<compile_context>
chip_gen: v6e
topology: v6e:2x2x1
jax: 0.10.0
libtpu: 0.0.40
codegen_flags: <defaults>
</compile_context>

<pallas_src>
import functools

import jax
import jax.numpy as jnp
from jax.experimental import pallas as pl
from jax.experimental.pallas import tpu as pltpu


def _round_up(x, m):
    return ((x + m - 1) // m) * m


def drugncf_kernel(u_ref, v_ref, v1_ref, feat_ref,
                   w1u_ref, w1v_ref, b1_ref, w2_ref,
                   ww1_ref, bw1_ref, ww2_ref, bw2_ref,
                   g_ref, out_ref):
    """One batch tile of DrugNCFwoshare.

    Streams : u, v, v1 (TB, k) bf16; feat (TB, F) f32 (binary fingerprints).
    Weights : bf16 MXU operands, f32 biases; gw/gb scalars live in SMEM.
    Deep    : h    = sigmoid(U @ w1u + V @ w1v + b1)        (bf16 MXU, f32 acc)
    Wide    : wh   = relu(feat_bf16 @ ww1 + bw1)
              wide = wh_bf16 @ ww2 + bw2
    Combine : out  = sigmoid( sum(h*w2_row + gw*(wide*V1), axis=1) + gb )
              (single fused cross-lane reduce; dropout is identity at inference)
    """
    u = u_ref[...]                                    # (TB, k)  bf16
    v = v_ref[...]                                    # (TB, k)  bf16
    f = feat_ref[...].astype(jnp.bfloat16)            # binary 0/1 -> exact in bf16

    # ---- deep tower: [U|V] @ w1 as two un-padded K=k bf16 matmuls -----------
    zd = (jnp.dot(u, w1u_ref[...], preferred_element_type=jnp.float32)
          + jnp.dot(v, w1v_ref[...], preferred_element_type=jnp.float32)
          + b1_ref[...])
    h = jax.nn.sigmoid(zd)                            # (TB, k)  f32

    # ---- wide tower ----------------------------------------------------------
    wh = jnp.maximum(
        jnp.dot(f, ww1_ref[...], preferred_element_type=jnp.float32) + bw1_ref[...],
        0.0)                                          # (TB, Hw) f32
    wide = (jnp.dot(wh.astype(jnp.bfloat16), ww2_ref[...],
                    preferred_element_type=jnp.float32)
            + bw2_ref[...])                           # (TB, k)  f32

    # ---- fused combine: one XLU reduce ---------------------------------------
    v1 = v1_ref[...].astype(jnp.float32)              # (TB, k)
    gw = g_ref[0]
    gb = g_ref[1]
    score = jnp.sum(h * w2_ref[...] + (gw * v1) * wide, axis=1, keepdims=True) + gb
    out_ref[...] = jax.nn.sigmoid(score)              # (TB, 1)  f32


def _est_vmem_bytes(tb, k, F, Hw):
    """VMEM footprint estimate: double-buffered streams + f32 intermediates."""
    per_row_in = 3 * k * 2 + F * 4                       # U,V,V1 bf16 + feat f32
    per_row_out = 4                                      # (TB,1) f32 output
    per_row_tmp = (4 * k + 2 * Hw) * 4 + (F + Hw) * 2    # h/wide/v1/products f32, bf16 casts
    weights = 2 * ((2 * k * k + F * Hw + Hw * k) * 2 + (3 * k + Hw) * 4)
    return tb * (2 * (per_row_in + per_row_out) + per_row_tmp) + weights + (1 << 20)


@functools.partial(jax.jit, static_argnames=("block_b",))
def drugncf_forward(params, x_idx, drug_features, *, block_b=8192):
    """Embedding gathers in JAX (bf16 tables); all fused math in one Pallas call."""
    k = params["W"].shape[1]
    user_idx = x_idx[:, 0]
    item_idx = x_idx[:, 1]
    # Gather from bf16-cast tables -> streamed rows are already bf16 in HBM.
    U = params["W"].astype(jnp.bfloat16)[user_idx]        # (B, k)
    V = params["H"].astype(jnp.bfloat16)[item_idx]        # (B, k)
    V1 = params["H1"].astype(jnp.bfloat16)[item_idx]      # (B, k)
    feat = drug_features.astype(jnp.float32)              # (B, F); bf16 cast happens in-kernel
    # TODO(synk): when the embedding tables fit in VMEM, scalar-prefetch the
    #             indices and gather in-kernel to drop this last HBM round trip.

    B = U.shape[0]
    F = feat.shape[1]
    Hw = params["ww1"].shape[1]

    # bf16 MXU weights, f32 biases.
    w1u = params["w1"][:k].astype(jnp.bfloat16)            # (k, k)
    w1v = params["w1"][k:].astype(jnp.bfloat16)            # (k, k)
    ww1 = params["ww1"].astype(jnp.bfloat16)               # (F, Hw)
    ww2 = params["ww2"].astype(jnp.bfloat16)               # (Hw, k)
    b1 = params["b1"].astype(jnp.float32)                  # (1, k)
    bw1 = params["bw1"].astype(jnp.float32)                # (1, Hw)
    bw2 = params["bw2"].astype(jnp.float32)                # (1, k)
    w2row = params["w2"].reshape(1, k).astype(jnp.float32) # (1, k)
    g = jnp.concatenate([params["gw"].reshape(-1),
                         params["gb"].reshape(-1)]).astype(jnp.float32)  # (2,)
    # TODO(synk): if layer.MultiLayerPerceptron carries BatchNorm1d, fold its
    #             inference-time affine into ww1/bw1 before calling this kernel.

    # ---- generation-aware batch tiling ---------------------------------------
    try:
        kind = jax.devices()[0].device_kind.lower()
    except Exception:  # pragma: no cover
        kind = ""
    two_cores = "v7" in kind                      # v7x: 2 TensorCores / chip

    B_pad = max(8, _round_up(B, 8))
    block_b = max(8, _round_up(int(block_b), 8))
    if two_cores and B_pad >= 4 * 1024:
        # >= 4 grid steps (2 per core), but never shrink a step below 1024 rows.
        block_b_eff = min(block_b, max(1024, _round_up(pl.cdiv(B, 4), 8)))
    else:
        # single TC (v5e/v6e): just take the biggest tile the batch allows.
        block_b_eff = min(block_b, B_pad)

    # VMEM budget: 26 MiB/core on v7x (64 MiB shared), 64 MiB elsewhere (128 MiB).
    vmem_cap = (26 if two_cores else 64) * 1024 * 1024
    while _est_vmem_bytes(block_b_eff, k, F, Hw) > vmem_cap and block_b_eff > 512:
        block_b_eff = max(512, _round_up(block_b_eff // 2, 8))

    est_vmem = _est_vmem_bytes(block_b_eff, k, F, Hw)
    default_scoped = (32 if two_cores else 16) * 1024 * 1024
    vmem_limit = (min(max(int(est_vmem * 1.3), default_scoped), vmem_cap)
                  if est_vmem > (3 * default_scoped) // 4 else None)

    grid = (pl.cdiv(B, block_b_eff),)

    def row_spec(cols):            # batch-streamed arrays
        return pl.BlockSpec((block_b_eff, cols), lambda i: (i, 0))

    def full_spec(shape):          # weights: same block every step (DMA'd once)
        return pl.BlockSpec(shape, lambda i: (0, 0))

    smem_spec = pl.BlockSpec(memory_space=pltpu.MemorySpace.SMEM)

    out = pl.pallas_call(
        drugncf_kernel,
        out_shape=jax.ShapeDtypeStruct((B, 1), jnp.float32),
        grid=grid,
        in_specs=[
            row_spec(k),           # U   (bf16)
            row_spec(k),           # V   (bf16)
            row_spec(k),           # V1  (bf16)
            row_spec(F),           # drug features (f32, binary)
            full_spec((k, k)),     # w1[:k]  (bf16)
            full_spec((k, k)),     # w1[k:]  (bf16)
            full_spec((1, k)),     # b1
            full_spec((1, k)),     # w2 as a row vector
            full_spec((F, Hw)),    # ww1 (bf16)
            full_spec((1, Hw)),    # bw1
            full_spec((Hw, k)),    # ww2 (bf16)
            full_spec((1, k)),     # bw2
            smem_spec,             # [gw, gb] scalars in SMEM
        ],
        out_specs=row_spec(1),
        compiler_params=pltpu.CompilerParams(
            dimension_semantics=("parallel",),
            vmem_limit_bytes=vmem_limit),
    )(U, V, V1, feat, w1u, w1v, b1, w2row, ww1, bw1, ww2, bw2, g)

    return out.reshape(-1)


def init_params(key, *, num_users, num_items, embed_dim, feat_dim, wide_hidden):
    """Deterministic synthetic parameters (PyTorch-default-like uniform init)."""
    k = embed_dim
    keys = jax.random.split(key, 12)

    def unif(kk, shape, fan_in):
        bound = 1.0 / jnp.sqrt(jnp.float32(fan_in))
        return jax.random.uniform(kk, shape, jnp.float32, -bound, bound)

    return {
        # embedding tables (num+1 rows, as in the module)
        "W":  jax.random.normal(keys[0], (num_users + 1, k), jnp.float32) * 0.1,
        "H":  jax.random.normal(keys[1], (num_items + 1, k), jnp.float32) * 0.1,
        "H1": jax.random.normal(keys[2], (num_items + 1, k), jnp.float32) * 0.1,
        # mlp_deep: Linear(2k, k) (stored transposed: x @ w1 + b1), Linear(k,1,no bias)
        "w1": unif(keys[3], (2 * k, k), 2 * k),
        "b1": unif(keys[4], (1, k), 2 * k),
        "w2": unif(keys[5], (k, 1), k),
        # mlp_wide: Linear(F, Hw) -> ReLU -> Dropout -> Linear(Hw, k)
        "ww1": unif(keys[6], (feat_dim, wide_hidden), feat_dim),
        "bw1": unif(keys[7], (1, wide_hidden), feat_dim),
        "ww2": unif(keys[8], (wide_hidden, k), wide_hidden),
        "bw2": unif(keys[9], (1, k), wide_hidden),
        # linear_g: Linear(1, 1)
        "gw": jnp.array([[0.7]], jnp.float32),
        "gb": jnp.array([[0.1]], jnp.float32),
    }


def reference_forward(params, x_idx, drug_features, *, quantized=False):
    """Pure-JAX reference. `quantized=True` mirrors the kernel's bf16 rounding."""
    f32 = jnp.float32
    if quantized:
        q = lambda a: a.astype(jnp.bfloat16).astype(f32)
    else:
        q = lambda a: a.astype(f32)
    U = q(params["W"])[x_idx[:, 0]]
    V = q(params["H"])[x_idx[:, 1]]
    V1 = q(params["H1"])[x_idx[:, 1]]
    feat = q(drug_features)
    w1, ww1, ww2 = q(params["w1"]), q(params["ww1"]), q(params["ww2"])

    z = jnp.concatenate([U, V], axis=1)
    h = jax.nn.sigmoid(z @ w1 + params["b1"])
    dnn = h @ params["w2"]
    wh = jnp.maximum(feat @ ww1 + params["bw1"], 0.0)
    if quantized:
        wh = wh.astype(jnp.bfloat16).astype(f32)
    wide = wh @ ww2 + params["bw2"]
    s = jnp.sum(wide * V1, axis=1, keepdims=True)
    g = s * params["gw"] + params["gb"]
    return jax.nn.sigmoid((g + dnn).reshape(-1))


if __name__ == "__main__":
    # Small, module-consistent shapes.
    num_users, num_items = 20, 10
    embed_dim = 32           # k
    field_dims = [64]        # sum(field_dims) = drug-feature dim F
    feat_dim = sum(field_dims)
    wide_hidden = 32         # mlp_dims_wide = [32]
    batch = 512

    key = jax.random.PRNGKey(0)
    k_param, k_u, k_i, k_f = jax.random.split(key, 4)

    params = init_params(k_param, num_users=num_users, num_items=num_items,
                         embed_dim=embed_dim, feat_dim=feat_dim,
                         wide_hidden=wide_hidden)

    user_idx = jax.random.randint(k_u, (batch,), 0, num_users + 1)
    item_idx = jax.random.randint(k_i, (batch,), 0, num_items + 1)
    x_idx = jnp.stack([user_idx, item_idx], axis=1).astype(jnp.int32)   # (B, 2)
    # drug fingerprint-like features (binary), cast to float
    drug_features = (jax.random.uniform(k_f, (batch, feat_dim)) > 0.5
                     ).astype(jnp.float32)

    out = drugncf_forward(params, x_idx, drug_features)
    out = jax.block_until_ready(out)

    # Tight check vs. a reference mirroring the kernel's bf16 rounding.
    ref_q = reference_forward(params, x_idx, drug_features, quantized=True)
    # Looser semantic check vs. the full-precision module math.
    ref_f = reference_forward(params, x_idx, drug_features, quantized=False)

    assert out.shape == (batch,)
    assert jnp.allclose(out, ref_q, atol=4e-3, rtol=4e-3), "mismatch vs bf16-quantized reference"
    assert jnp.allclose(out, ref_f, atol=3e-2, rtol=3e-2), "mismatch vs f32 reference"

    print("KERNEL_OK")
</pallas_src>

<mosaic_0001>
module attributes {stable_mosaic.version = 11 : i64} {
  func.func @drugncf_kernel(%arg0: i32, %arg1: memref<512x32xbf16, #tpu.memory_space<vmem>>, %arg2: memref<512x32xbf16, #tpu.memory_space<vmem>>, %arg3: memref<512x32xbf16, #tpu.memory_space<vmem>>, %arg4: memref<512x64xf32, #tpu.memory_space<vmem>>, %arg5: memref<32x32xbf16, #tpu.memory_space<vmem>>, %arg6: memref<32x32xbf16, #tpu.memory_space<vmem>>, %arg7: memref<1x32xf32, #tpu.memory_space<vmem>>, %arg8: memref<1x32xf32, #tpu.memory_space<vmem>>, %arg9: memref<64x32xbf16, #tpu.memory_space<vmem>>, %arg10: memref<1x32xf32, #tpu.memory_space<vmem>>, %arg11: memref<32x32xbf16, #tpu.memory_space<vmem>>, %arg12: memref<1x32xf32, #tpu.memory_space<vmem>>, %arg13: memref<2xf32, #tpu.memory_space<smem>>, %arg14: memref<512x1xf32, #tpu.memory_space<vmem>>) attributes {dimension_semantics = [#tpu.dimension_semantics<parallel>], iteration_bounds = array<i64: 1>, scalar_prefetch = 0 : i64, scratch_operands = 0 : i64, tpu.core_type = #tpu.core_type<tc>, window_params = [{transform_indices = @transform_0, window_bounds = array<i64: 512, 32>}, {transform_indices = @transform_1, window_bounds = array<i64: 512, 32>}, {transform_indices = @transform_2, window_bounds = array<i64: 512, 32>}, {transform_indices = @transform_3, window_bounds = array<i64: 512, 64>}, {pipeline_mode = #tpu.pipeline_mode<synchronous>, transform_indices = @transform_4, window_bounds = array<i64: 32, 32>}, {pipeline_mode = #tpu.pipeline_mode<synchronous>, transform_indices = @transform_5, window_bounds = array<i64: 32, 32>}, {pipeline_mode = #tpu.pipeline_mode<synchronous>, transform_indices = @transform_6, window_bounds = array<i64: 1, 32>}, {pipeline_mode = #tpu.pipeline_mode<synchronous>, transform_indices = @transform_7, window_bounds = array<i64: 1, 32>}, {pipeline_mode = #tpu.pipeline_mode<synchronous>, transform_indices = @transform_8, window_bounds = array<i64: 64, 32>}, {pipeline_mode = #tpu.pipeline_mode<synchronous>, transform_indices = @transform_9, window_bounds = array<i64: 1, 32>}, {pipeline_mode = #tpu.pipeline_mode<synchronous>, transform_indices = @transform_10, window_bounds = array<i64: 32, 32>}, {pipeline_mode = #tpu.pipeline_mode<synchronous>, transform_indices = @transform_11, window_bounds = array<i64: 1, 32>}, {transform_indices = @transform_12, window_bounds = array<i64: 2>}, {transform_indices = @transform_13, window_bounds = array<i64: 512, 1>}]} {
    %c0 = arith.constant 0 : index
    %c0_0 = arith.constant 0 : index
    %0 = vector.load %arg1[%c0, %c0_0] : memref<512x32xbf16, #tpu.memory_space<vmem>>, vector<512x32xbf16>
    %c0_1 = arith.constant 0 : index
    %c0_2 = arith.constant 0 : index
    %1 = vector.load %arg2[%c0_1, %c0_2] : memref<512x32xbf16, #tpu.memory_space<vmem>>, vector<512x32xbf16>
    %c0_3 = arith.constant 0 : index
    %c0_4 = arith.constant 0 : index
    %2 = vector.load %arg4[%c0_3, %c0_4] : memref<512x64xf32, #tpu.memory_space<vmem>>, vector<512x64xf32>
    %3 = arith.truncf %2 : vector<512x64xf32> to vector<512x64xbf16>
    %c0_5 = arith.constant 0 : index
    %c0_6 = arith.constant 0 : index
    %4 = vector.load %arg5[%c0_5, %c0_6] : memref<32x32xbf16, #tpu.memory_space<vmem>>, vector<32x32xbf16>
    %cst = arith.constant dense<0.000000e+00> : vector<512x32xf32>
    %5 = tpu.matmul %0, %4, %cst {dimension_numbers = #tpu.dot_dimension_numbers<[1], [0], [0], [1], [0, 0, 1, 1], [], []>} : vector<512x32xbf16>, vector<32x32xbf16>, vector<512x32xf32> -> vector<512x32xf32>
    %c0_7 = arith.constant 0 : index
    %c0_8 = arith.constant 0 : index
    %6 = vector.load %arg6[%c0_7, %c0_8] : memref<32x32xbf16, #tpu.memory_space<vmem>>, vector<32x32xbf16>
    %cst_9 = arith.constant dense<0.000000e+00> : vector<512x32xf32>
    %7 = tpu.matmul %1, %6, %cst_9 {dimension_numbers = #tpu.dot_dimension_numbers<[1], [0], [0], [1], [0, 0, 1, 1], [], []>} : vector<512x32xbf16>, vector<32x32xbf16>, vector<512x32xf32> -> vector<512x32xf32>
    %8 = arith.addf %5, %7 : vector<512x32xf32>
    %c0_10 = arith.constant 0 : index
    %c0_11 = arith.constant 0 : index
    %9 = vector.load %arg7[%c0_10, %c0_11] : memref<1x32xf32, #tpu.memory_space<vmem>>, vector<1x32xf32>
    %10 = vector.broadcast %9 : vector<1x32xf32> to vector<512x32xf32>
    %11 = arith.addf %8, %10 : vector<512x32xf32>
    %12 = arith.negf %11 : vector<512x32xf32>
    %13 = math.exp %12 : vector<512x32xf32>
    %cst_12 = arith.constant 1.000000e+00 : f32
    %14 = vector.broadcast %cst_12 : f32 to vector<512x32xf32>
    %15 = arith.addf %14, %13 : vector<512x32xf32>
    %16 = arith.divf %14, %15 : vector<512x32xf32>
    %c0_13 = arith.constant 0 : index
    %c0_14 = arith.constant 0 : index
    %17 = vector.load %arg9[%c0_13, %c0_14] : memref<64x32xbf16, #tpu.memory_space<vmem>>, vector<64x32xbf16>
    %cst_15 = arith.constant dense<0.000000e+00> : vector<512x32xf32>
    %18 = tpu.matmul %3, %17, %cst_15 {dimension_numbers = #tpu.dot_dimension_numbers<[1], [0], [0], [1], [0, 0, 1, 1], [], []>} : vector<512x64xbf16>, vector<64x32xbf16>, vector<512x32xf32> -> vector<512x32xf32>
    %c0_16 = arith.constant 0 : index
    %c0_17 = arith.constant 0 : index
    %19 = vector.load %arg10[%c0_16, %c0_17] : memref<1x32xf32, #tpu.memory_space<vmem>>, vector<1x32xf32>
    %20 = vector.broadcast %19 : vector<1x32xf32> to vector<512x32xf32>
    %21 = arith.addf %18, %20 : vector<512x32xf32>
    %cst_18 = arith.constant 0.000000e+00 : f32
    %22 = vector.broadcast %cst_18 : f32 to vector<512x32xf32>
    %23 = arith.maximumf %21, %22 : vector<512x32xf32>
    %24 = arith.truncf %23 : vector<512x32xf32> to vector<512x32xbf16>
    %c0_19 = arith.constant 0 : index
    %c0_20 = arith.constant 0 : index
    %25 = vector.load %arg11[%c0_19, %c0_20] : memref<32x32xbf16, #tpu.memory_space<vmem>>, vector<32x32xbf16>
    %cst_21 = arith.constant dense<0.000000e+00> : vector<512x32xf32>
    %26 = tpu.matmul %24, %25, %cst_21 {dimension_numbers = #tpu.dot_dimension_numbers<[1], [0], [0], [1], [0, 0, 1, 1], [], []>} : vector<512x32xbf16>, vector<32x32xbf16>, vector<512x32xf32> -> vector<512x32xf32>
    %c0_22 = arith.constant 0 : index
    %c0_23 = arith.constant 0 : index
    %27 = vector.load %arg12[%c0_22, %c0_23] : memref<1x32xf32, #tpu.memory_space<vmem>>, vector<1x32xf32>
    %28 = vector.broadcast %27 : vector<1x32xf32> to vector<512x32xf32>
    %29 = arith.addf %26, %28 : vector<512x32xf32>
    %c0_24 = arith.constant 0 : index
    %c0_25 = arith.constant 0 : index
    %30 = vector.load %arg3[%c0_24, %c0_25] : memref<512x32xbf16, #tpu.memory_space<vmem>>, vector<512x32xbf16>
    %31 = arith.extf %30 : vector<512x32xbf16> to vector<512x32xf32>
    %c0_26 = arith.constant 0 : index
    %32 = memref.load %arg13[%c0_26] : memref<2xf32, #tpu.memory_space<smem>>
    %c1 = arith.constant 1 : index
    %33 = memref.load %arg13[%c1] : memref<2xf32, #tpu.memory_space<smem>>
    %c0_27 = arith.constant 0 : index
    %c0_28 = arith.constant 0 : index
    %34 = vector.load %arg8[%c0_27, %c0_28] : memref<1x32xf32, #tpu.memory_space<vmem>>, vector<1x32xf32>
    %35 = vector.broadcast %34 : vector<1x32xf32> to vector<512x32xf32>
    %36 = arith.mulf %16, %35 : vector<512x32xf32>
    %37 = vector.broadcast %32 : f32 to vector<512x32xf32>
    %38 = arith.mulf %37, %31 : vector<512x32xf32>
    %39 = arith.mulf %38, %29 : vector<512x32xf32>
    %40 = arith.addf %36, %39 : vector<512x32xf32>
    %cst_29 = arith.constant dense<0.000000e+00> : vector<512xf32>
    %41 = vector.multi_reduction <add>, %40, %cst_29 [1] : vector<512x32xf32> to vector<512xf32>
    %42 = vector.shape_cast %41 : vector<512xf32> to vector<512x1xf32>
    %43 = vector.broadcast %33 : f32 to vector<512x1xf32>
    %44 = arith.addf %42, %43 : vector<512x1xf32>
    %45 = arith.negf %44 : vector<512x1xf32>
    %46 = math.exp %45 : vector<512x1xf32>
    %cst_30 = arith.constant 1.000000e+00 : f32
    %47 = vector.broadcast %cst_30 : f32 to vector<512x1xf32>
    %48 = arith.addf %47, %46 : vector<512x1xf32>
    %49 = arith.divf %47, %48 : vector<512x1xf32>
    %c0_31 = arith.constant 0 : index
    %c0_32 = arith.constant 0 : index
    %50 = vector.load %arg14[%c0_31, %c0_32] : memref<512x1xf32, #tpu.memory_space<vmem>>, vector<512x1xf32>
    tpu.vector_store %arg14[%c0_31, %c0_32], %49 {strides = array<i32>} : memref<512x1xf32, #tpu.memory_space<vmem>>, vector<512x1xf32>,
    return
  }
  func.func @transform_0(%arg0: i32) -> (i32, i32) {
    %c0_i32 = arith.constant 0 : i32
    %c0_i32_0 = arith.constant 0 : i32
    return %arg0, %c0_i32 : i32, i32
  }
  func.func @transform_1(%arg0: i32) -> (i32, i32) {
    %c0_i32 = arith.constant 0 : i32
    %c0_i32_0 = arith.constant 0 : i32
    return %arg0, %c0_i32 : i32, i32
  }
  func.func @transform_2(%arg0: i32) -> (i32, i32) {
    %c0_i32 = arith.constant 0 : i32
    %c0_i32_0 = arith.constant 0 : i32
    return %arg0, %c0_i32 : i32, i32
  }
  func.func @transform_3(%arg0: i32) -> (i32, i32) {
    %c0_i32 = arith.constant 0 : i32
    %c0_i32_0 = arith.constant 0 : i32
    return %arg0, %c0_i32 : i32, i32
  }
  func.func @transform_4(%arg0: i32) -> (i32, i32) {
    %c0_i32 = arith.constant 0 : i32
    %c0_i32_0 = arith.constant 0 : i32
    %c0_i32_1 = arith.constant 0 : i32
    return %c0_i32, %c0_i32_0 : i32, i32
  }
  func.func @transform_5(%arg0: i32) -> (i32, i32) {
    %c0_i32 = arith.constant 0 : i32
    %c0_i32_0 = arith.constant 0 : i32
    %c0_i32_1 = arith.constant 0 : i32
    return %c0_i32, %c0_i32_0 : i32, i32
  }
  func.func @transform_6(%arg0: i32) -> (i32, i32) {
    %c0_i32 = arith.constant 0 : i32
    %c0_i32_0 = arith.constant 0 : i32
    %c0_i32_1 = arith.constant 0 : i32
    return %c0_i32, %c0_i32_0 : i32, i32
  }
  func.func @transform_7(%arg0: i32) -> (i32, i32) {
    %c0_i32 = arith.constant 0 : i32
    %c0_i32_0 = arith.constant 0 : i32
    %c0_i32_1 = arith.constant 0 : i32
    return %c0_i32, %c0_i32_0 : i32, i32
  }
  func.func @transform_8(%arg0: i32) -> (i32, i32) {
    %c0_i32 = arith.constant 0 : i32
    %c0_i32_0 = arith.constant 0 : i32
    %c0_i32_1 = arith.constant 0 : i32
    return %c0_i32, %c0_i32_0 : i32, i32
  }
  func.func @transform_9(%arg0: i32) -> (i32, i32) {
    %c0_i32 = arith.constant 0 : i32
    %c0_i32_0 = arith.constant 0 : i32
    %c0_i32_1 = arith.constant 0 : i32
    return %c0_i32, %c0_i32_0 : i32, i32
  }
  func.func @transform_10(%arg0: i32) -> (i32, i32) {
    %c0_i32 = arith.constant 0 : i32
    %c0_i32_0 = arith.constant 0 : i32
    %c0_i32_1 = arith.constant 0 : i32
    return %c0_i32, %c0_i32_0 : i32, i32
  }
  func.func @transform_11(%arg0: i32) -> (i32, i32) {
    %c0_i32 = arith.constant 0 : i32
    %c0_i32_0 = arith.constant 0 : i32
    %c0_i32_1 = arith.constant 0 : i32
    return %c0_i32, %c0_i32_0 : i32, i32
  }
  func.func @transform_12(%arg0: i32) -> i32 {
    %c0_i32 = arith.constant 0 : i32
    %c0_i32_0 = arith.constant 0 : i32
    return %c0_i32 : i32
  }
  func.func @transform_13(%arg0: i32) -> (i32, i32) {
    %c0_i32 = arith.constant 0 : i32
    %c0_i32_0 = arith.constant 0 : i32
    return %arg0, %c0_i32 : i32, i32
  }
}

</mosaic_0001>

<bundles_post_ra>
// kernel: drugncf_forward.1
= control target key start
LH: loop header
LB: loop body
LE: loop exit
PB: predicated region body
PF: predicated region fallthrough
CT: control target
= control target key end

     0   :  { %18 = vsyncpa [#allocation3], 0  ;;  %s7458_s0 = inlined_call_operand.vmem [shape: bf16[512,32], index: 0, kind: input, shape index: {}]   ;;  %s7459_s1 = inlined_call_operand.vmem [shape: bf16[512,32], index: 1, kind: input, shape index: {}]   ;;  %s7460_s2 = inlined_call_operand.vmem [shape: bf16[512,32], index: 2, kind: input, shape index: {}]   ;;  %s7461_s3 = inlined_call_operand.vmem [shape: f32[512,64], index: 3, kind: input, shape index: {}]   ;;  %s7462_s4 = inlined_call_operand.vmem [shape: bf16[32,32], index: 4, kind: input, shape index: {}]   ;;  %s7463_s5 = inlined_call_operand.vmem [shape: bf16[32,32], index: 5, kind: input, shape index: {}]   ;;  %s7464_s6 = inlined_call_operand.vmem [shape: f32[1,32], index: 6, kind: input, shape index: {}]   ;;  %s7465_s7 = inlined_call_operand.vmem [shape: f32[1,32], index: 7, kind: input, shape index: {}]   ;;  %s7466_s8 = inlined_call_operand.vmem [shape: bf16[64,32], index: 8, kind: input, shape index: {}]   ;;  %s7467_s9 = inlined_call_operand.vmem [shape: f32[1,32], index: 9, kind: input, shape index: {}]   ;;  %s7468_s10 = inlined_call_operand.vmem [shape: bf16[32,32], index: 10, kind: input, shape index: {}]   ;;  %s7469_s11 = inlined_call_operand.vmem [shape: f32[1,32], index: 11, kind: input, shape index: {}]   ;;  %s7470_s12 = inlined_call_operand.vmem [shape: f32[2], index: 12, kind: input, shape index: {}]   ;;  %s7471_s13 = inlined_call_operand.vmem [shape: f32[512,1], index: 13, kind: output, shape index: {}]  }
   0x1   :  { %s49_s27 = sshll.u32 %s7470_s12, 4  ;;  %s50_s27 = int_to_ptr.vmem [resolvable:$true] %s49_s27 }
   0x2   :  { %s5392_s28 = scalar_lea.vmem %s50_s27, 16  ;;  %p5397_p1 = scmp.lt.s32.totalorder %s50_s27, %s50_s27 }
   0x3   :  { %p5393_p0 = scmp.ne.s32.totalorder %s50_s27, %s5392_s28  ;;  %p5398_p2 = scmp.lt.s32.totalorder %s5392_s28, %s5392_s28 }
   0x5   :  { %p5399_p3 = por %p5398_p2, %p5397_p1 }
   0x7   :  { %p5400_p4 = pnand %p5399_p3, %p5393_p0 }
   0x9   :  { %5403 = shalt.err (!%p5400_p4)
}
   0xa   :  { %s5406_s29 = smov [#allocation2]  }
   0xb   :  { %52 = dma.vmem_to_smem %s50_s27, 16, %s5406_s29, [#allocation3]  }
   0xc   :  { %5404 = dma.done.wait [#allocation3], 16  }
   0xd   :  { %5405 = vsyncadd [#allocation3], 4294967280 }
   0xe   :  { %56 = sfence }
   0xf   :  { %v4803_v0 = vld [vmem:[%s7463_s5 + $0x8] sm:$0xff]   ;;  %v4805_v2 = vld [vmem:[%s7463_s5] sm:$0xff]   ;;  %vm462_vm0 = vcmask 261120   ;;  %v4811_v8 = vld [vmem:[%s7466_s8 + $0x18] sm:$0xff]   ;;  %vm1899_vm1 = vcmask 523264   ;;  %vm3824_vm2 = vcmask 7168  }
  0x10   :  { %v4804_v1 = vld [vmem:[%s7462_s4 + $0x8] sm:$0xff]   ;;  %4526 = vmatprep.subr.bf16.mxu0 %v4803_v0  ;;  %v4806_v3 = vld [vmem:[%s7462_s4] sm:$0xff]   ;;  %v4812_v9 = vld [vmem:[%s7459_s1 + $0x10] sm:$0xff]  }
  0x11   :  { %4594 = vmatprep.subr.bf16.mxu1 %v4804_v1  ;;  %4527 = vmatpush3.bf16.msra.mxu0 %v4803_v0  ;;  %v4807_v4 = vld [vmem:[%s7459_s1] sm:$0xff]   ;;  %v4809_v6 = vld [vmem:[%s7459_s1 + $0x8] sm:$0xff]   ;;  %v4813_v10 = vld [vmem:[%s7458_s0 + $0x10] sm:$0xff]  }
  0x12   :  { %4595 = vmatpush3.bf16.msra.mxu1 %v4804_v1  ;;  %4528 = vmatprep.subr.bf16.mxu0 %v4805_v2  ;;  %v4808_v5 = vld [vmem:[%s7458_s0] sm:$0xff]   ;;  %v4810_v7 = vld [vmem:[%s7458_s0 + $0x8] sm:$0xff]   ;;  %v4814_v11 = vld [vmem:[%s7459_s1 + $0x18] sm:$0xff]  }
  0x13   :  { %4596 = vmatprep.subr.bf16.mxu1 %v4806_v3  ;;  %4530 = vmatprep.mubr.msk.bf16.mxu0 %vm462_vm0, %v4807_v4  ;;  %v4815_v12 = vld [vmem:[%s7458_s0 + $0x18] sm:$0xff]   ;;  %v4816_v13 = vld [vmem:[%s7459_s1 + $0x20] sm:$0xff]   ;;  %v4818_v15 = vld [vmem:[%s7459_s1 + $0x28] sm:$0xff]  }
  0x14   :  { %4598 = vmatprep.mubr.msk.bf16.mxu1 %vm462_vm0, %v4808_v5  ;;  %v4817_v14 = vld [vmem:[%s7458_s0 + $0x20] sm:$0xff]   ;;  %v4819_v16 = vld [vmem:[%s7458_s0 + $0x28] sm:$0xff]   ;;  %v4820_v17 = vld [vmem:[%s7459_s1 + $0x30] sm:$0xff]  }
  0x15   :  { %4529 = vmatpush3.bf16.msra.mxu0 %v4805_v2  ;;  %v4821_v18 = vld [vmem:[%s7458_s0 + $0x30] sm:$0xff]   ;;  %v4822_v20 = vld [vmem:[%s7459_s1 + $0x38] sm:$0xff]   ;;  %v4824_v22 = vld [vmem:[%s7459_s1 + $0x40] sm:$0xff]  }
  0x16   :  { %4597 = vmatpush3.bf16.msra.mxu1 %v4806_v3  ;;  %4662 = vmatprep.subr.bf16.mxu0 %v4811_v8  ;;  %v4828_v19 = vld [vmem:[%s7466_s8 + $0x10] sm:$0xff]   ;;  %v4823_v21 = vld [vmem:[%s7458_s0 + $0x38] sm:$0xff]   ;;  %v4825_v23 = vld [vmem:[%s7458_s0 + $0x40] sm:$0xff]  }
  0x17   :  { %v4826_v24 = vld [vmem:[%s7459_s1 + $0x48] sm:$0xff]   ;;  %v4829_v26 = vld [vmem:[%s7459_s1 + $0x50] sm:$0xff]   ;;  %v4831_v29 = vld [vmem:[%s7459_s1 + $0x58] sm:$0xff]  }
  0x18   :  { %4531 = vmatmul.mubr.msk.bf16.vlgmr.msra.gmra.mxu0 %vm462_vm0, %v4809_v6  ;;  %v4827_v25 = vld [vmem:[%s7458_s0 + $0x48] sm:$0xff]   ;;  %v4830_v27 = vld [vmem:[%s7458_s0 + $0x50] sm:$0xff]   ;;  %v4832_v30 = vld [vmem:[%s7458_s0 + $0x58] sm:$0xff]  }
  0x19   :  { %4599 = vmatmul.mubr.msk.bf16.vlgmr.msra.gmra.mxu1 %vm462_vm0, %v4810_v7  ;;  %4663 = vmatpush3.bf16.msra.mxu0 %v4811_v8  ;;  %v4845_v28 = vld [vmem:[%s7466_s8 + $0x8] sm:$0xff]   ;;  %v4833_v31 = vld [vmem:[%s7459_s1 + $0x60] sm:$0xff]   ;;  %v4837_v35 = vld [vmem:[%s7459_s1 + $0x70] sm:$0xff]  }
  0x1a   :  { %4534 = vmatprep.mubr.msk.bf16.mxu0 %vm462_vm0, %v4812_v9  ;;  %4602 = vmatprep.mubr.msk.bf16.mxu1 %vm462_vm0, %v4813_v10  ;;  %v4834_v32 = vld [vmem:[%s7458_s0 + $0x60] sm:$0xff]   ;;  %v4835_v33 = vld [vmem:[%s7459_s1 + $0x68] sm:$0xff]   ;;  %v4838_v36 = vld [vmem:[%s7458_s0 + $0x70] sm:$0xff]  }
  0x1b   :  { %4664 = vmatprep.subr.bf16.mxu0 %v4828_v19  ;;  %v4836_v34 = vld [vmem:[%s7458_s0 + $0x68] sm:$0xff]   ;;  %v4862_v37 = vld [vmem:[%s7466_s8] sm:$0xff]   ;;  %v4839_v38 = vld [vmem:[%s7459_s1 + $0x78] sm:$0xff]  }
  0x1c   :  { %v4840_v39 = vld [vmem:[%s7458_s0 + $0x78] sm:$0xff]   ;;  %v4841_v40 = vld [vmem:[%s7459_s1 + $0x80] sm:$0xff]   ;;  %v4843_v42 = vld [vmem:[%s7459_s1 + $0x88] sm:$0xff]  }
  0x1d   :  { %4665 = vmatpush3.bf16.msra.mxu0 %v4828_v19  ;;  %v4842_v41 = vld [vmem:[%s7458_s0 + $0x80] sm:$0xff]   ;;  %v4844_v43 = vld [vmem:[%s7458_s0 + $0x88] sm:$0xff]   ;;  %v4846_v44 = vld [vmem:[%s7459_s1 + $0x90] sm:$0xff]  }
  0x1e   :  { %4666 = vmatprep.subr.bf16.mxu0 %v4845_v28  ;;  %v4847_v45 = vld [vmem:[%s7458_s0 + $0x90] sm:$0xff]   ;;  %v4848_v46 = vld [vmem:[%s7459_s1 + $0x98] sm:$0xff]   ;;  %v4850_v48 = vld [vmem:[%s7459_s1 + $0xa0] sm:$0xff]  }
  0x1f   :  { %v4849_v47 = vld [vmem:[%s7458_s0 + $0x98] sm:$0xff]   ;;  %v4851_v49 = vld [vmem:[%s7458_s0 + $0xa0] sm:$0xff]   ;;  %v4852_v50 = vld [vmem:[%s7459_s1 + $0xa8] sm:$0xff]  }
  0x20   :  { %4535 = vmatmul.mubr.msk.bf16.gmra.mxu0 %vm462_vm0, %v4814_v11  ;;  %v4853_v51 = vld [vmem:[%s7458_s0 + $0xa8] sm:$0xff]   ;;  %v4854_v52 = vld [vmem:[%s7459_s1 + $0xb0] sm:$0xff]   ;;  %v4856_v54 = vld [vmem:[%s7459_s1 + $0xb8] sm:$0xff]  }
  0x21   :  { %4603 = vmatmul.mubr.msk.bf16.gmra.mxu1 %vm462_vm0, %v4815_v12  ;;  %4538 = vmatprep.mubr.msk.bf16.mxu0 %vm462_vm0, %v4816_v13  ;;  %v4855_v53 = vld [vmem:[%s7458_s0 + $0xb0] sm:$0xff]   ;;  %v4857_v55 = vld [vmem:[%s7458_s0 + $0xb8] sm:$0xff]   ;;  %v4858_v56 = vld [vmem:[%s7459_s1 + $0xc0] sm:$0xff]  }
  0x22   :  { %4606 = vmatprep.mubr.msk.bf16.mxu1 %vm462_vm0, %v4817_v14  ;;  %4667 = vmatpush3.bf16.msra.mxu0 %v4845_v28  ;;  %v4859_v57 = vld [vmem:[%s7458_s0 + $0xc0] sm:$0xff]   ;;  %v4860_v58 = vld [vmem:[%s7459_s1 + $0xc8] sm:$0xff]   ;;  %v4863_v60 = vld [vmem:[%s7459_s1 + $0xd0] sm:$0xff]  }
  0x23   :  { %4668 = vmatprep.subr.bf16.mxu0 %v4862_v37  ;;  %v4861_v59 = vld [vmem:[%s7458_s0 + $0xc8] sm:$0xff]   ;;  %v4864_v61 = vld [vmem:[%s7458_s0 + $0xd0] sm:$0xff]   ;;  %v4865_v62 = vld [vmem:[%s7459_s1 + $0xd8] sm:$0xff]  }
  0x24   :  { %v4866_v63 = vld [vmem:[%s7458_s0 + $0xd8] sm:$0xff]   ;;  %v4867_v0 = vld [vmem:[%s7459_s1 + $0xe0] sm:$0xff]   ;;  %v4875_v2 = vld [vmem:[%s7468_s10 + $0x8] sm:$0xff]  }
  0x25   :  { %v4868_v1 = vld [vmem:[%s7458_s0 + $0xe0] sm:$0xff]   ;;  %4734 = vmatprep.subr.bf16.mxu1 %v4875_v2  ;;  %v4869_v3 = vld [vmem:[%s7459_s1 + $0xe8] sm:$0xff]   ;;  %v4871_v5 = vld [vmem:[%s7459_s1 + $0xf0] sm:$0xff]  }
  0x26   :  { %4669 = vmatpush3.bf16.msra.mxu0 %v4862_v37  ;;  %4735 = vmatpush3.bf16.msra.mxu1 %v4875_v2  ;;  %v4870_v4 = vld [vmem:[%s7458_s0 + $0xe8] sm:$0xff]   ;;  %v4872_v6 = vld [vmem:[%s7458_s0 + $0xf0] sm:$0xff]   ;;  %v186_v7 = vld [vmem:[%s7461_s3] sm:$0xff] }
  0x27   :  { %v187_v8 = vld [vmem:[%s7461_s3 + $0x8] sm:$0xff]  ;;  %v4873_v9 = vld [vmem:[%s7459_s1 + $0xf8] sm:$0xff]   ;;  %v188_v12 = vld [vmem:[%s7461_s3 + $0x10] sm:$0xff] }
  0x28   :  { %4539 = vmatmul.mubr.msk.bf16.gmra.mxu0 %vm462_vm0, %v4818_v15  ;;  %v4874_v10 = vld [vmem:[%s7458_s0 + $0xf8] sm:$0xff]   ;;  %v250_v11 = vpack.c.bf16 %v187_v8, %v186_v7  ;;  %v190_v14 = vld [vmem:[%s7461_s3 + $0x20] sm:$0xff]  ;;  %v191_v15 = vld [vmem:[%s7461_s3 + $0x28] sm:$0xff] }
  0x29   :  { %4607 = vmatmul.mubr.msk.bf16.gmra.mxu1 %vm462_vm0, %v4819_v16  ;;  %4542 = vmatprep.mubr.msk.bf16.mxu0 %vm462_vm0, %v4820_v17  ;;  %v189_v13 = vld [vmem:[%s7461_s3 + $0x18] sm:$0xff]  ;;  %v252_v17 = vpack.c.bf16 %v191_v15, %v190_v14 }
  0x2a   :  { %4610 = vmatprep.mubr.msk.bf16.mxu1 %vm462_vm0, %v4821_v18  ;;  %v251_v16 = vpack.c.bf16 %v189_v13, %v188_v12  ;;  %v192_v18 = vld [vmem:[%s7461_s3 + $0x30] sm:$0xff]  ;;  %v193_v19 = vld [vmem:[%s7461_s3 + $0x38] sm:$0xff] }
  0x2b   :  { %v205_v37 = vld [vmem:[%s7461_s3 + $0x98] sm:$0xff] }
  0x30   :  { %4543 = vmatmul.mubr.msk.bf16.gmra.mxu0 %vm462_vm0, %v4822_v20  ;;  %v194_v20 = vld [vmem:[%s7461_s3 + $0x40] sm:$0xff] }
  0x31   :  { %4611 = vmatmul.mubr.msk.bf16.gmra.mxu1 %vm462_vm0, %v4823_v21  ;;  %4546 = vmatprep.mubr.msk.bf16.mxu0 %vm462_vm0, %v4824_v22  ;;  %v195_v21 = vld [vmem:[%s7461_s3 + $0x48] sm:$0xff]  ;;  %v253_v22 = vpack.c.bf16 %v193_v19, %v192_v18 }
  0x32   :  { %4614 = vmatprep.mubr.msk.bf16.mxu1 %vm462_vm0, %v4825_v23  ;;  %v254_v23 = vpack.c.bf16 %v195_v21, %v194_v20 }
  0x38   :  { %4547 = vmatmul.mubr.msk.bf16.gmra.mxu0 %vm462_vm0, %v4826_v24  ;;  %v196_v24 = vld [vmem:[%s7461_s3 + $0x50] sm:$0xff] }
  0x39   :  { %4615 = vmatmul.mubr.msk.bf16.gmra.mxu1 %vm462_vm0, %v4827_v25  ;;  %4550 = vmatprep.mubr.msk.bf16.mxu0 %vm462_vm0, %v4829_v26  ;;  %v197_v25 = vld [vmem:[%s7461_s3 + $0x58] sm:$0xff]  ;;  %v198_v26 = vld [vmem:[%s7461_s3 + $0x60] sm:$0xff] }
  0x3a   :  { %4618 = vmatprep.mubr.msk.bf16.mxu1 %vm462_vm0, %v4830_v27  ;;  %v199_v27 = vld [vmem:[%s7461_s3 + $0x68] sm:$0xff]  ;;  %v255_v28 = vpack.c.bf16 %v197_v25, %v196_v24 }
  0x40   :  { %4551 = vmatmul.mubr.msk.bf16.gmra.mxu0 %vm462_vm0, %v4831_v29  ;;  %v256_v29 = vpack.c.bf16 %v199_v27, %v198_v26  ;;  %v230_v26 = vld [vmem:[%s7461_s3 + $0x160] sm:$0xff]  ;;  %v231_v27 = vld [vmem:[%s7461_s3 + $0x168] sm:$0xff] }
  0x41   :  { %4619 = vmatmul.mubr.msk.bf16.gmra.mxu1 %vm462_vm0, %v4832_v30  ;;  %4554 = vmatprep.mubr.msk.bf16.mxu0 %vm462_vm0, %v4833_v31  ;;  %v200_v30 = vld [vmem:[%s7461_s3 + $0x70] sm:$0xff]  ;;  %v201_v31 = vld [vmem:[%s7461_s3 + $0x78] sm:$0xff] }
  0x42   :  { %4622 = vmatprep.mubr.msk.bf16.mxu1 %vm462_vm0, %v4834_v32  ;;  %v202_v32 = vld [vmem:[%s7461_s3 + $0x80] sm:$0xff] }
  0x48   :  { %4555 = vmatmul.mubr.msk.bf16.gmra.mxu0 %vm462_vm0, %v4835_v33  ;;  %v203_v33 = vld [vmem:[%s7461_s3 + $0x88] sm:$0xff] }
  0x49   :  { %4623 = vmatmul.mubr.msk.bf16.gmra.mxu1 %vm462_vm0, %v4836_v34  ;;  %4558 = vmatprep.mubr.msk.bf16.mxu0 %vm462_vm0, %v4837_v35  ;;  %v257_v34 = vpack.c.bf16 %v201_v31, %v200_v30  ;;  %v258_v35 = vpack.c.bf16 %v203_v33, %v202_v32  ;;  %v272_v33 = vpack.c.bf16 %v231_v27, %v230_v26 }
  0x4a   :  { %4626 = vmatprep.mubr.msk.bf16.mxu1 %vm462_vm0, %v4838_v36  ;;  %v204_v36 = vld [vmem:[%s7461_s3 + $0x90] sm:$0xff] }
  0x50   :  { %4559 = vmatmul.mubr.msk.bf16.gmra.mxu0 %vm462_vm0, %v4839_v38  ;;  %v206_v38 = vld [vmem:[%s7461_s3 + $0xa0] sm:$0xff] }
  0x51   :  { %4627 = vmatmul.mubr.msk.bf16.gmra.mxu1 %vm462_vm0, %v4840_v39  ;;  %4562 = vmatprep.mubr.msk.bf16.mxu0 %vm462_vm0, %v4841_v40  ;;  %v207_v39 = vld [vmem:[%s7461_s3 + $0xa8] sm:$0xff]  ;;  %v259_v40 = vpack.c.bf16 %v205_v37, %v204_v36 }
  0x52   :  { %4630 = vmatprep.mubr.msk.bf16.mxu1 %vm462_vm0, %v4842_v41  ;;  %v260_v41 = vpack.c.bf16 %v207_v39, %v206_v38  ;;  %v232_v39 = vld [vmem:[%s7461_s3 + $0x170] sm:$0xff] }
  0x58   :  { %4563 = vmatmul.mubr.msk.bf16.gmra.mxu0 %vm462_vm0, %v4843_v42  ;;  %v208_v42 = vld [vmem:[%s7461_s3 + $0xb0] sm:$0xff] }
  0x59   :  { %4631 = vmatmul.mubr.msk.bf16.gmra.mxu1 %vm462_vm0, %v4844_v43  ;;  %4566 = vmatprep.mubr.msk.bf16.mxu0 %vm462_vm0, %v4846_v44  ;;  %v209_v43 = vld [vmem:[%s7461_s3 + $0xb8] sm:$0xff]  ;;  %v210_v44 = vld [vmem:[%s7461_s3 + $0xc0] sm:$0xff] }
  0x5a   :  { %4634 = vmatprep.mubr.msk.bf16.mxu1 %vm462_vm0, %v4847_v45  ;;  %v211_v45 = vld [vmem:[%s7461_s3 + $0xc8] sm:$0xff] }
  0x60   :  { %4567 = vmatmul.mubr.msk.bf16.gmra.mxu0 %vm462_vm0, %v4848_v46  ;;  %v261_v46 = vpack.c.bf16 %v209_v43, %v208_v42  ;;  %v234_v43 = vld [vmem:[%s7461_s3 + $0x180] sm:$0xff] }
  0x61   :  { %4635 = vmatmul.mubr.msk.bf16.gmra.mxu1 %vm462_vm0, %v4849_v47  ;;  %4570 = vmatprep.mubr.msk.bf16.mxu0 %vm462_vm0, %v4850_v48  ;;  %v262_v47 = vpack.c.bf16 %v211_v45, %v210_v44  ;;  %v4876_v48 = vld [vmem:[%s7468_s10] sm:$0xff]   ;;  %v235_v44 = vld [vmem:[%s7461_s3 + $0x188] sm:$0xff]  ;;  %s6439_s10 = sld [smem:[#allocation2]] }
  0x62   :  { %4638 = vmatprep.mubr.msk.bf16.mxu1 %vm462_vm0, %v4851_v49  ;;  %v212_v49 = vld [vmem:[%s7461_s3 + $0xd0] sm:$0xff]  ;;  %4736 = vmatprep.subr.bf16.mxu1 %v4876_v48 }
  0x63   :  { %4737 = vmatpush3.bf16.msra.mxu1 %v4876_v48 }
  0x68   :  { %4571 = vmatmul.mubr.msk.bf16.gmra.mxu0 %vm462_vm0, %v4852_v50  ;;  %v213_v50 = vld [vmem:[%s7461_s3 + $0xd8] sm:$0xff] }
  0x69   :  { %4639 = vmatmul.mubr.msk.bf16.gmra.mxu1 %vm462_vm0, %v4853_v51  ;;  %4574 = vmatprep.mubr.msk.bf16.mxu0 %vm462_vm0, %v4854_v52  ;;  %v214_v51 = vld [vmem:[%s7461_s3 + $0xe0] sm:$0xff]  ;;  %v215_v52 = vld [vmem:[%s7461_s3 + $0xe8] sm:$0xff] }
  0x6a   :  { %4642 = vmatprep.mubr.msk.bf16.mxu1 %vm462_vm0, %v4855_v53  ;;  %v263_v53 = vpack.c.bf16 %v213_v50, %v212_v49  ;;  %v274_v50 = vpack.c.bf16 %v235_v44, %v234_v43  ;;  %v247_v43 = vld [vmem:[%s7461_s3 + $0x1e8] sm:$0xff] }
  0x70   :  { %4575 = vmatmul.mubr.msk.bf16.gmra.mxu0 %vm462_vm0, %v4856_v54  ;;  %v264_v54 = vpack.c.bf16 %v215_v52, %v214_v51 }
  0x71   :  { %4643 = vmatmul.mubr.msk.bf16.gmra.mxu1 %vm462_vm0, %v4857_v55  ;;  %4578 = vmatprep.mubr.msk.bf16.mxu0 %vm462_vm0, %v4858_v56  ;;  %v216_v55 = vld [vmem:[%s7461_s3 + $0xf0] sm:$0xff]  ;;  %v217_v56 = vld [vmem:[%s7461_s3 + $0xf8] sm:$0xff] }
  0x72   :  { %4646 = vmatprep.mubr.msk.bf16.mxu1 %vm462_vm0, %v4859_v57  ;;  %v218_v57 = vld [vmem:[%s7461_s3 + $0x100] sm:$0xff] }
  0x78   :  { %4579 = vmatmul.mubr.msk.bf16.gmra.mxu0 %vm462_vm0, %v4860_v58  ;;  %v219_v58 = vld [vmem:[%s7461_s3 + $0x108] sm:$0xff] }
  0x79   :  { %4647 = vmatmul.mubr.msk.bf16.gmra.mxu1 %vm462_vm0, %v4861_v59  ;;  %4582 = vmatprep.mubr.msk.bf16.mxu0 %vm462_vm0, %v4863_v60  ;;  %v265_v59 = vpack.c.bf16 %v217_v56, %v216_v55  ;;  %v266_v60 = vpack.c.bf16 %v219_v58, %v218_v57  ;;  %v236_v56 = vld [vmem:[%s7461_s3 + $0x190] sm:$0xff]  ;;  %v237_v57 = vld [vmem:[%s7461_s3 + $0x198] sm:$0xff] }
  0x7a   :  { %4650 = vmatprep.mubr.msk.bf16.mxu1 %vm462_vm0, %v4864_v61  ;;  %v220_v61 = vld [vmem:[%s7461_s3 + $0x110] sm:$0xff] }
  0x80   :  { %4583 = vmatmul.mubr.msk.bf16.gmra.mxu0 %vm462_vm0, %v4865_v62  ;;  %v221_v62 = vld [vmem:[%s7461_s3 + $0x118] sm:$0xff] }
  0x81   :  { %4651 = vmatmul.mubr.msk.bf16.gmra.mxu1 %vm462_vm0, %v4866_v63  ;;  %4586 = vmatprep.mubr.msk.bf16.mxu0 %vm462_vm0, %v4867_v0  ;;  %v222_v63 = vld [vmem:[%s7461_s3 + $0x120] sm:$0xff]  ;;  %v223_v0 = vld [vmem:[%s7461_s3 + $0x128] sm:$0xff] }
  0x82   :  { %4654 = vmatprep.mubr.msk.bf16.mxu1 %vm462_vm0, %v4868_v1  ;;  %v267_v1 = vpack.c.bf16 %v221_v62, %v220_v61  ;;  %v268_v2 = vpack.c.bf16 %v223_v0, %v222_v63  ;;  %v239_v61 = vld [vmem:[%s7461_s3 + $0x1a8] sm:$0xff]  ;;  %v275_v0 = vpack.c.bf16 %v237_v57, %v236_v56 }
  0x88   :  { %4587 = vmatmul.mubr.msk.bf16.gmra.mxu0 %vm462_vm0, %v4869_v3 }
  0x89   :  { %4655 = vmatmul.mubr.msk.bf16.gmra.mxu1 %vm462_vm0, %v4870_v4  ;;  %4590 = vmatprep.mubr.msk.bf16.mxu0 %vm462_vm0, %v4871_v5  ;;  %v224_v5 = vld [vmem:[%s7461_s3 + $0x130] sm:$0xff] }
  0x8a   :  { %4658 = vmatprep.mubr.msk.bf16.mxu1 %vm462_vm0, %v4872_v6  ;;  %v225_v6 = vld [vmem:[%s7461_s3 + $0x138] sm:$0xff] }
  0x8b   :  { %v269_v14 = vpack.c.bf16 %v225_v6, %v224_v5 }
  0x90   :  { %4591 = vmatmul.mubr.msk.bf16.gmra.mxu0 %vm462_vm0, %v4873_v9  ;;  %v226_v9 = vld [vmem:[%s7461_s3 + $0x140] sm:$0xff] }
  0x91   :  { %4659 = vmatmul.mubr.msk.bf16.gmra.mxu1 %vm462_vm0, %v4874_v10  ;;  %4670 = vmatprep.mubr.msk.bf16.mxu0 %vm1899_vm1, %v250_v11  ;;  %v227_v10 = vld [vmem:[%s7461_s3 + $0x148] sm:$0xff] }
  0x98   :  { %4671 = vmatmul.mubr.msk.bf16.vlgmr.msra.gmra.mxu0 %vm1899_vm1, %v251_v16  ;;  %v270_v16 = vpack.c.bf16 %v227_v10, %v226_v9  ;;  %v240_v10 = vld [vmem:[%s7461_s3 + $0x1b0] sm:$0xff] }
  0x99   :  { %4674 = vmatprep.mubr.msk.bf16.mxu0 %vm1899_vm1, %v252_v17 }
  0xa0   :  { %4675 = vmatmul.mubr.msk.bf16.gmra.mxu0 %vm1899_vm1, %v253_v22  ;;  %v228_v22 = vld [vmem:[%s7461_s3 + $0x150] sm:$0xff] }
  0xa1   :  { %4678 = vmatprep.mubr.msk.bf16.mxu0 %vm1899_vm1, %v254_v23  ;;  %v229_v23 = vld [vmem:[%s7461_s3 + $0x158] sm:$0xff] }
  0xa2   :  { %v271_v31 = vpack.c.bf16 %v229_v23, %v228_v22 }
  0xa8   :  { %4679 = vmatmul.mubr.msk.bf16.gmra.mxu0 %vm1899_vm1, %v255_v28 }
  0xa9   :  { %4682 = vmatprep.mubr.msk.bf16.mxu0 %vm1899_vm1, %v256_v29 }
  0xb0   :  { %4683 = vmatmul.mubr.msk.bf16.gmra.mxu0 %vm1899_vm1, %v257_v34 }
  0xb1   :  { %4686 = vmatprep.mubr.msk.bf16.mxu0 %vm1899_vm1, %v258_v35 }
  0xb8   :  { %4687 = vmatmul.mubr.msk.bf16.gmra.mxu0 %vm1899_vm1, %v259_v40  ;;  %v233_v40 = vld [vmem:[%s7461_s3 + $0x178] sm:$0xff] }
  0xb9   :  { %4690 = vmatprep.mubr.msk.bf16.mxu0 %vm1899_vm1, %v260_v41  ;;  %v273_v48 = vpack.c.bf16 %v233_v40, %v232_v39 }
  0xc0   :  { %4691 = vmatmul.mubr.msk.bf16.gmra.mxu0 %vm1899_vm1, %v261_v46 }
  0xc1   :  { %4694 = vmatprep.mubr.msk.bf16.mxu0 %vm1899_vm1, %v262_v47 }
  0xc8   :  { %4695 = vmatmul.mubr.msk.bf16.gmra.mxu0 %vm1899_vm1, %v263_v53 }
  0xc9   :  { %4698 = vmatprep.mubr.msk.bf16.mxu0 %vm1899_vm1, %v264_v54 }
  0xd0   :  { %4699 = vmatmul.mubr.msk.bf16.gmra.mxu0 %vm1899_vm1, %v265_v59 }
  0xd1   :  { %4702 = vmatprep.mubr.msk.bf16.mxu0 %vm1899_vm1, %v266_v60  ;;  %v238_v60 = vld [vmem:[%s7461_s3 + $0x1a0] sm:$0xff] }
  0xd8   :  { %v4532_v3 = vpop.f32.mrf.mxu0  ;;  %4703 = vmatmul.mubr.msk.bf16.gmra.mxu0 %vm1899_vm1, %v267_v1 }
  0xd9   :  { %v4600_v4 = vpop.f32.mrf.mxu1  ;;  %4706 = vmatprep.mubr.msk.bf16.mxu0 %vm1899_vm1, %v268_v2 }
  0xda   :  { %v5905_v7 = vadd.f32 %v4600_v4, %v4532_v3  ;;  %v593_v8 = vpop.f32.mrf.mxu0  ;;  %v276_v3 = vpack.c.bf16 %v239_v61, %v238_v60  ;;  %v248_v61 = vld [vmem:[%s7461_s3 + $0x1f0] sm:$0xff] }
  0xdb   :  { %v1150_v11 = vpop.f32.mrf.mxu1 }
  0xdc   :  { %v5913_v12 = vadd.f32 %v1150_v11, %v593_v8  ;;  %v4533_v13 = vpop.f32.mrf.mxu0  ;;  %v241_v11 = vld [vmem:[%s7461_s3 + $0x1b8] sm:$0xff] }
  0xdd   :  { %v4601_v15 = vpop.f32.mrf.mxu1  ;;  %v277_v23 = vpack.c.bf16 %v241_v11, %v240_v10 }
  0xde   :  { %v5915_v17 = vadd.f32 %v4601_v15, %v4533_v13  ;;  %v5917_v18 = vpop.f32.mrf.mxu0  ;;  %v243_v15 = vld [vmem:[%s7461_s3 + $0x1c8] sm:$0xff] }
  0xdf   :  { %v5919_v19 = vpop.f32.mrf.mxu1 }
  0xe0   :  { %v4536_v20 = vpop.f32.mrf.mxu0  ;;  %4707 = vmatmul.mubr.msk.bf16.gmra.mxu0 %vm1899_vm1, %v269_v14  ;;  %v242_v14 = vld [vmem:[%s7461_s3 + $0x1c0] sm:$0xff] }
  0xe1   :  { %v4604_v21 = vpop.f32.mrf.mxu1  ;;  %4710 = vmatprep.mubr.msk.bf16.mxu0 %vm1899_vm1, %v270_v16  ;;  %v278_v26 = vpack.c.bf16 %v243_v15, %v242_v14 }
  0xe2   :  { %v5929_v24 = vadd.f32 %v4604_v21, %v4536_v20  ;;  %v609_v25 = vpop.f32.mrf.mxu0 }
  0xe3   :  { %v1166_v28 = vpop.f32.mrf.mxu1 }
  0xe4   :  { %v5937_v29 = vadd.f32 %v1166_v28, %v609_v25  ;;  %v4537_v30 = vpop.f32.mrf.mxu0 }
  0xe5   :  { %v4605_v32 = vpop.f32.mrf.mxu1 }
  0xe6   :  { %v5939_v34 = vadd.f32 %v4605_v32, %v4537_v30  ;;  %v5941_v35 = vpop.f32.mrf.mxu0 }
  0xe7   :  { %v5943_v36 = vpop.f32.mrf.mxu1 }
  0xe8   :  { %v4540_v37 = vpop.f32.mrf.mxu0  ;;  %4711 = vmatmul.mubr.msk.bf16.gmra.mxu0 %vm1899_vm1, %v271_v31 }
  0xe9   :  { %v4608_v38 = vpop.f32.mrf.mxu1  ;;  %4714 = vmatprep.mubr.msk.bf16.mxu0 %vm1899_vm1, %v272_v33 }
  0xea   :  { %v5953_v41 = vadd.f32 %v4608_v38, %v4540_v37  ;;  %v625_v42 = vpop.f32.mrf.mxu0  ;;  %v244_v37 = vld [vmem:[%s7461_s3 + $0x1d0] sm:$0xff]  ;;  %v245_v38 = vld [vmem:[%s7461_s3 + $0x1d8] sm:$0xff] }
  0xeb   :  { %v1182_v45 = vpop.f32.mrf.mxu1 }
  0xec   :  { %v5961_v46 = vadd.f32 %v1182_v45, %v625_v42  ;;  %v4541_v47 = vpop.f32.mrf.mxu0  ;;  %v246_v42 = vld [vmem:[%s7461_s3 + $0x1e0] sm:$0xff] }
  0xed   :  { %v4609_v49 = vpop.f32.mrf.mxu1 }
  0xee   :  { %v5963_v51 = vpop.f32.mrf.mxu0  ;;  %v5965_v52 = vadd.f32 %v4609_v49, %v4541_v47 }
  0xef   :  { %v5967_v53 = vpop.f32.mrf.mxu1 }
  0xf0   :  { %v4544_v54 = vpop.f32.mrf.mxu0  ;;  %4715 = vmatmul.mubr.msk.bf16.gmra.mxu0 %vm1899_vm1, %v273_v48  ;;  %v279_v48 = vpack.c.bf16 %v245_v38, %v244_v37 }
  0xf1   :  { %v4612_v55 = vpop.f32.mrf.mxu1  ;;  %4718 = vmatprep.mubr.msk.bf16.mxu0 %vm1899_vm1, %v274_v50  ;;  %v280_v50 = vpack.c.bf16 %v247_v43, %v246_v42 }
  0xf2   :  { %v5977_v58 = vadd.f32 %v4612_v55, %v4544_v54  ;;  %v641_v59 = vpop.f32.mrf.mxu0 }
  0xf3   :  { %v1198_v62 = vpop.f32.mrf.mxu1 }
  0xf4   :  { %v4545_v63 = vpop.f32.mrf.mxu0  ;;  %v5985_v1 = vadd.f32 %v1198_v62, %v641_v59  ;;  %v249_v62 = vld [vmem:[%s7461_s3 + $0x1f8] sm:$0xff] }
  0xf5   :  { %v4613_v2 = vpop.f32.mrf.mxu1 }
  0xf6   :  { %v5987_v4 = vadd.f32 %v4613_v2, %v4545_v63  ;;  %v5989_v5 = vpop.f32.mrf.mxu0 }
  0xf7   :  { %v5991_v6 = vpop.f32.mrf.mxu1 }
  0xf8   :  { %v4548_v8 = vpop.f32.mrf.mxu0  ;;  %4719 = vmatmul.mubr.msk.bf16.gmra.mxu0 %vm1899_vm1, %v275_v0 }
  0xf9   :  { %v4616_v9 = vpop.f32.mrf.mxu1  ;;  %4722 = vmatprep.mubr.msk.bf16.mxu0 %vm1899_vm1, %v276_v3 }
  0xfa   :  { %v657_v13 = vpop.f32.mrf.mxu0  ;;  %v6007_v16 = vadd.f32 %v4616_v9, %v4548_v8  ;;  %v281_v9 = vpack.c.bf16 %v249_v62, %v248_v61 }
  0xfb   :  { %v1214_v20 = vpop.f32.mrf.mxu1 }
  0xfc   :  { %v6009_v21 = vadd.f32 %v1214_v20, %v657_v13  ;;  %v4549_v22 = vpop.f32.mrf.mxu0 }
  0xfd   :  { %v4617_v25 = vpop.f32.mrf.mxu1 }
  0xfe   :  { %v6011_v27 = vadd.f32 %v4617_v25, %v4549_v22  ;;  %v660_v28 = vpop.f32.mrf.mxu0 }
  0xff   :  { %v1217_v30 = vpop.f32.mrf.mxu1 }
 0x100   :  { %v6013_v31 = vadd.f32 %v1217_v30, %v660_v28  ;;  %v4552_v32 = vpop.f32.mrf.mxu0  ;;  %4723 = vmatmul.mubr.msk.bf16.gmra.mxu0 %vm1899_vm1, %v277_v23 }
 0x101   :  { %v4620_v33 = vpop.f32.mrf.mxu1  ;;  %4726 = vmatprep.mubr.msk.bf16.mxu0 %vm1899_vm1, %v278_v26 }
 0x102   :  { %v6023_v39 = vadd.f32 %v4620_v33, %v4552_v32  ;;  %v673_v40 = vpop.f32.mrf.mxu0 }
 0x103   :  { %v1230_v44 = vpop.f32.mrf.mxu1 }
 0x104   :  { %v6031_v45 = vadd.f32 %v1230_v44, %v673_v40  ;;  %v4553_v47 = vpop.f32.mrf.mxu0 }
 0x105   :  { %v4621_v49 = vpop.f32.mrf.mxu1 }
 0x106   :  { %v6033_v54 = vadd.f32 %v4621_v49, %v4553_v47  ;;  %v676_v55 = vpop.f32.mrf.mxu0 }
 0x107   :  { %v1233_v56 = vpop.f32.mrf.mxu1 }
 0x108   :  { %v6035_v57 = vadd.f32 %v1233_v56, %v676_v55  ;;  %v4556_v59 = vpop.f32.mrf.mxu0  ;;  %4727 = vmatmul.mubr.msk.bf16.gmra.mxu0 %vm1899_vm1, %v279_v48 }
 0x109   :  { %v4624_v60 = vpop.f32.mrf.mxu1  ;;  %4730 = vmatprep.mubr.msk.bf16.mxu0 %vm1899_vm1, %v280_v50 }
 0x10a   :  { %v6045_v63 = vadd.f32 %v4624_v60, %v4556_v59  ;;  %v689_v0 = vpop.f32.mrf.mxu0 }
 0x10b   :  { %v1246_v2 = vpop.f32.mrf.mxu1 }
 0x10c   :  { %v6047_v3 = vadd.f32 %v1246_v2, %v689_v0  ;;  %v4557_v8 = vpop.f32.mrf.mxu0 }
 0x10d   :  { %v4625_v10 = vpop.f32.mrf.mxu1 }
 0x10e   :  { %v6049_v11 = vadd.f32 %v4625_v10, %v4557_v8  ;;  %v692_v13 = vpop.f32.mrf.mxu0 }
 0x10f   :  { %v1249_v14 = vpop.f32.mrf.mxu1 }
 0x110   :  { %v4560_v15 = vpop.f32.mrf.mxu0  ;;  %4731 = vmatmul.mubr.msk.bf16.gmra.mxu0 %vm1899_vm1, %v281_v9  ;;  %v6052_v20 = vadd.f32 %v1249_v14, %v692_v13 }
 0x111   :  { %v4628_v22 = vpop.f32.mrf.mxu1 }
 0x112   :  { %v6054_v23 = vadd.f32 %v4628_v22, %v4560_v15  ;;  %v705_v25 = vpop.f32.mrf.mxu0 }
 0x113   :  { %v1262_v26 = vpop.f32.mrf.mxu1 }
 0x114   :  { %v6056_v28 = vadd.f32 %v1262_v26, %v705_v25  ;;  %v4561_v30 = vpop.f32.mrf.mxu0 }
 0x115   :  { %v4629_v32 = vpop.f32.mrf.mxu1 }
 0x116   :  { %v708_v33 = vpop.f32.mrf.mxu0  ;;  %v6058_v37 = vadd.f32 %v4629_v32, %v4561_v30 }
 0x117   :  { %v1265_v38 = vpop.f32.mrf.mxu1 }
 0x118   :  { %v6060_v40 = vadd.f32 %v1265_v38, %v708_v33  ;;  %v4564_v42 = vpop.f32.mrf.mxu0 }
 0x119   :  { %v4632_v43 = vpop.f32.mrf.mxu1 }
 0x11a   :  { %v6062_v44 = vadd.f32 %v4632_v43, %v4564_v42  ;;  %v721_v47 = vpop.f32.mrf.mxu0 }
 0x11b   :  { %v1278_v48 = vpop.f32.mrf.mxu1 }
 0x11c   :  { %v4565_v49 = vpop.f32.mrf.mxu0  ;;  %v6064_v50 = vadd.f32 %v1278_v48, %v721_v47 }
 0x11d   :  { %v4633_v55 = vpop.f32.mrf.mxu1 }
 0x11e   :  { %v6066_v56 = vadd.f32 %v4633_v55, %v4565_v49  ;;  %v724_v59 = vpop.f32.mrf.mxu0 }
 0x11f   :  { %v1281_v60 = vpop.f32.mrf.mxu1 }
 0x120   :  { %v6068_v61 = vadd.f32 %v1281_v60, %v724_v59  ;;  %v4568_v62 = vpop.f32.mrf.mxu0 }
 0x121   :  { %v4636_v0 = vpop.f32.mrf.mxu1 }
 0x122   :  { %v6070_v2 = vadd.f32 %v4636_v0, %v4568_v62  ;;  %v737_v8 = vpop.f32.mrf.mxu0 }
 0x123   :  { %v1294_v9 = vpop.f32.mrf.mxu1 }
 0x124   :  { %v6072_v10 = vadd.f32 %v1294_v9, %v737_v8  ;;  %v4569_v13 = vpop.f32.mrf.mxu0 }
 0x125   :  { %v4637_v14 = vpop.f32.mrf.mxu1 }
 0x126   :  { %v6074_v15 = vadd.f32 %v4637_v14, %v4569_v13  ;;  %v740_v22 = vpop.f32.mrf.mxu0 }
 0x127   :  { %v1297_v25 = vpop.f32.mrf.mxu1 }
 0x128   :  { %v6076_v26 = vadd.f32 %v1297_v25, %v740_v22  ;;  %v4572_v30 = vpop.f32.mrf.mxu0 }
 0x129   :  { %v4640_v32 = vpop.f32.mrf.mxu1 }
 0x12a   :  { %v6078_v33 = vadd.f32 %v4640_v32, %v4572_v30  ;;  %v753_v38 = vpop.f32.mrf.mxu0 }
 0x12b   :  { %v1310_v42 = vpop.f32.mrf.mxu1 }
 0x12c   :  { %v6080_v43 = vadd.f32 %v1310_v42, %v753_v38  ;;  %v4573_v47 = vpop.f32.mrf.mxu0 }
 0x12d   :  { %v4641_v48 = vpop.f32.mrf.mxu1 }
 0x12e   :  { %7472 = vst [vmem:[#allocation5_spill] sm:$0xff] %v6080_v43  ;;  %v6082_v49 = vadd.f32 %v4641_v48, %v4573_v47  ;;  %v756_v55 = vpop.f32.mrf.mxu0 }
 0x12f   :  { %v1313_v59 = vpop.f32.mrf.mxu1 }
 0x130   :  { %7473 = vst [vmem:[#allocation6_spill] sm:$0xff] %v6082_v49  ;;  %v4576_v60 = vpop.f32.mrf.mxu0  ;;  %v6084_v62 = vadd.f32 %v1313_v59, %v756_v55 }
 0x131   :  { %v4644_v0 = vpop.f32.mrf.mxu1 }
 0x132   :  { %7474 = vst [vmem:[#allocation7_spill] sm:$0xff] %v6084_v62  ;;  %v6086_v8 = vadd.f32 %v4644_v0, %v4576_v60  ;;  %v769_v9 = vpop.f32.mrf.mxu0 }
 0x133   :  { %v1326_v13 = vpop.f32.mrf.mxu1 }
 0x134   :  { %7475 = vst [vmem:[#allocation8_spill] sm:$0xff] %v6086_v8  ;;  %v6088_v14 = vadd.f32 %v1326_v13, %v769_v9  ;;  %v4577_v22 = vpop.f32.mrf.mxu0 }
 0x135   :  { %v4645_v25 = vpop.f32.mrf.mxu1 }
 0x136   :  { %7476 = vst [vmem:[#allocation9_spill] sm:$0xff] %v6088_v14  ;;  %v772_v30 = vpop.f32.mrf.mxu0  ;;  %v6090_v32 = vadd.f32 %v4645_v25, %v4577_v22 }
 0x137   :  { %v1329_v38 = vpop.f32.mrf.mxu1 }
 0x138   :  { %7477 = vst [vmem:[#allocation10_spill] sm:$0xff] %v6090_v32  ;;  %v6092_v42 = vadd.f32 %v1329_v38, %v772_v30  ;;  %v4580_v47 = vpop.f32.mrf.mxu0 }
 0x139   :  { %v4648_v48 = vpop.f32.mrf.mxu1 }
 0x13a   :  { %7478 = vst [vmem:[#allocation11_spill] sm:$0xff] %v6092_v42  ;;  %v6094_v49 = vadd.f32 %v4648_v48, %v4580_v47  ;;  %v785_v55 = vpop.f32.mrf.mxu0 }
 0x13b   :  { %v1342_v59 = vpop.f32.mrf.mxu1 }
 0x13c   :  { %7479 = vst [vmem:[#allocation12_spill] sm:$0xff] %v6094_v49  ;;  %v4581_v60 = vpop.f32.mrf.mxu0  ;;  %v6096_v0 = vadd.f32 %v1342_v59, %v785_v55 }
 0x13d   :  { %v4649_v8 = vpop.f32.mrf.mxu1 }
 0x13e   :  { %7480 = vst [vmem:[#allocation13_spill] sm:$0xff] %v6096_v0  ;;  %v6098_v9 = vadd.f32 %v4649_v8, %v4581_v60  ;;  %v788_v13 = vpop.f32.mrf.mxu0 }
 0x13f   :  { %v1345_v14 = vpop.f32.mrf.mxu1 }
 0x140   :  { %7481 = vst [vmem:[#allocation14_spill] sm:$0xff] %v6098_v9  ;;  %v6100_v62 = vadd.f32 %v1345_v14, %v788_v13  ;;  %v4584_v22 = vpop.f32.mrf.mxu0 }
 0x141   :  { %v4652_v25 = vpop.f32.mrf.mxu1 }
 0x142   :  { %7482 = vst [vmem:[#allocation15_spill] sm:$0xff] %v6100_v62  ;;  %v6102_v30 = vadd.f32 %v4652_v25, %v4584_v22  ;;  %v801_v38 = vpop.f32.mrf.mxu0 }
 0x143   :  { %v1358_v42 = vpop.f32.mrf.mxu1 }
 0x144   :  { %7483 = vst [vmem:[#allocation16_spill] sm:$0xff] %v6102_v30  ;;  %v6104_v47 = vadd.f32 %v1358_v42, %v801_v38  ;;  %v4585_v48 = vpop.f32.mrf.mxu0 }
 0x145   :  { %v4653_v49 = vpop.f32.mrf.mxu1 }
 0x146   :  { %7484 = vst [vmem:[#allocation17_spill] sm:$0xff] %v6104_v47  ;;  %v6106_v32 = vadd.f32 %v4653_v49, %v4585_v48  ;;  %v804_v55 = vpop.f32.mrf.mxu0 }
 0x147   :  { %v1361_v59 = vpop.f32.mrf.mxu1 }
 0x148   :  { %7485 = vst [vmem:[#allocation18_spill] sm:$0xff] %v6106_v32  ;;  %v6108_v8 = vadd.f32 %v1361_v59, %v804_v55  ;;  %v4588_v60 = vpop.f32.mrf.mxu0 }
 0x149   :  { %v4656_v9 = vpop.f32.mrf.mxu1 }
 0x14a   :  { %7486 = vst [vmem:[#allocation19_spill] sm:$0xff] %v6108_v8  ;;  %v6110_v14 = vadd.f32 %v4656_v9, %v4588_v60  ;;  %v817_v13 = vpop.f32.mrf.mxu0 }
 0x14b   :  { %v1374_v62 = vpop.f32.mrf.mxu1 }
 0x14c   :  { %7487 = vst [vmem:[#allocation20_spill] sm:$0xff] %v6110_v14  ;;  %v6112_v22 = vadd.f32 %v1374_v62, %v817_v13  ;;  %v4589_v25 = vpop.f32.mrf.mxu0 }
 0x14d   :  { %v4657_v30 = vpop.f32.mrf.mxu1 }
 0x14e   :  { %7488 = vst [vmem:[#allocation21_spill] sm:$0xff] %v6112_v22  ;;  %v6114_v42 = vadd.f32 %v4657_v30, %v4589_v25  ;;  %v820_v38 = vpop.f32.mrf.mxu0 }
 0x14f   :  { %v1377_v47 = vpop.f32.mrf.mxu1 }
 0x150   :  { %7489 = vst [vmem:[#allocation22_spill] sm:$0xff] %v6114_v42  ;;  %v4592_v49 = vpop.f32.mrf.mxu0  ;;  %v6116_v48 = vadd.f32 %v1377_v47, %v820_v38  ;;  %v6129_v47 = vld [vmem:[%s7467_s9] ss:$0 sm:$0xff] }
 0x151   :  { %v4660_v32 = vpop.f32.mrf.mxu1 }
 0x152   :  { %7490 = vst [vmem:[#allocation23_spill] sm:$0xff] %v6116_v48  ;;  %v6118_v55 = vadd.f32 %v4660_v32, %v4592_v49  ;;  %v833_v59 = vpop.f32.mrf.mxu0 }
 0x153   :  { %v1390_v8 = vpop.f32.mrf.mxu1 }
 0x154   :  { %7491 = vst [vmem:[#allocation24_spill] sm:$0xff] %v6118_v55  ;;  %v6120_v9 = vadd.f32 %v1390_v8, %v833_v59  ;;  %v4593_v60 = vpop.f32.mrf.mxu0 }
 0x155   :  { %v4661_v14 = vpop.f32.mrf.mxu1 }
 0x156   :  { %7492 = vst [vmem:[#allocation25_spill] sm:$0xff] %v6120_v9  ;;  %v6122_v62 = vpop.f32.mrf.mxu0  ;;  %v6124_v13 = vadd.f32 %v4661_v14, %v4593_v60 }
 0x157   :  { %7493 = vst [vmem:[#allocation26_spill] sm:$0xff] %v6122_v62 }
 0x158   :  { %7494 = vst [vmem:[#allocation27_spill] sm:$0xff] %v6124_v13  ;;  %v4672_v30 = vpop.f32.mrf.mxu0 }
 0x159   :  { %v2039_v8 = vadd.f32 %v4672_v30, %v6129_v47 }
 0x15a   :  { %v2030_v25 = vpop.f32.mrf.mxu0 }
 0x15b   :  { %v2031_v32 = vadd.f32 %v6129_v47, %v2030_v25  ;;  %v2287_v55 = vmax.f32 %v2039_v8, 0.0 }
 0x15c   :  { %v4673_v38 = vpop.f32.mrf.mxu0 }
 0x15d   :  { %v2042_v49 = vadd.f32 %v4673_v38, %v6129_v47  ;;  %v2285_v60 = vmax.f32 %v2031_v32, 0.0 }
 0x15e   :  { %v2033_v59 = vpop.f32.mrf.mxu0 }
 0x15f   :  { %v2034_v9 = vadd.f32 %v6129_v47, %v2033_v59  ;;  %v2288_v62 = vmax.f32 %v2042_v49, 0.0 }
 0x160   :  { %v4676_v14 = vpop.f32.mrf.mxu0 }
 0x161   :  { %v2286_v13 = vmax.f32 %v2034_v9, 0.0  ;;  %v2350_v22 = vpack.c.bf16 %v2288_v62, %v2287_v55  ;;  %v2055_v30 = vadd.f32 %v4676_v14, %v6129_v47 }
 0x162   :  { %v2046_v48 = vpop.f32.mrf.mxu0 }
 0x163   :  { %v2349_v42 = vpack.c.bf16 %v2286_v13, %v2285_v60  ;;  %v2047_v43 = vadd.f32 %v6129_v47, %v2046_v48  ;;  %v2291_v13 = vmax.f32 %v2055_v30, 0.0 }
 0x164   :  { %v4677_v0 = vpop.f32.mrf.mxu0 }
 0x165   :  { %v2058_v25 = vadd.f32 %v4677_v0, %v6129_v47  ;;  %4738 = vmatprep.mubr.msk.bf16.mxu1 %vm462_vm0, %v2349_v42  ;;  %v2289_v8 = vmax.f32 %v2047_v43, 0.0 }
 0x166   :  { %v2049_v38 = vpop.f32.mrf.mxu0  ;;  %4739 = vmatmul.mubr.msk.bf16.vlgmr.msra.gmra.mxu1 %vm462_vm0, %v2350_v22 }
 0x167   :  { %v2050_v49 = vadd.f32 %v6129_v47, %v2049_v38  ;;  %v2292_v32 = vmax.f32 %v2058_v25, 0.0 }
 0x168   :  { %v4680_v9 = vpop.f32.mrf.mxu0 }
 0x169   :  { %v2290_v59 = vmax.f32 %v2050_v49, 0.0  ;;  %v2352_v60 = vpack.c.bf16 %v2292_v32, %v2291_v13  ;;  %v2071_v14 = vadd.f32 %v4680_v9, %v6129_v47 }
 0x16a   :  { %v2062_v55 = vpop.f32.mrf.mxu0 }
 0x16b   :  { %v2351_v62 = vpack.c.bf16 %v2290_v59, %v2289_v8  ;;  %v2063_v0 = vadd.f32 %v6129_v47, %v2062_v55  ;;  %v2295_v8 = vmax.f32 %v2071_v14, 0.0 }
 0x16c   :  { %v4681_v48 = vpop.f32.mrf.mxu0 }
 0x16d   :  { %v2074_v42 = vadd.f32 %v4681_v48, %v6129_v47  ;;  %4742 = vmatprep.mubr.msk.bf16.mxu1 %vm462_vm0, %v2351_v62  ;;  %v2293_v30 = vmax.f32 %v2063_v0, 0.0 }
 0x16e   :  { %v2065_v22 = vpop.f32.mrf.mxu0  ;;  %4743 = vmatmul.mubr.msk.bf16.gmra.mxu1 %vm462_vm0, %v2352_v60 }
 0x16f   :  { %v2066_v25 = vadd.f32 %v6129_v47, %v2065_v22  ;;  %v2296_v43 = vmax.f32 %v2074_v42, 0.0 }
 0x170   :  { %v4684_v38 = vpop.f32.mrf.mxu0 }
 0x171   :  { %v2294_v49 = vmax.f32 %v2066_v25, 0.0  ;;  %v2354_v13 = vpack.c.bf16 %v2296_v43, %v2295_v8  ;;  %v2087_v9 = vadd.f32 %v4684_v38, %v6129_v47 }
 0x172   :  { %v2078_v32 = vpop.f32.mrf.mxu0 }
 0x173   :  { %v2353_v59 = vpack.c.bf16 %v2294_v49, %v2293_v30  ;;  %v2079_v48 = vadd.f32 %v6129_v47, %v2078_v32  ;;  %v2299_v30 = vmax.f32 %v2087_v9, 0.0 }
 0x174   :  { %v4685_v55 = vpop.f32.mrf.mxu0 }
 0x175   :  { %v2090_v62 = vadd.f32 %v4685_v55, %v6129_v47  ;;  %4746 = vmatprep.mubr.msk.bf16.mxu1 %vm462_vm0, %v2353_v59  ;;  %v2297_v14 = vmax.f32 %v2079_v48, 0.0 }
 0x176   :  { %v2081_v60 = vpop.f32.mrf.mxu0  ;;  %4747 = vmatmul.mubr.msk.bf16.gmra.mxu1 %vm462_vm0, %v2354_v13 }
 0x177   :  { %v2082_v42 = vadd.f32 %v6129_v47, %v2081_v60  ;;  %v2300_v0 = vmax.f32 %v2090_v62, 0.0 }
 0x178   :  { %v4688_v22 = vpop.f32.mrf.mxu0 }
 0x179   :  { %v2298_v25 = vmax.f32 %v2082_v42, 0.0  ;;  %v2356_v8 = vpack.c.bf16 %v2300_v0, %v2299_v30  ;;  %v2103_v38 = vadd.f32 %v4688_v22, %v6129_v47 }
 0x17a   :  { %v2094_v43 = vpop.f32.mrf.mxu0 }
 0x17b   :  { %v2355_v49 = vpack.c.bf16 %v2298_v25, %v2297_v14  ;;  %v2095_v55 = vadd.f32 %v6129_v47, %v2094_v43  ;;  %v2303_v14 = vmax.f32 %v2103_v38, 0.0 }
 0x17c   :  { %v4689_v32 = vpop.f32.mrf.mxu0 }
 0x17d   :  { %v2106_v59 = vadd.f32 %v4689_v32, %v6129_v47  ;;  %4750 = vmatprep.mubr.msk.bf16.mxu1 %vm462_vm0, %v2355_v49  ;;  %v2301_v9 = vmax.f32 %v2095_v55, 0.0 }
 0x17e   :  { %v2097_v13 = vpop.f32.mrf.mxu0  ;;  %4751 = vmatmul.mubr.msk.bf16.gmra.mxu1 %vm462_vm0, %v2356_v8 }
 0x17f   :  { %v2098_v62 = vadd.f32 %v6129_v47, %v2097_v13  ;;  %v2304_v48 = vmax.f32 %v2106_v59, 0.0 }
 0x180   :  { %v4692_v60 = vpop.f32.mrf.mxu0 }
 0x181   :  { %v2302_v42 = vmax.f32 %v2098_v62, 0.0  ;;  %v2358_v30 = vpack.c.bf16 %v2304_v48, %v2303_v14  ;;  %v2119_v22 = vadd.f32 %v4692_v60, %v6129_v47 }
 0x182   :  { %v2110_v0 = vpop.f32.mrf.mxu0 }
 0x183   :  { %v2357_v25 = vpack.c.bf16 %v2302_v42, %v2301_v9  ;;  %v2111_v32 = vadd.f32 %v6129_v47, %v2110_v0  ;;  %v2307_v9 = vmax.f32 %v2119_v22, 0.0 }
 0x184   :  { %v4693_v43 = vpop.f32.mrf.mxu0 }
 0x185   :  { %v2122_v49 = vadd.f32 %v4693_v43, %v6129_v47  ;;  %4754 = vmatprep.mubr.msk.bf16.mxu1 %vm462_vm0, %v2357_v25  ;;  %v2305_v38 = vmax.f32 %v2111_v32, 0.0 }
 0x186   :  { %v2113_v8 = vpop.f32.mrf.mxu0  ;;  %4755 = vmatmul.mubr.msk.bf16.gmra.mxu1 %vm462_vm0, %v2358_v30 }
 0x187   :  { %v2114_v59 = vadd.f32 %v6129_v47, %v2113_v8  ;;  %v2308_v55 = vmax.f32 %v2122_v49, 0.0 }
 0x188   :  { %v4696_v13 = vpop.f32.mrf.mxu0 }
 0x189   :  { %v2306_v62 = vmax.f32 %v2114_v59, 0.0  ;;  %v2360_v14 = vpack.c.bf16 %v2308_v55, %v2307_v9  ;;  %v2135_v60 = vadd.f32 %v4696_v13, %v6129_v47 }
 0x18a   :  { %v2126_v48 = vpop.f32.mrf.mxu0 }
 0x18b   :  { %v2359_v42 = vpack.c.bf16 %v2306_v62, %v2305_v38  ;;  %v2127_v43 = vadd.f32 %v6129_v47, %v2126_v48  ;;  %v2311_v38 = vmax.f32 %v2135_v60, 0.0 }
 0x18c   :  { %v4697_v0 = vpop.f32.mrf.mxu0 }
 0x18d   :  { %v2138_v25 = vadd.f32 %v4697_v0, %v6129_v47  ;;  %4758 = vmatprep.mubr.msk.bf16.mxu1 %vm462_vm0, %v2359_v42  ;;  %v2309_v22 = vmax.f32 %v2127_v43, 0.0 }
 0x18e   :  { %v2129_v30 = vpop.f32.mrf.mxu0  ;;  %4759 = vmatmul.mubr.msk.bf16.gmra.mxu1 %vm462_vm0, %v2360_v14 }
 0x18f   :  { %v2130_v49 = vadd.f32 %v6129_v47, %v2129_v30  ;;  %v2312_v32 = vmax.f32 %v2138_v25, 0.0 }
 0x190   :  { %v4700_v8 = vpop.f32.mrf.mxu0 }
 0x191   :  { %v2310_v59 = vmax.f32 %v2130_v49, 0.0  ;;  %v2362_v9 = vpack.c.bf16 %v2312_v32, %v2311_v38  ;;  %v2151_v13 = vadd.f32 %v4700_v8, %v6129_v47 }
 0x192   :  { %v2142_v55 = vpop.f32.mrf.mxu0 }
 0x193   :  { %v2361_v62 = vpack.c.bf16 %v2310_v59, %v2309_v22  ;;  %v2143_v0 = vadd.f32 %v6129_v47, %v2142_v55  ;;  %v2315_v22 = vmax.f32 %v2151_v13, 0.0 }
 0x194   :  { %v4701_v48 = vpop.f32.mrf.mxu0 }
 0x195   :  { %v2154_v42 = vadd.f32 %v4701_v48, %v6129_v47  ;;  %4762 = vmatprep.mubr.msk.bf16.mxu1 %vm462_vm0, %v2361_v62  ;;  %v2313_v60 = vmax.f32 %v2143_v0, 0.0 }
 0x196   :  { %v2145_v14 = vpop.f32.mrf.mxu0  ;;  %4763 = vmatmul.mubr.msk.bf16.gmra.mxu1 %vm462_vm0, %v2362_v9 }
 0x197   :  { %v2146_v25 = vadd.f32 %v6129_v47, %v2145_v14  ;;  %v2316_v43 = vmax.f32 %v2154_v42, 0.0 }
 0x198   :  { %v4704_v30 = vpop.f32.mrf.mxu0 }
 0x199   :  { %v2314_v49 = vmax.f32 %v2146_v25, 0.0  ;;  %v2364_v38 = vpack.c.bf16 %v2316_v43, %v2315_v22  ;;  %v2167_v8 = vadd.f32 %v4704_v30, %v6129_v47 }
 0x19a   :  { %v2158_v32 = vpop.f32.mrf.mxu0 }
 0x19b   :  { %v2363_v59 = vpack.c.bf16 %v2314_v49, %v2313_v60  ;;  %v2159_v48 = vadd.f32 %v6129_v47, %v2158_v32  ;;  %v2319_v60 = vmax.f32 %v2167_v8, 0.0 }
 0x19c   :  { %v4705_v55 = vpop.f32.mrf.mxu0 }
 0x19d   :  { %v2170_v62 = vadd.f32 %v4705_v55, %v6129_v47  ;;  %4766 = vmatprep.mubr.msk.bf16.mxu1 %vm462_vm0, %v2363_v59  ;;  %v2317_v13 = vmax.f32 %v2159_v48, 0.0 }
 0x19e   :  { %v2161_v9 = vpop.f32.mrf.mxu0  ;;  %4767 = vmatmul.mubr.msk.bf16.gmra.mxu1 %vm462_vm0, %v2364_v38 }
 0x19f   :  { %v2162_v42 = vadd.f32 %v6129_v47, %v2161_v9  ;;  %v2320_v0 = vmax.f32 %v2170_v62, 0.0 }
 0x1a0   :  { %v4708_v14 = vpop.f32.mrf.mxu0 }
 0x1a1   :  { %v2318_v25 = vmax.f32 %v2162_v42, 0.0  ;;  %v2366_v22 = vpack.c.bf16 %v2320_v0, %v2319_v60  ;;  %v2183_v30 = vadd.f32 %v4708_v14, %v6129_v47 }
 0x1a2   :  { %v2174_v43 = vpop.f32.mrf.mxu0 }
 0x1a3   :  { %v2365_v49 = vpack.c.bf16 %v2318_v25, %v2317_v13  ;;  %v2175_v55 = vadd.f32 %v6129_v47, %v2174_v43  ;;  %v2323_v13 = vmax.f32 %v2183_v30, 0.0 }
 0x1a4   :  { %v4709_v32 = vpop.f32.mrf.mxu0 }
 0x1a5   :  { %v2186_v59 = vadd.f32 %v4709_v32, %v6129_v47  ;;  %4770 = vmatprep.mubr.msk.bf16.mxu1 %vm462_vm0, %v2365_v49  ;;  %v2321_v8 = vmax.f32 %v2175_v55, 0.0 }
 0x1a6   :  { %v2177_v38 = vpop.f32.mrf.mxu0  ;;  %4771 = vmatmul.mubr.msk.bf16.gmra.mxu1 %vm462_vm0, %v2366_v22 }
 0x1a7   :  { %v2178_v62 = vadd.f32 %v6129_v47, %v2177_v38  ;;  %v2324_v48 = vmax.f32 %v2186_v59, 0.0 }
 0x1a8   :  { %v4712_v9 = vpop.f32.mrf.mxu0 }
 0x1a9   :  { %v2322_v42 = vmax.f32 %v2178_v62, 0.0  ;;  %v2368_v60 = vpack.c.bf16 %v2324_v48, %v2323_v13  ;;  %v2199_v14 = vadd.f32 %v4712_v9, %v6129_v47 }
 0x1aa   :  { %v2190_v0 = vpop.f32.mrf.mxu0 }
 0x1ab   :  { %v2367_v25 = vpack.c.bf16 %v2322_v42, %v2321_v8  ;;  %v2191_v32 = vadd.f32 %v6129_v47, %v2190_v0  ;;  %v2327_v8 = vmax.f32 %v2199_v14, 0.0 }
 0x1ac   :  { %v4713_v43 = vpop.f32.mrf.mxu0 }
 0x1ad   :  { %v2202_v49 = vadd.f32 %v4713_v43, %v6129_v47  ;;  %4774 = vmatprep.mubr.msk.bf16.mxu1 %vm462_vm0, %v2367_v25  ;;  %v2325_v30 = vmax.f32 %v2191_v32, 0.0  ;;  %v6204_v32 = vld [vmem:[%s7464_s6] ss:$0 sm:$0xff] }
 0x1ae   :  { %v2193_v22 = vpop.f32.mrf.mxu0  ;;  %4775 = vmatmul.mubr.msk.bf16.gmra.mxu1 %vm462_vm0, %v2368_v60 }
 0x1af   :  { %v2194_v59 = vadd.f32 %v6129_v47, %v2193_v22  ;;  %v2328_v55 = vmax.f32 %v2202_v49, 0.0 }
 0x1b0   :  { %v4716_v38 = vpop.f32.mrf.mxu0 }
 0x1b1   :  { %v2326_v62 = vmax.f32 %v2194_v59, 0.0  ;;  %v2370_v13 = vpack.c.bf16 %v2328_v55, %v2327_v8  ;;  %v2215_v9 = vadd.f32 %v4716_v38, %v6129_v47  ;;  %v1414_v8 = vadd.f32 %v6204_v32, %v5905_v7 }
 0x1b2   :  { %v2206_v48 = vpop.f32.mrf.mxu0 }
 0x1b3   :  { %v2369_v42 = vpack.c.bf16 %v2326_v62, %v2325_v30  ;;  %v2207_v43 = vadd.f32 %v6129_v47, %v2206_v48  ;;  %v2331_v30 = vmax.f32 %v2215_v9, 0.0  ;;  %v4029_v7 = vmul.f32 -1.442695, %v1414_v8 }
 0x1b4   :  { %v4717_v0 = vpop.f32.mrf.mxu0 }
 0x1b5   :  { %v2218_v25 = vadd.f32 %v4717_v0, %v6129_v47  ;;  %4778 = vmatprep.mubr.msk.bf16.mxu1 %vm462_vm0, %v2369_v42  ;;  %v2329_v59 = vmax.f32 %v2207_v43, 0.0  ;;  %v1412_v43 = vadd.f32 %v6204_v32, %v5913_v12  ;;  %v1418_v12 = vadd.f32 %v6204_v32, %v5929_v24 }
 0x1b6   :  { %v2209_v60 = vpop.f32.mrf.mxu0  ;;  %4779 = vmatmul.mubr.msk.bf16.gmra.mxu1 %vm462_vm0, %v2370_v13  ;;  %v1154_v13 = vadd.f32 %v5919_v19, %v5917_v18  ;;  %v1415_v18 = vadd.f32 %v6204_v32, %v5915_v17  ;;  %4877 = vpow2.f32 %v4029_v7  ;;  %v1170_v17 = vadd.f32 %v5943_v36, %v5941_v35 }
 0x1b7   :  { %v2210_v49 = vadd.f32 %v6129_v47, %v2209_v60  ;;  %v2332_v14 = vmax.f32 %v2218_v25, 0.0  ;;  %v4033_v24 = vmul.f32 -1.442695, %v1418_v12  ;;  %v1186_v12 = vadd.f32 %v5967_v53, %v5963_v51 }
 0x1b8   :  { %v4720_v22 = vpop.f32.mrf.mxu0  ;;  %v4030_v8 = vmul.f32 -1.442695, %v1415_v18 }
 0x1b9   :  { %v2330_v55 = vmax.f32 %v2210_v49, 0.0  ;;  %v2372_v48 = vpack.c.bf16 %v2332_v14, %v2331_v30  ;;  %v2231_v25 = vadd.f32 %v4720_v22, %v6129_v47 }
 0x1ba   :  { %v2222_v62 = vpop.f32.mrf.mxu0 }
 0x1bb   :  { %v2371_v38 = vpack.c.bf16 %v2330_v55, %v2329_v59  ;;  %v2223_v0 = vadd.f32 %v6129_v47, %v2222_v62  ;;  %v1413_v59 = vadd.f32 %v6204_v32, %v1154_v13  ;;  %v4027_v62 = vmul.f32 -1.442695, %v1412_v43 }
 0x1bc   :  { %v4721_v42 = vpop.f32.mrf.mxu0  ;;  %v2335_v22 = vmax.f32 %v2231_v25, 0.0  ;;  %v1419_v25 = vadd.f32 %v6204_v32, %v5939_v34  ;;  %v1422_v34 = vadd.f32 %v6204_v32, %v5953_v41 }
 0x1bd   :  { %v2234_v60 = vadd.f32 %v4721_v42, %v6129_v47  ;;  %4782 = vmatprep.mubr.msk.bf16.mxu1 %vm462_vm0, %v2371_v38  ;;  %v2333_v55 = vmax.f32 %v2223_v0, 0.0  ;;  %v1416_v42 = vadd.f32 %v6204_v32, %v5937_v29  ;;  %v4028_v13 = vmul.f32 -1.442695, %v1413_v59 }
 0x1be   :  { %v2225_v9 = vpop.f32.mrf.mxu0  ;;  %4783 = vmatmul.mubr.msk.bf16.gmra.mxu1 %vm462_vm0, %v2372_v48  ;;  %4879 = vpow2.f32 %v4027_v62 }
 0x1bf   :  { %v2226_v49 = vadd.f32 %v6129_v47, %v2225_v9  ;;  %v2336_v19 = vmax.f32 %v2234_v60, 0.0  ;;  %4881 = vpow2.f32 %v4030_v8  ;;  %v4031_v36 = vmul.f32 -1.442695, %v1416_v42 }
 0x1c0   :  { %v4724_v14 = vpop.f32.mrf.mxu0  ;;  %4883 = vpow2.f32 %v4028_v13 }
 0x1c1   :  { %v2334_v30 = vmax.f32 %v2226_v49, 0.0  ;;  %v2374_v60 = vpack.c.bf16 %v2336_v19, %v2335_v22  ;;  %v2247_v7 = vadd.f32 %v4724_v14, %v6129_v47  ;;  %v1417_v49 = vadd.f32 %v6204_v32, %v1170_v17 }
 0x1c2   :  { %v2238_v38 = vpop.f32.mrf.mxu0  ;;  %4885 = vpow2.f32 %v4033_v24  ;;  %v1423_v17 = vadd.f32 %v6204_v32, %v5965_v52 }
 0x1c3   :  { %v2373_v48 = vpack.c.bf16 %v2334_v30, %v2333_v55  ;;  %v2239_v0 = vadd.f32 %v6129_v47, %v2238_v38  ;;  %v4034_v30 = vmul.f32 -1.442695, %v1419_v25  ;;  %v2339_v14 = vmax.f32 %v2247_v7, 0.0 }
 0x1c4   :  { %v4725_v9 = vpop.f32.mrf.mxu0  ;;  %4887 = vpow2.f32 %v4031_v36  ;;  %v4032_v38 = vmul.f32 -1.442695, %v1417_v49  ;;  %v4038_v25 = vmul.f32 -1.442695, %v1423_v17  ;;  %v1424_v17 = vadd.f32 %v6204_v32, %v5985_v1 }
 0x1c5   :  { %v2250_v43 = vadd.f32 %v4725_v9, %v6129_v47  ;;  %4786 = vmatprep.mubr.msk.bf16.mxu1 %vm462_vm0, %v2373_v48  ;;  %v2337_v59 = vmax.f32 %v2239_v0, 0.0  ;;  %v1420_v48 = vadd.f32 %v6204_v32, %v5961_v46  ;;  %4889 = vpow2.f32 %v4034_v30  ;;  %v4878_v0 = vpop.eup %4877 }
 0x1c6   :  { %v2241_v29 = vpop.f32.mrf.mxu0  ;;  %4787 = vmatmul.mubr.msk.bf16.gmra.mxu1 %vm462_vm0, %v2374_v60  ;;  %v4037_v9 = vmul.f32 -1.442695, %v1422_v34  ;;  %v1421_v46 = vadd.f32 %v6204_v32, %v1186_v12  ;;  %4891 = vpow2.f32 %v4032_v38  ;;  %v4039_v1 = vmul.f32 -1.442695, %v1424_v17 }
 0x1c7   :  { %v2242_v35 = vadd.f32 %v6129_v47, %v2241_v29  ;;  %v2340_v18 = vmax.f32 %v2250_v43, 0.0  ;;  %v4035_v52 = vmul.f32 -1.442695, %v1420_v48 }
 0x1c8   :  { %v4728_v19 = vpop.f32.mrf.mxu0  ;;  %4893 = vpow2.f32 %v4037_v9 }
 0x1c9   :  { %v2338_v55 = vmax.f32 %v2242_v35, 0.0  ;;  %v2376_v8 = vpack.c.bf16 %v2340_v18, %v2339_v14  ;;  %v2263_v51 = vadd.f32 %v4728_v19, %v6129_v47  ;;  %v1426_v35 = vadd.f32 %v6204_v32, %v5977_v58 }
 0x1ca   :  { %v2254_v62 = vpop.f32.mrf.mxu0  ;;  %v4036_v19 = vmul.f32 -1.442695, %v1421_v46  ;;  %4895 = vpow2.f32 %v4035_v52 }
 0x1cb   :  { %v2375_v22 = vpack.c.bf16 %v2338_v55, %v2337_v59  ;;  %v2255_v60 = vadd.f32 %v6129_v47, %v2254_v62  ;;  %v2343_v36 = vmax.f32 %v2263_v51, 0.0  ;;  %v4880_v18 = vpop.eup %4879  ;;  %v1670_v55 = vadd.f32 1.0, %v4878_v0 }
 0x1cc   :  { %v4729_v42 = vpop.f32.mrf.mxu0  ;;  %v4882_v14 = vpop.eup %4881  ;;  %4897 = vpow2.f32 %v4038_v25  ;;  %v1668_v38 = vadd.f32 1.0, %v4880_v18  ;;  %v4041_v58 = vmul.f32 -1.442695, %v1426_v35 }
 0x1cd   :  { %v2266_v41 = vadd.f32 %v4729_v42, %v6129_v47  ;;  %4790 = vmatprep.mubr.msk.bf16.mxu1 %vm462_vm0, %v2375_v22  ;;  %v2341_v7 = vmax.f32 %v2255_v60, 0.0  ;;  %v4884_v22 = vpop.eup %4883  ;;  %4899 = vpow2.f32 %v4036_v19  ;;  %v1202_v60 = vadd.f32 %v5991_v6, %v5989_v5 }
 0x1ce   :  { %v2257_v53 = vpop.f32.mrf.mxu0  ;;  %4791 = vmatmul.mubr.msk.bf16.gmra.mxu1 %vm462_vm0, %v2376_v8  ;;  %4901 = vrcp.f32 %v1670_v55  ;;  %v1671_v9 = vadd.f32 1.0, %v4882_v14  ;;  %v1669_v46 = vadd.f32 1.0, %v4884_v22  ;;  %v1428_v19 = vadd.f32 %v6204_v32, %v6009_v21 }
 0x1cf   :  { %v2258_v13 = vadd.f32 %v6129_v47, %v2257_v53  ;;  %v2344_v43 = vmax.f32 %v2266_v41, 0.0  ;;  %v4886_v42 = vpop.eup %4885  ;;  %4903 = vrcp.f32 %v1668_v38  ;;  %v1425_v5 = vadd.f32 %v6204_v32, %v1202_v60 }
 0x1d0   :  { %v4732_v24 = vpop.f32.mrf.mxu0  ;;  %4905 = vpow2.f32 %v4041_v58  ;;  %v1431_v14 = vadd.f32 %v6204_v32, %v6011_v27  ;;  %v1429_v38 = vadd.f32 %v6204_v32, %v6013_v31  ;;  %v1432_v27 = vadd.f32 %v6204_v32, %v6031_v45 }
 0x1d1   :  { %v2342_v29 = vmax.f32 %v2258_v13, 0.0  ;;  %v2378_v30 = vpack.c.bf16 %v2344_v43, %v2343_v36  ;;  %v2279_v48 = vadd.f32 %v4732_v24, %v6129_v47  ;;  %v4888_v53 = vpop.eup %4887  ;;  %v1427_v13 = vadd.f32 %v6204_v32, %v5987_v4 }
 0x1d2   :  { %v2270_v49 = vpop.f32.mrf.mxu0  ;;  %v1674_v43 = vadd.f32 1.0, %v4886_v42  ;;  %v4890_v25 = vpop.eup %4889  ;;  %4907 = vrcp.f32 %v1671_v9  ;;  %v1430_v4 = vadd.f32 %v6204_v32, %v6007_v16  ;;  %v4040_v18 = vmul.f32 -1.442695, %v1425_v5 }
 0x1d3   :  { %v2377_v59 = vpack.c.bf16 %v2342_v29, %v2341_v7  ;;  %v2271_v62 = vadd.f32 %v6129_v47, %v2270_v49  ;;  %v2347_v24 = vmax.f32 %v2279_v48, 0.0  ;;  %v4892_v29 = vpop.eup %4891  ;;  %4909 = vrcp.f32 %v1669_v46 }
 0x1d4   :  { %v4733_v34 = vpop.f32.mrf.mxu0  ;;  %v4042_v35 = vmul.f32 -1.442695, %v1427_v13  ;;  %4911 = vrcp.f32 %v1674_v43  ;;  %v1675_v36 = vadd.f32 1.0, %v4890_v25  ;;  %v1434_v48 = vadd.f32 %v6204_v32, %v6023_v39 }
 0x1d5   :  { %v2282_v12 = vadd.f32 %v4733_v34, %v6129_v47  ;;  %4794 = vmatprep.mubr.msk.bf16.mxu1 %vm462_vm0, %v2377_v59  ;;  %v2345_v0 = vmax.f32 %v2271_v62, 0.0  ;;  %v4894_v49 = vpop.eup %4893  ;;  %4913 = vpow2.f32 %v4039_v1  ;;  %v1673_v59 = vadd.f32 1.0, %v4892_v29 }
 0x1d6   :  { %v2273_v8 = vpop.f32.mrf.mxu0  ;;  %4795 = vmatmul.mubr.msk.bf16.gmra.mxu1 %vm462_vm0, %v2378_v30  ;;  %v4045_v30 = vmul.f32 -1.442695, %v1430_v4  ;;  %v1678_v16 = vadd.f32 1.0, %v4894_v49  ;;  %v4043_v62 = vmul.f32 -1.442695, %v1428_v19  ;;  %v1435_v31 = vadd.f32 %v6204_v32, %v6033_v54 }
 0x1d7   :  { %v2274_v41 = vadd.f32 %v6129_v47, %v2273_v8  ;;  %v2348_v51 = vmax.f32 %v2282_v12, 0.0  ;;  %v1672_v47 = vadd.f32 1.0, %v4888_v53  ;;  %v4896_v55 = vpop.eup %4895  ;;  %v4046_v8 = vmul.f32 -1.442695, %v1431_v14 }
 0x1d8   :  { %v1676_v22 = vadd.f32 1.0, %v4896_v55  ;;  %v1433_v39 = vadd.f32 %v6204_v32, %v6035_v57  ;;  %v4047_v45 = vmul.f32 -1.442695, %v1432_v27  ;;  %v1438_v46 = vadd.f32 %v6204_v32, %v6045_v63 }
 0x1d9   :  { %v2346_v52 = vmax.f32 %v2274_v41, 0.0  ;;  %v2380_v7 = vpack.c.bf16 %v2348_v51, %v2347_v24  ;;  %4915 = vrcp.f32 %v1672_v47  ;;  %v4898_v34 = vpop.eup %4897  ;;  %v4044_v41 = vmul.f32 -1.442695, %v1429_v38 }
 0x1da   :  { %4917 = vpow2.f32 %v4042_v35  ;;  %v4900_v12 = vpop.eup %4899  ;;  %v1679_v58 = vadd.f32 1.0, %v4898_v34  ;;  %v4049_v51 = vmul.f32 -1.442695, %v1434_v48  ;;  %v4050_v54 = vmul.f32 -1.442695, %v1435_v31 }
 0x1db   :  { %v2379_v6 = vpack.c.bf16 %v2346_v52, %v2345_v0  ;;  %4919 = vrcp.f32 %v1675_v36  ;;  %v6276_v21 = vpop.eup %4901  ;;  %v1677_v17 = vadd.f32 1.0, %v4900_v12  ;;  %v1436_v43 = vadd.f32 %v6204_v32, %v6047_v3 }
 0x1dc   :  { %4921 = vpow2.f32 %v4040_v18  ;;  %v6282_v42 = vpop.eup %4903  ;;  %v4048_v57 = vmul.f32 -1.442695, %v1433_v39  ;;  %v4053_v1 = vmul.f32 -1.442695, %v1438_v46  ;;  %v1439_v63 = vadd.f32 %v6204_v32, %v6049_v11 }
 0x1dd   :  { %4798 = vmatprep.mubr.msk.bf16.mxu1 %vm462_vm0, %v2379_v6  ;;  %4923 = vrcp.f32 %v1673_v59  ;;  %v4906_v60 = vpop.eup %4905  ;;  %v1437_v3 = vadd.f32 %v6204_v32, %v6052_v20  ;;  %v1442_v11 = vadd.f32 %v6204_v32, %v6054_v23  ;;  %v1440_v20 = vadd.f32 %v6204_v32, %v6056_v28 }
 0x1de   :  { %4799 = vmatmul.mubr.msk.bf16.gmra.mxu1 %vm462_vm0, %v2380_v7  ;;  %4925 = vpow2.f32 %v4045_v30  ;;  %v1682_v0 = vadd.f32 1.0, %v4906_v60  ;;  %v4051_v7 = vmul.f32 -1.442695, %v1436_v43  ;;  %v4054_v36 = vmul.f32 -1.442695, %v1439_v63 }
 0x1df   :  { %4927 = vrcp.f32 %v1678_v16  ;;  %v6286_v9 = vpop.eup %4907  ;;  %v4052_v59 = vmul.f32 -1.442695, %v1437_v3  ;;  %v1443_v34 = vadd.f32 %v6204_v32, %v6058_v37  ;;  %v4057_v23 = vmul.f32 -1.442695, %v1442_v11 }
 0x1e0   :  { %4929 = vpow2.f32 %v4043_v62  ;;  %v6290_v53 = vpop.eup %4909  ;;  %v1441_v12 = vadd.f32 %v6204_v32, %v6060_v40  ;;  %v4055_v28 = vmul.f32 -1.442695, %v1440_v20 }
 0x1e1   :  { %4931 = vrcp.f32 %v1676_v22  ;;  %v6294_v13 = vpop.eup %4911 }
 0x1e2   :  { %4933 = vrcp.f32 %v1679_v58  ;;  %v4914_v52 = vpop.eup %4913  ;;  %v4058_v58 = vmul.f32 -1.442695, %v1443_v34  ;;  %v4056_v27 = vmul.f32 -1.442695, %v1441_v12 }
 0x1e3   :  { %4935 = vpow2.f32 %v4046_v8  ;;  %v1680_v6 = vadd.f32 1.0, %v4914_v52 }
 0x1e4   :  { %4937 = vrcp.f32 %v1677_v17  ;;  %v1446_v17 = vadd.f32 %v6204_v32, %v6062_v44 }
 0x1e5   :  { %4939 = vpow2.f32 %v4044_v41 }
 0x1e6   :  { %v6298_v24 = vpop.eup %4915  ;;  %4941 = vpow2.f32 %v4049_v51  ;;  %v4061_v46 = vmul.f32 -1.442695, %v1446_v17 }
 0x1e7   :  { %v4918_v25 = vpop.eup %4917  ;;  %4943 = vpow2.f32 %v4047_v45 }
 0x1e8   :  { %v6302_v5 = vpop.eup %4919  ;;  %4945 = vrcp.f32 %v1682_v0  ;;  %v1683_v35 = vadd.f32 1.0, %v4918_v25  ;;  %v1444_v0 = vadd.f32 %v6204_v32, %v6064_v50  ;;  %v1445_v50 = vadd.f32 %v6204_v32, %v6068_v61 }
 0x1e9   :  { %v4922_v47 = vpop.eup %4921  ;;  %4947 = vpow2.f32 %v4050_v54  ;;  %v1448_v61 = vadd.f32 %v6204_v32, %v6072_v10 }
 0x1ea   :  { %v6306_v29 = vpop.eup %4923  ;;  %4949 = vpow2.f32 %v4048_v57  ;;  %v1681_v18 = vadd.f32 1.0, %v4922_v47  ;;  %v1447_v57 = vadd.f32 %v6204_v32, %v6066_v56  ;;  %v1450_v56 = vadd.f32 %v6204_v32, %v6070_v2 }
 0x1eb   :  { %v4926_v4 = vpop.eup %4925  ;;  %4951 = vpow2.f32 %v4053_v1 }
 0x1ec   :  { %v6310_v49 = vpop.eup %4927  ;;  %4953 = vrcp.f32 %v1680_v6  ;;  %v1686_v30 = vadd.f32 1.0, %v4926_v4  ;;  %v4059_v6 = vmul.f32 -1.442695, %v1444_v0 }
 0x1ed   :  { %v4930_v19 = vpop.eup %4929  ;;  %4955 = vpow2.f32 %v4051_v7 }
 0x1ee   :  { %v6314_v55 = vpop.eup %4931  ;;  %4957 = vrcp.f32 %v1683_v35  ;;  %v1684_v62 = vadd.f32 1.0, %v4930_v19  ;;  %v4062_v35 = vmul.f32 -1.442695, %v1447_v57 }
 0x1ef   :  { %v6318_v16 = vpop.eup %4933  ;;  %4959 = vpow2.f32 %v4054_v36 }
 0x1f0   :  { %v4936_v14 = vpop.eup %4935  ;;  %4961 = vrcp.f32 %v1681_v18  ;;  %v4060_v18 = vmul.f32 -1.442695, %v1445_v50 }
 0x1f1   :  { %v6322_v22 = vpop.eup %4937  ;;  %4963 = vpow2.f32 %v4052_v59  ;;  %v1687_v8 = vadd.f32 1.0, %v4936_v14 }
 0x1f2   :  { %v4940_v38 = vpop.eup %4939  ;;  %4965 = vrcp.f32 %v1686_v30  ;;  %v4065_v30 = vmul.f32 -1.442695, %v1450_v56 }
 0x1f3   :  { %v4942_v48 = vpop.eup %4941  ;;  %4967 = vpow2.f32 %v4057_v23  ;;  %v1685_v41 = vadd.f32 1.0, %v4940_v38  ;;  %v1451_v23 = vadd.f32 %v6204_v32, %v6074_v15 }
 0x1f4   :  { %v4944_v37 = vpop.eup %4943  ;;  %4969 = vrcp.f32 %v1684_v62  ;;  %v1690_v31 = vadd.f32 1.0, %v4942_v48  ;;  %v4063_v62 = vmul.f32 -1.442695, %v1448_v61  ;;  %v1454_v48 = vadd.f32 %v6204_v32, %v6078_v33 }
 0x1f5   :  { %v6326_v60 = vpop.eup %4945  ;;  %4971 = vpow2.f32 %v4055_v28  ;;  %v1688_v39 = vadd.f32 1.0, %v4944_v37  ;;  %v1449_v28 = vadd.f32 %v6204_v32, %v6076_v26  ;;  %v4066_v15 = vmul.f32 -1.442695, %v1451_v23  ;;  %v7499_v23 = vld [vmem:[#allocation9_spill] sm:$0xff] }
 0x1f6   :  { %v4948_v40 = vpop.eup %4947  ;;  %4973 = vpow2.f32 %v4058_v58 }
 0x1f7   :  { %v4950_v51 = vpop.eup %4949  ;;  %4975 = vrcp.f32 %v1687_v8  ;;  %v1691_v44 = vadd.f32 1.0, %v4948_v40  ;;  %v7495_v40 = vld [vmem:[#allocation5_spill] sm:$0xff] }
 0x1f8   :  { %v4952_v45 = vpop.eup %4951  ;;  %4977 = vpow2.f32 %v4056_v27  ;;  %v1689_v43 = vadd.f32 1.0, %v4950_v51  ;;  %v1452_v26 = vadd.f32 %v6204_v32, %v7495_v40  ;;  %v4069_v51 = vmul.f32 -1.442695, %v1454_v48  ;;  %v4357_v40 = vld [vmem:[%s7460_s2 + $0x8] sm:$0xff]  }
 0x1f9   :  { %v6330_v52 = vpop.eup %4953  ;;  %4979 = vrcp.f32 %v1685_v41  ;;  %v1694_v1 = vadd.f32 1.0, %v4952_v45  ;;  %v4064_v41 = vmul.f32 -1.442695, %v1449_v28 }
 0x1fa   :  { %v4956_v54 = vpop.eup %4955  ;;  %4981 = vrcp.f32 %v1690_v31  ;;  %v6367_v31 = vld [vmem:[%s7465_s7] ss:$0 sm:$0xff] }
 0x1fb   :  { %v6334_v25 = vpop.eup %4957  ;;  %4983 = vrcp.f32 %v1688_v39  ;;  %v1692_v7 = vadd.f32 1.0, %v4956_v54  ;;  %v6377_v0 = vmul.f32 %v6276_v21, %v6367_v31  ;;  %v4067_v54 = vmul.f32 -1.442695, %v1452_v26 }
 0x1fc   :  { %v4960_v63 = vpop.eup %4959  ;;  %4985 = vpow2.f32 %v4061_v46  ;;  %v6391_v21 = vmul.f32 %v6290_v53, %v6367_v31  ;;  %v6395_v50 = vmul.f32 %v6294_v13, %v6367_v31  ;;  %v6409_v53 = vmul.f32 %v6306_v29, %v6367_v31 }
 0x1fd   :  { %v6338_v47 = vpop.eup %4961  ;;  %4987 = vrcp.f32 %v1691_v44  ;;  %v1695_v36 = vadd.f32 1.0, %v4960_v63  ;;  %v6423_v29 = vmul.f32 %v6318_v16, %v6367_v31  ;;  %v1456_v16 = vadd.f32 %v6204_v32, %v7499_v23 }
 0x1fe   :  { %v4964_v3 = vpop.eup %4963  ;;  %4989 = vrcp.f32 %v1689_v43  ;;  %v7496_v43 = vld [vmem:[#allocation6_spill] sm:$0xff] }
 0x1ff   :  { %v6342_v4 = vpop.eup %4965  ;;  %4991 = vrcp.f32 %v1694_v1  ;;  %v1693_v59 = vadd.f32 1.0, %v4964_v3  ;;  %v1455_v57 = vadd.f32 %v6204_v32, %v7496_v43  ;;  %v6383_v1 = vmul.f32 %v6282_v42, %v6367_v31  ;;  %v7497_v3 = vld [vmem:[#allocation7_spill] sm:$0xff] }
 0x200   :  { %v4968_v11 = vpop.eup %4967  ;;  %4993 = vpow2.f32 %v4059_v6  ;;  %v6387_v6 = vmul.f32 %v6286_v9, %v6367_v31  ;;  %v6401_v42 = vmul.f32 %v6302_v5, %v6367_v31  ;;  %v6405_v9 = vmul.f32 %v6298_v24, %v6367_v31  ;;  %v7498_v24 = vld [vmem:[#allocation8_spill] sm:$0xff] }
 0x201   :  { %v6346_v19 = vpop.eup %4969  ;;  %4995 = vrcp.f32 %v1692_v7  ;;  %v1698_v2 = vadd.f32 1.0, %v4968_v11  ;;  %v6417_v11 = vmul.f32 %v6314_v55, %v6367_v31  ;;  %v1458_v61 = vadd.f32 %v6204_v32, %v7498_v24 }
 0x202   :  { %v4972_v20 = vpop.eup %4971  ;;  %4997 = vpow2.f32 %v4062_v35  ;;  %v1453_v35 = vadd.f32 %v6204_v32, %v7497_v3  ;;  %v6431_v55 = vmul.f32 %v6326_v60, %v6367_v31  ;;  %v4235_v3 = vunpack.c.l.bf16 %v4357_v40 }
 0x203   :  { %v4974_v34 = vpop.eup %4973  ;;  %4999 = vrcp.f32 %v1695_v36  ;;  %v1696_v10 = vadd.f32 1.0, %v4972_v20  ;;  %v6413_v36 = vmul.f32 %v6310_v49, %v6367_v31  ;;  %v6427_v49 = vmul.f32 %v6322_v22, %v6367_v31 }
 0x204   :  { %v6350_v14 = vpop.eup %4975  ;;  %5001 = vpow2.f32 %v4060_v18  ;;  %v1699_v58 = vadd.f32 1.0, %v4974_v34  ;;  %v4070_v18 = vmul.f32 -1.442695, %v1455_v57  ;;  %v6447_v22 = vmul.f32 %v6338_v47, %v6367_v31 }
 0x205   :  { %v4978_v12 = vpop.eup %4977  ;;  %5003 = vrcp.f32 %v1693_v59  ;;  %v6461_v47 = vmul.f32 %v6350_v14, %v6367_v31 }
 0x206   :  { %v6354_v38 = vpop.eup %4979  ;;  %5005 = vpow2.f32 %v4065_v30  ;;  %v1697_v27 = vadd.f32 1.0, %v4978_v12  ;;  %v6435_v30 = vmul.f32 %v6330_v52, %v6367_v31  ;;  %v6451_v52 = vmul.f32 %v6342_v4, %v6367_v31 }
 0x207   :  { %v6358_v8 = vpop.eup %4981  ;;  %5007 = vrcp.f32 %v1698_v2  ;;  %v4068_v2 = vmul.f32 -1.442695, %v1453_v35  ;;  %v6465_v4 = vmul.f32 %v6354_v38, %v6367_v31 }
 0x208   :  { %v6360_v37 = vpop.eup %4983  ;;  %5009 = vpow2.f32 %v4063_v62  ;;  %v6443_v62 = vmul.f32 %v6334_v25, %v6367_v31  ;;  %v7500_v25 = vld [vmem:[#allocation10_spill] sm:$0xff] }
 0x209   :  { %v4986_v17 = vpop.eup %4985  ;;  %5011 = vrcp.f32 %v1696_v10  ;;  %v6455_v10 = vmul.f32 %v6346_v19, %v6367_v31  ;;  %v1459_v48 = vadd.f32 %v6204_v32, %v7500_v25  ;;  %v6469_v19 = vmul.f32 %v6358_v8, %v6367_v31  ;;  %v7501_v8 = vld [vmem:[#allocation11_spill] sm:$0xff]  ;;  %v6529_v25 = vld [vmem:[%s7460_s2 + $0x18] sm:$0xff]  }
 0x20a   :  { %v6369_v33 = vpop.eup %4987  ;;  %5013 = vrcp.f32 %v1699_v58  ;;  %v1702_v46 = vadd.f32 1.0, %v4986_v17  ;;  %v4073_v58 = vmul.f32 -1.442695, %v1458_v61  ;;  %v6480_v26 = vmul.f32 %v6360_v37, %v6367_v31 }
 0x20b   :  { %v6371_v39 = vpop.eup %4989  ;;  %5015 = vpow2.f32 %v4066_v15  ;;  %v6476_v14 = vmul.f32 %v6369_v33, %v6367_v31  ;;  %v4074_v43 = vmul.f32 -1.442695, %v1459_v48  ;;  %v4230_v33 = vld [vmem:[%s7460_s2] sm:$0xff]  }
 0x20c   :  { %v6373_v45 = vpop.eup %4991  ;;  %5017 = vrcp.f32 %v1697_v27  ;;  %v4231_v61 = vunpack.c.l.bf16 %v4230_v33 }
 0x20d   :  { %v4994_v44 = vpop.eup %4993  ;;  %5019 = vpow2.f32 %v4064_v41  ;;  %v4071_v41 = vmul.f32 -1.442695, %v1456_v16  ;;  %v6493_v37 = vmul.f32 %v6373_v45, %v6367_v31  ;;  %v6507_v45 = vstv %s6439_s10 }
 0x20e   :  { %v4996_v63 = vpop.eup %4995  ;;  %5021 = vpow2.f32 %v4069_v51  ;;  %v1700_v13 = vadd.f32 1.0, %v4994_v44  ;;  %v6486_v44 = vmul.f32 %v6371_v39, %v6367_v31 }
 0x20f   :  { %v4998_v7 = vpop.eup %4997  ;;  %5023 = vrcp.f32 %v1702_v46  ;;  %v1457_v46 = vadd.f32 %v6204_v32, %v7501_v8  ;;  %v6496_v57 = vmul.f32 %v4996_v63, %v6367_v31  ;;  %v2991_v8 = vmul.f32 %v4231_v61, %v6507_v45 }
 0x210   :  { %v5000_v56 = vpop.eup %4999  ;;  %5025 = vpow2.f32 %v4067_v54  ;;  %v1703_v20 = vadd.f32 1.0, %v4998_v7 }
 0x211   :  { %v5002_v5 = vpop.eup %5001  ;;  %5027 = vrcp.f32 %v1700_v13  ;;  %v6499_v39 = vmul.f32 %v5000_v56, %v6367_v31  ;;  %v4072_v63 = vmul.f32 -1.442695, %v1457_v46  ;;  %v4232_v46 = vunpack.c.h.bf16 %v4230_v33 }
 0x212   :  { %v5004_v59 = vpop.eup %5003  ;;  %v1701_v12 = vadd.f32 1.0, %v5002_v5  ;;  %5029 = vpow2.f32 %v4070_v18  ;;  %v7502_v18 = vld [vmem:[#allocation12_spill] sm:$0xff] }
 0x213   :  { %v5006_v34 = vpop.eup %5005  ;;  %5031 = vrcp.f32 %v1703_v20  ;;  %v6502_v35 = vmul.f32 %v5004_v59, %v6367_v31  ;;  %v1462_v24 = vadd.f32 %v6204_v32, %v7502_v18  ;;  %v6517_v59 = vld [vmem:[%s7469_s11] ss:$0 sm:$0xff] }
 0x214   :  { %v5008_v60 = vpop.eup %5007  ;;  %v1706_v27 = vadd.f32 1.0, %v5006_v34  ;;  %5033 = vpow2.f32 %v4068_v2  ;;  %v6512_v2 = vpop.f32.mrf.mxu1 }
 0x215   :  { %v5010_v28 = vpop.eup %5009  ;;  %5035 = vrcp.f32 %v1701_v12  ;;  %v6510_v20 = vmul.f32 %v5008_v60, %v6367_v31  ;;  %7503 = vst [vmem:[#allocation5_spill] sm:$0xff] %v6512_v2  ;;  %v2993_v60 = vmul.f32 %v4235_v3, %v6507_v45 }
 0x216   :  { %v5012_v15 = vpop.eup %5011  ;;  %v1704_v51 = vadd.f32 1.0, %v5010_v28  ;;  %5037 = vpow2.f32 %v4073_v58  ;;  %v4236_v58 = vunpack.c.h.bf16 %v4357_v40 }
 0x217   :  { %v5014_v17 = vpop.eup %5013  ;;  %5039 = vrcp.f32 %v1706_v27  ;;  %v6523_v16 = vmul.f32 %v5012_v15, %v6367_v31  ;;  %v4077_v27 = vmul.f32 -1.442695, %v1462_v24  ;;  %v7507_v15 = vld [vmem:[#allocation14_spill] sm:$0xff] }
 0x218   :  { %v5016_v38 = vpop.eup %5015  ;;  %5041 = vpow2.f32 %v4071_v41  ;;  %v6520_v23 = vmul.f32 %v5014_v17, %v6367_v31  ;;  %v7506_v17 = vld [vmem:[#allocation13_spill] sm:$0xff]  ;;  %v2994_v33 = vmul.f32 %v4236_v58, %v6507_v45  ;;  %v7509_v58 = vld [vmem:[#allocation15_spill] sm:$0xff] }
 0x219   :  { %v5018_v54 = vpop.eup %5017  ;;  %v1707_v5 = vadd.f32 1.0, %v5016_v38  ;;  %5043 = vrcp.f32 %v1704_v51  ;;  %7504 = vst [vmem:[#allocation6_spill] sm:$0xff] %v6523_v16  ;;  %v1460_v41 = vadd.f32 %v6204_v32, %v7506_v17  ;;  %v1463_v38 = vadd.f32 %v6204_v32, %v7507_v15 }
 0x21a   :  { %v5020_v7 = vpop.eup %5019  ;;  %5045 = vpow2.f32 %v4074_v43  ;;  %v6532_v48 = vmul.f32 %v5018_v54, %v6367_v31  ;;  %v6543_v54 = vld [vmem:[%s7460_s2 + $0x10] sm:$0xff]  }
 0x21b   :  { %v5022_v13 = vpop.eup %5021  ;;  %v1705_v56 = vadd.f32 1.0, %v5020_v7  ;;  %5047 = vrcp.f32 %v1707_v5  ;;  %v4075_v17 = vmul.f32 -1.442695, %v1460_v41  ;;  %v4078_v15 = vmul.f32 -1.442695, %v1463_v38 }
 0x21c   :  { %v5024_v34 = vpop.eup %5023  ;;  %v1710_v28 = vadd.f32 1.0, %v5022_v13  ;;  %7505 = vst [vmem:[#allocation7_spill] sm:$0xff] %v6532_v48  ;;  %5049 = vpow2.f32 %v4072_v63  ;;  %v4243_v13 = vunpack.c.l.bf16 %v6529_v25  ;;  %v4244_v38 = vunpack.c.h.bf16 %v6529_v25 }
 0x21d   :  { %v5026_v12 = vpop.eup %5025  ;;  %5051 = vrcp.f32 %v1705_v56  ;;  %v6547_v5 = vmul.f32 %v5024_v34, %v6367_v31 }
 0x21e   :  { %v5028_v43 = vpop.eup %5027  ;;  %v1708_v7 = vadd.f32 1.0, %v5026_v12  ;;  %5053 = vrcp.f32 %v1710_v28  ;;  %v4239_v12 = vunpack.c.l.bf16 %v6543_v54  ;;  %v2997_v41 = vmul.f32 %v4243_v13, %v6507_v45 }
 0x21f   :  { %7508 = vst [vmem:[#allocation8_spill] sm:$0xff] %v6547_v5  ;;  %v5030_v18 = vpop.eup %5029  ;;  %5055 = vpow2.f32 %v4077_v27  ;;  %v2992_v5 = vmul.f32 %v4232_v46, %v6507_v45 }
 0x220   :  { %v6551_v61 = vpop.eup %5031  ;;  %5057 = vrcp.f32 %v1708_v7  ;;  %v6571_v7 = vld [vmem:[%s7460_s2 + $0x28] sm:$0xff]   ;;  %v2995_v25 = vmul.f32 %v4239_v12, %v6507_v45 }
 0x221   :  { %5059 = vpow2.f32 %v4075_v17 }
 0x226   :  { %v4740_v51 = vpop.f32.mrf.mxu1 }
 0x227   :  { %v2543_v40 = vadd.f32 %v4740_v51, %v6517_v59  ;;  %v5034_v51 = vpop.eup %5033 }
 0x228   :  { %v2534_v3 = vpop.f32.mrf.mxu1 }
 0x229   :  { %v3057_v24 = vmul.f32 %v2993_v60, %v2543_v40  ;;  %v2535_v63 = vadd.f32 %v6517_v59, %v2534_v3  ;;  %v6557_v60 = vpop.eup %5035  ;;  %v1461_v40 = vadd.f32 %v6204_v32, %v7509_v58 }
 0x22a   :  { %v4741_v56 = vpop.f32.mrf.mxu1  ;;  %v6563_v3 = vpop.eup %5037 }
 0x22b   :  { %v3055_v2 = vmul.f32 %v2991_v8, %v2535_v63  ;;  %v2546_v34 = vadd.f32 %v4741_v56, %v6517_v59  ;;  %v3121_v28 = vadd.f32 %v3057_v24, %v6377_v0  ;;  %v6573_v24 = vpop.eup %5039  ;;  %v1711_v56 = vadd.f32 1.0, %v5030_v18  ;;  %v6588_v18 = vld [vmem:[%s7460_s2 + $0x20] sm:$0xff]  }
 0x22c   :  { %v2537_v27 = vpop.f32.mrf.mxu1  ;;  %v4076_v17 = vmul.f32 -1.442695, %v1461_v40 }
 0x22d   :  { %v3058_v8 = vmul.f32 %v2994_v33, %v2546_v34  ;;  %v2538_v63 = vadd.f32 %v6517_v59, %v2537_v27  ;;  %v3189_v46 = vsel %vm462_vm0, %v3121_v28, 0.0  ;;  %v3119_v0 = vadd.f32 %v3055_v2, %v6383_v1  ;;  %v6580_v28 = vpop.eup %5041 }
 0x22e   :  { %3190 = vadd.xlane.f32.xlu1 %v3189_v46  ;;  %v4744_v13 = vpop.f32.mrf.mxu1  ;;  %v4240_v33 = vunpack.c.h.bf16 %v6543_v54  ;;  %v6578_v34 = vmul.f32 %v5028_v43, %v6367_v31  ;;  %v6590_v12 = vpop.eup %5043  ;;  %v7511_v54 = vld [vmem:[#allocation16_spill] sm:$0xff]  ;;  %5061 = vrcp.f32 %v1711_v56  ;;  %v4252_v56 = vunpack.c.h.bf16 %v6571_v7 }
 0x22f   :  { %v3056_v1 = vmul.f32 %v2992_v5, %v2538_v63  ;;  %v2559_v2 = vadd.f32 %v4744_v13, %v6517_v59  ;;  %v3183_v58 = vsel %vm462_vm0, %v3119_v0, 0.0  ;;  %v3122_v27 = vadd.f32 %v3058_v8, %v6387_v6  ;;  %v6596_v0 = vpop.eup %5045 }
 0x230   :  { %7510 = vst [vmem:[#allocation9_spill] sm:$0xff] %v6578_v34  ;;  %v1466_v43 = vadd.f32 %v6204_v32, %v7511_v54  ;;  %v2550_v46 = vpop.f32.mrf.mxu1  ;;  %3184 = vadd.xlane.f32.xlu0 %v3183_v58  ;;  %v2998_v5 = vmul.f32 %v4244_v38, %v6507_v45  ;;  %v4251_v63 = vunpack.c.l.bf16 %v6571_v7  ;;  %v2996_v32 = vmul.f32 %v4240_v33, %v6507_v45  ;;  %v6603_v38 = vpop.eup %5047  ;;  %v7513_v7 = vld [vmem:[#allocation17_spill] sm:$0xff] }
 0x231   :  { %v3061_v6 = vmul.f32 %v2997_v41, %v2559_v2  ;;  %v2551_v8 = vadd.f32 %v6517_v59, %v2550_v46  ;;  %v3192_v13 = vsel %vm462_vm0, %v3122_v27, 0.0  ;;  %v3120_v34 = vadd.f32 %v3056_v1, %v6391_v21  ;;  %v6608_v27 = vpop.eup %5049 }
 0x232   :  { %3193 = vadd.xlane.f32.xlu1 %v3192_v13  ;;  %v4745_v48 = vpop.f32.mrf.mxu1  ;;  %v4247_v58 = vunpack.c.l.bf16 %v6588_v18  ;;  %v1709_v21 = vadd.f32 1.0, %v5034_v51  ;;  %5063 = vpow2.f32 %v4078_v15  ;;  %v6613_v33 = vmul.f32 %v6551_v61, %v6367_v31  ;;  %v6615_v1 = vpop.eup %5051  ;;  %v6622_v15 = vld [vmem:[%s7460_s2 + $0x38] sm:$0xff]   ;;  %v6629_v61 = vld [vmem:[%s7464_s6] ss:$0 sm:$0xff] }
 0x233   :  { %v3059_v54 = vmul.f32 %v2995_v25, %v2551_v8  ;;  %v2562_v16 = vadd.f32 %v4745_v48, %v6517_v59  ;;  %v3186_v41 = vsel %vm462_vm0, %v3120_v34, 0.0  ;;  %v3125_v2 = vadd.f32 %v3061_v6, %v6395_v50  ;;  %v6624_v51 = vpop.eup %5053 }
 0x234   :  { %v2553_v40 = vpop.f32.mrf.mxu1  ;;  %3187 = vadd.xlane.f32.xlu0 %v3186_v41  ;;  %7512 = vst [vmem:[#allocation10_spill] sm:$0xff] %v6613_v33  ;;  %v4081_v25 = vmul.f32 -1.442695, %v1466_v43  ;;  %v3001_v50 = vmul.f32 %v4251_v63, %v6507_v45  ;;  %v1464_v43 = vadd.f32 %v6629_v61, %v7513_v7  ;;  %v2999_v46 = vmul.f32 %v4247_v58, %v6507_v45  ;;  %v6636_v6 = vpop.eup %5055  ;;  %v4362_v7 = vld [vmem:[%s7460_s2 + $0x30] sm:$0xff]  }
 0x235   :  { %v3062_v48 = vmul.f32 %v2998_v5, %v2562_v16  ;;  %v2554_v34 = vadd.f32 %v6517_v59, %v2553_v40  ;;  %v3201_v5 = vsel %vm462_vm0, %v3125_v2, 0.0  ;;  %v4248_v63 = vunpack.c.h.bf16 %v6588_v18 }
 0x236   :  { %v4748_v16 = vpop.f32.mrf.mxu1  ;;  %v3123_v40 = vadd.f32 %v3059_v54, %v6405_v9  ;;  %5065 = vrcp.f32 %v1709_v21  ;;  %v1714_v58 = vadd.f32 1.0, %v6563_v3  ;;  %v3002_v18 = vmul.f32 %v4252_v56, %v6507_v45 }
 0x237   :  { %v3060_v8 = vmul.f32 %v2996_v32, %v2554_v34  ;;  %v2575_v13 = vadd.f32 %v4748_v16, %v6517_v59  ;;  %v3126_v41 = vadd.f32 %v3062_v48, %v6401_v42  ;;  %v4259_v2 = vunpack.c.l.bf16 %v6622_v15  ;;  %v6647_v32 = vpop.eup %5057 }
 0x238   :  { %v2566_v33 = vpop.f32.mrf.mxu1  ;;  %3202 = vadd.xlane.f32.xlu0 %v3201_v5  ;;  %5067 = vpow2.f32 %v4076_v17  ;;  %v3000_v3 = vmul.f32 %v4248_v63, %v6507_v45  ;;  %v4255_v48 = vunpack.c.l.bf16 %v4362_v7  ;;  %v6655_v56 = vmul.f32 %v6557_v60, %v6367_v31 }
 0x239   :  { %v3065_v34 = vmul.f32 %v3001_v50, %v2575_v13  ;;  %v2567_v42 = vadd.f32 %v6517_v59, %v2566_v33  ;;  %v3204_v9 = vsel %vm462_vm0, %v3126_v41, 0.0  ;;  %v3124_v54 = vadd.f32 %v3060_v8, %v6409_v53  ;;  %v7514_v53 = vld [vmem:[#allocation18_spill] sm:$0xff]  ;;  %v6663_v41 = vpop.eup %5059 }
 0x23a   :  { %3205 = vadd.xlane.f32.xlu1 %v3204_v9  ;;  %v4749_v21 = vpop.f32.mrf.mxu1  ;;  %v3195_v50 = vsel %vm462_vm0, %v3123_v40, 0.0  ;;  %5069 = vrcp.f32 %v1714_v58  ;;  %v4079_v13 = vmul.f32 -1.442695, %v1464_v43  ;;  %v1467_v17 = vadd.f32 %v6629_v61, %v7514_v53 }
 0x23b   :  { %v3063_v16 = vmul.f32 %v2999_v46, %v2567_v42  ;;  %v2578_v5 = vadd.f32 %v4749_v21, %v6517_v59  ;;  %v3129_v33 = vadd.f32 %v3065_v34, %v6413_v36  ;;  %v4260_v63 = vunpack.c.h.bf16 %v6622_v15  ;;  %v6671_v36 = vld [vmem:[%s7460_s2 + $0x48] sm:$0xff]   ;;  %v6676_v9 = vpop.eup %5061 }
 0x23c   :  { %v2569_v8 = vpop.f32.mrf.mxu1  ;;  %3196 = vadd.xlane.f32.xlu0 %v3195_v50  ;;  %v3005_v42 = vmul.f32 %v4259_v2, %v6507_v45  ;;  %v3198_v40 = vsel %vm462_vm0, %v3124_v54, 0.0  ;;  %v1712_v43 = vadd.f32 1.0, %v6580_v28  ;;  %v3003_v15 = vmul.f32 %v4255_v48, %v6507_v45  ;;  %v4364_v28 = vld [vmem:[%s7460_s2 + $0x40] sm:$0xff]  }
 0x23d   :  { %v3066_v60 = vmul.f32 %v3002_v18, %v2578_v5  ;;  %v2570_v46 = vadd.f32 %v6517_v59, %v2569_v8  ;;  %v3213_v34 = vsel %vm462_vm0, %v3129_v33, 0.0  ;;  %v4256_v18 = vunpack.c.h.bf16 %v4362_v7  ;;  %v7515_v8 = vld [vmem:[#allocation19_spill] sm:$0xff] }
 0x23e   :  { %v4752_v58 = vpop.f32.mrf.mxu1  ;;  %3199 = vadd.xlane.f32.xlu1 %v3198_v40  ;;  %v3127_v5 = vadd.f32 %v3063_v16, %v6417_v11  ;;  %5071 = vpow2.f32 %v4081_v25  ;;  %v3006_v48 = vmul.f32 %v4260_v63, %v6507_v45  ;;  %v4267_v7 = vunpack.c.l.bf16 %v6671_v36 }
 0x23f   :  { %v3064_v21 = vmul.f32 %v3000_v3, %v2570_v46  ;;  %v2591_v2 = vadd.f32 %v4752_v58, %v6517_v59  ;;  %v3130_v54 = vadd.f32 %v3066_v60, %v6423_v29  ;;  %v6688_v3 = vmul.f32 %v6573_v24, %v6367_v31  ;;  %v6690_v33 = vpop.eup %5063 }
 0x240   :  { %v2582_v50 = vpop.f32.mrf.mxu1  ;;  %3214 = vadd.xlane.f32.xlu0 %v3213_v34  ;;  %v4082_v25 = vmul.f32 -1.442695, %v1467_v17  ;;  %v1465_v60 = vadd.f32 %v6629_v61, %v7515_v8  ;;  %v3004_v46 = vmul.f32 %v4256_v18, %v6507_v45  ;;  %v4263_v40 = vunpack.c.l.bf16 %v4364_v28  ;;  %v7516_v8 = vld [vmem:[#allocation20_spill] sm:$0xff] }
 0x241   :  { %v3069_v29 = vmul.f32 %v3005_v42, %v2591_v2  ;;  %v2583_v11 = vadd.f32 %v6517_v59, %v2582_v50  ;;  %v3216_v16 = vsel %vm462_vm0, %v3130_v54, 0.0  ;;  %v3128_v53 = vadd.f32 %v3064_v21, %v6427_v49 }
 0x242   :  { %v4753_v63 = vpop.f32.mrf.mxu1  ;;  %3217 = vadd.xlane.f32.xlu1 %v3216_v16  ;;  %v3207_v42 = vsel %vm462_vm0, %v3127_v5, 0.0  ;;  %5073 = vrcp.f32 %v1712_v43  ;;  %v1715_v2 = vadd.f32 1.0, %v6596_v0  ;;  %v4268_v17 = vunpack.c.h.bf16 %v6671_v36  ;;  %v4367_v0 = vld [vmem:[%s7460_s2 + $0x58] sm:$0xff]  }
 0x243   :  { %v3067_v24 = vmul.f32 %v3003_v15, %v2583_v11  ;;  %v2594_v58 = vadd.f32 %v4753_v63, %v6517_v59  ;;  %v3133_v34 = vadd.f32 %v3069_v29, %v6431_v55  ;;  %v6705_v21 = vmul.f32 %v6590_v12, %v6367_v31  ;;  %v6707_v18 = vpop.eup %5065 }
 0x244   :  { %v2585_v49 = vpop.f32.mrf.mxu1  ;;  %3208 = vadd.xlane.f32.xlu0 %v3207_v42  ;;  %v3009_v5 = vmul.f32 %v4267_v7, %v6507_v45  ;;  %v3210_v55 = vsel %vm462_vm0, %v3128_v53, 0.0  ;;  %5075 = vpow2.f32 %v4079_v13  ;;  %v3007_v36 = vmul.f32 %v4263_v40, %v6507_v45  ;;  %v4366_v13 = vld [vmem:[%s7460_s2 + $0x50] sm:$0xff]  }
 0x245   :  { %v3070_v15 = vmul.f32 %v3006_v48, %v2594_v58  ;;  %v2586_v54 = vadd.f32 %v6517_v59, %v2585_v49  ;;  %v3225_v12 = vsel %vm462_vm0, %v3133_v34, 0.0  ;;  %v4264_v50 = vunpack.c.h.bf16 %v4364_v28  ;;  %v6717_v29 = vpop.eup %5067 }
 0x246   :  { %v4756_v43 = vpop.f32.mrf.mxu1  ;;  %3211 = vadd.xlane.f32.xlu1 %v3210_v55  ;;  %v3131_v16 = vadd.f32 %v3067_v24, %v6435_v30  ;;  %v6725_v53 = vmul.f32 -1.442695, %v1465_v60  ;;  %v1470_v63 = vadd.f32 %v6629_v61, %v7516_v8  ;;  %v3010_v28 = vmul.f32 %v4268_v17, %v6507_v45 }
 0x247   :  { %v3068_v48 = vmul.f32 %v3004_v46, %v2586_v54  ;;  %v2607_v11 = vadd.f32 %v4756_v43, %v6517_v59  ;;  %v3134_v7 = vadd.f32 %v3070_v15, %v6443_v62  ;;  %v4275_v46 = vunpack.c.l.bf16 %v4367_v0  ;;  %v6730_v58 = vpop.eup %5069 }
 0x248   :  { %v2598_v40 = vpop.f32.mrf.mxu1  ;;  %3226 = vadd.xlane.f32.xlu0 %v3225_v12  ;;  %5077 = vrcp.f32 %v1715_v2  ;;  %v1713_v60 = vadd.f32 1.0, %v6608_v27  ;;  %v3008_v49 = vmul.f32 %v4264_v50, %v6507_v45  ;;  %v4271_v15 = vunpack.c.l.bf16 %v4366_v13 }
 0x249   :  { %v3073_v42 = vmul.f32 %v3009_v5, %v2607_v11  ;;  %v2599_v62 = vadd.f32 %v6517_v59, %v2598_v40  ;;  %v3228_v30 = vsel %vm462_vm0, %v3134_v7, 0.0  ;;  %v3132_v24 = vadd.f32 %v3068_v48, %v6447_v22 }
 0x24a   :  { %v4757_v34 = vpop.f32.mrf.mxu1  ;;  %3229 = vadd.xlane.f32.xlu1 %v3228_v30  ;;  %v3219_v55 = vsel %vm462_vm0, %v3131_v16, 0.0  ;;  %5079 = vpow2.f32 %v4082_v25  ;;  %v4085_v43 = vmul.f32 -1.442695, %v1470_v63  ;;  %v4276_v22 = vunpack.c.h.bf16 %v4367_v0  ;;  %v7517_v25 = vld [vmem:[#allocation21_spill] sm:$0xff] }
 0x24b   :  { %v3071_v54 = vmul.f32 %v3007_v36, %v2599_v62  ;;  %v2610_v17 = vadd.f32 %v4757_v34, %v6517_v59  ;;  %v3137_v5 = vadd.f32 %v3073_v42, %v6451_v52  ;;  %v6742_v27 = vmul.f32 %v6603_v38, %v6367_v31  ;;  %v6744_v2 = vpop.eup %5071  ;;  %v4369_v52 = vld [vmem:[%s7460_s2 + $0x68] sm:$0xff]   ;;  %v4368_v42 = vld [vmem:[%s7460_s2 + $0x60] sm:$0xff]  }
 0x24c   :  { %v2601_v12 = vpop.f32.mrf.mxu1  ;;  %3220 = vadd.xlane.f32.xlu0 %v3219_v55  ;;  %v3013_v48 = vmul.f32 %v4275_v46, %v6507_v45  ;;  %v3222_v11 = vsel %vm462_vm0, %v3132_v24, 0.0  ;;  %v1468_v0 = vadd.f32 %v6629_v61, %v7517_v25  ;;  %v3011_v38 = vmul.f32 %v4271_v15, %v6507_v45 }
 0x24d   :  { %v3074_v50 = vmul.f32 %v3010_v28, %v2610_v17  ;;  %v2602_v36 = vadd.f32 %v6517_v59, %v2601_v12  ;;  %v3237_v16 = vsel %vm462_vm0, %v3137_v5, 0.0  ;;  %v4272_v8 = vunpack.c.h.bf16 %v4366_v13 }
 0x24e   :  { %v4760_v7 = vpop.f32.mrf.mxu1  ;;  %3223 = vadd.xlane.f32.xlu1 %v3222_v11  ;;  %v3135_v46 = vadd.f32 %v3071_v54, %v6455_v10  ;;  %5081 = vrcp.f32 %v1713_v60  ;;  %v3014_v30 = vmul.f32 %v4276_v22, %v6507_v45  ;;  %v4283_v24 = vunpack.c.l.bf16 %v4369_v52 }
 0x24f   :  { %v3072_v63 = vmul.f32 %v3008_v49, %v2602_v36  ;;  %v2623_v40 = vadd.f32 %v4760_v7, %v6517_v59  ;;  %v3138_v28 = vadd.f32 %v3074_v50, %v6461_v47  ;;  %v6765_v13 = vmul.f32 %v6615_v1, %v6367_v31  ;;  %v6767_v34 = vpop.eup %5073  ;;  %v7518_v36 = vld [vmem:[#allocation22_spill] sm:$0xff] }
 0x250   :  { %v2614_v62 = vpop.f32.mrf.mxu1  ;;  %3238 = vadd.xlane.f32.xlu0 %v3237_v16  ;;  %v1718_v60 = vadd.f32 1.0, %v6636_v6  ;;  %v3012_v17 = vmul.f32 %v4272_v8, %v6507_v45  ;;  %v4279_v55 = vunpack.c.l.bf16 %v4368_v42  ;;  %v6776_v1 = vmul.f32 %v6624_v51, %v6367_v31 }
 0x251   :  { %v3077_v49 = vmul.f32 %v3013_v48, %v2623_v40  ;;  %v2615_v47 = vadd.f32 %v6517_v59, %v2614_v62  ;;  %v3240_v10 = vsel %vm462_vm0, %v3138_v28, 0.0  ;;  %v3136_v15 = vadd.f32 %v3072_v63, %v6465_v4  ;;  %v6778_v5 = vpop.eup %5075 }
 0x252   :  { %v4761_v54 = vpop.f32.mrf.mxu1  ;;  %3241 = vadd.xlane.f32.xlu1 %v3240_v10  ;;  %v3231_v50 = vsel %vm462_vm0, %v3135_v46, 0.0  ;;  %5083 = vpow2.f32 %v6725_v53  ;;  %v4083_v6 = vmul.f32 -1.442695, %v1468_v0  ;;  %v1471_v48 = vadd.f32 %v6629_v61, %v7518_v36  ;;  %v7519_v36 = vld [vmem:[#allocation23_spill] sm:$0xff] }
 0x253   :  { %v3075_v12 = vmul.f32 %v3011_v38, %v2615_v47  ;;  %v2626_v22 = vadd.f32 %v4761_v54, %v6517_v59  ;;  %v3141_v4 = vadd.f32 %v3077_v49, %v6469_v19  ;;  %v4284_v25 = vunpack.c.h.bf16 %v4369_v52  ;;  %v4371_v19 = vld [vmem:[%s7460_s2 + $0x78] sm:$0xff]  }
 0x254   :  { %v2617_v11 = vpop.f32.mrf.mxu1  ;;  %3232 = vadd.xlane.f32.xlu0 %v3231_v50  ;;  %v3017_v38 = vmul.f32 %v4283_v24, %v6507_v45  ;;  %v3234_v16 = vsel %vm462_vm0, %v3136_v15, 0.0  ;;  %5085 = vpow2.f32 %v4085_v43  ;;  %v3015_v0 = vmul.f32 %v4279_v55, %v6507_v45  ;;  %v4370_v43 = vld [vmem:[%s7460_s2 + $0x70] sm:$0xff]  }
 0x255   :  { %v3078_v51 = vmul.f32 %v3014_v30, %v2626_v22  ;;  %v2618_v7 = vadd.f32 %v6517_v59, %v2617_v11  ;;  %v3249_v8 = vsel %vm462_vm0, %v3141_v4, 0.0  ;;  %v4280_v63 = vunpack.c.h.bf16 %v4368_v42  ;;  %v6794_v52 = vpop.eup %5077 }
 0x256   :  { %v4764_v53 = vpop.f32.mrf.mxu1  ;;  %3235 = vadd.xlane.f32.xlu1 %v3234_v16  ;;  %v3139_v62 = vadd.f32 %v3075_v12, %v6480_v26  ;;  %5087 = vrcp.f32 %v1718_v60  ;;  %v3018_v24 = vmul.f32 %v4284_v25, %v6507_v45  ;;  %v4291_v49 = vunpack.c.l.bf16 %v4371_v19 }
 0x257   :  { %v3076_v40 = vmul.f32 %v3012_v17, %v2618_v7  ;;  %v2639_v28 = vadd.f32 %v4764_v53, %v6517_v59  ;;  %v3142_v46 = vadd.f32 %v3078_v51, %v6476_v14  ;;  %v6805_v42 = vmul.f32 %v6647_v32, %v6367_v31  ;;  %v6807_v47 = vpop.eup %5079 }
 0x258   :  { %v2630_v30 = vpop.f32.mrf.mxu1  ;;  %3250 = vadd.xlane.f32.xlu0 %v3249_v8  ;;  %v1716_v60 = vadd.f32 1.0, %v6663_v41  ;;  %v4086_v54 = vmul.f32 -1.442695, %v1471_v48  ;;  %v3016_v55 = vmul.f32 %v4280_v63, %v6507_v45  ;;  %v4287_v12 = vunpack.c.l.bf16 %v4370_v43 }
 0x259   :  { %v3081_v10 = vmul.f32 %v3017_v38, %v2639_v28  ;;  %v2631_v14 = vadd.f32 %v6517_v59, %v2630_v30  ;;  %v3252_v26 = vsel %vm462_vm0, %v3142_v46, 0.0  ;;  %v3140_v15 = vadd.f32 %v3076_v40, %v6486_v44  ;;  %v4372_v28 = vld [vmem:[%s7460_s2 + $0x80] sm:$0xff]  }
 0x25a   :  { %v4765_v17 = vpop.f32.mrf.mxu1  ;;  %3253 = vadd.xlane.f32.xlu1 %v3252_v26  ;;  %v3243_v50 = vsel %vm462_vm0, %v3139_v62, 0.0  ;;  %5089 = vpow2.f32 %v4083_v6  ;;  %v1469_v11 = vadd.f32 %v6629_v61, %v7519_v36  ;;  %v4292_v41 = vunpack.c.h.bf16 %v4371_v19  ;;  %v4373_v6 = vld [vmem:[%s7460_s2 + $0x88] sm:$0xff]   ;;  %v7520_v62 = vld [vmem:[#allocation24_spill] sm:$0xff] }
 0x25b   :  { %v3079_v22 = vmul.f32 %v3015_v0, %v2631_v14  ;;  %v2642_v32 = vadd.f32 %v4765_v17, %v6517_v59  ;;  %v3145_v4 = vadd.f32 %v3081_v10, %v6493_v37  ;;  %v6821_v48 = vmul.f32 %v6676_v9, %v6367_v31  ;;  %v6823_v25 = vpop.eup %5081 }
 0x25c   :  { %v2633_v44 = vpop.f32.mrf.mxu1  ;;  %3244 = vadd.xlane.f32.xlu0 %v3243_v50  ;;  %v3021_v38 = vmul.f32 %v4291_v49, %v6507_v45  ;;  %v3246_v37 = vsel %vm462_vm0, %v3140_v15, 0.0  ;;  %5091 = vrcp.f32 %v1716_v60  ;;  %v3019_v19 = vmul.f32 %v4287_v12, %v6507_v45 }
 0x25d   :  { %v3082_v51 = vmul.f32 %v3018_v24, %v2642_v32  ;;  %v2634_v7 = vadd.f32 %v6517_v59, %v2633_v44  ;;  %v3261_v9 = vsel %vm462_vm0, %v3145_v4, 0.0  ;;  %v4288_v53 = vunpack.c.h.bf16 %v4370_v43 }
 0x25e   :  { %v4768_v16 = vpop.f32.mrf.mxu1  ;;  %3247 = vadd.xlane.f32.xlu1 %v3246_v37  ;;  %v3143_v40 = vadd.f32 %v3079_v22, %v6496_v57  ;;  %v1719_v46 = vadd.f32 1.0, %v6690_v33  ;;  %v1474_v30 = vadd.f32 %v6629_v61, %v7520_v62  ;;  %v3022_v43 = vmul.f32 %v4292_v41, %v6507_v45 }
 0x25f   :  { %v3080_v0 = vmul.f32 %v3016_v55, %v2634_v7  ;;  %v2655_v8 = vadd.f32 %v4768_v16, %v6517_v59  ;;  %v3146_v63 = vadd.f32 %v3082_v51, %v6499_v39  ;;  %v4299_v49 = vunpack.c.l.bf16 %v4373_v6  ;;  %v6843_v10 = vpop.eup %5083 }
 0x260   :  { %v2646_v24 = vpop.f32.mrf.mxu1  ;;  %3262 = vadd.xlane.f32.xlu0 %v3261_v9  ;;  %5093 = vpow2.f32 %v4086_v54  ;;  %v4084_v15 = vmul.f32 -1.442695, %v1469_v11  ;;  %v3020_v60 = vmul.f32 %v4288_v53, %v6507_v45  ;;  %v4295_v17 = vunpack.c.l.bf16 %v4372_v28  ;;  %v7521_v53 = vld [vmem:[#allocation6_spill] sm:$0xff] }
 0x261   :  { %v3085_v14 = vmul.f32 %v3021_v38, %v2655_v8  ;;  %v2647_v39 = vadd.f32 %v6517_v59, %v2646_v24  ;;  %v3264_v57 = vsel %vm462_vm0, %v3146_v63, 0.0  ;;  %v3144_v26 = vadd.f32 %v3080_v0, %v6502_v35  ;;  %v6849_v55 = vpop.eup %5085  ;;  %v6875_v8 = vld [vmem:[%s7460_s2 + $0x90] sm:$0xff]   ;;  %v7522_v63 = vld [vmem:[#allocation25_spill] sm:$0xff] }
 0x262   :  { %v4769_v33 = vpop.f32.mrf.mxu1  ;;  %3265 = vadd.xlane.f32.xlu1 %v3264_v57  ;;  %v3255_v32 = vsel %vm462_vm0, %v3143_v40, 0.0  ;;  %5095 = vrcp.f32 %v1719_v46  ;;  %v1717_v4 = vadd.f32 1.0, %v6717_v29  ;;  %v4300_v54 = vunpack.c.h.bf16 %v4373_v6 }
 0x263   :  { %v3083_v12 = vmul.f32 %v3019_v19, %v2647_v39  ;;  %v2658_v22 = vadd.f32 %v4769_v33, %v6517_v59  ;;  %v3149_v50 = vadd.f32 %v3085_v14, %v6510_v20  ;;  %v6857_v36 = vmul.f32 %v6707_v18, %v6367_v31  ;;  %v6859_v11 = vpop.eup %5087  ;;  %v4375_v20 = vld [vmem:[%s7460_s2 + $0x98] sm:$0xff]  }
 0x264   :  { %v2649_v35 = vpop.f32.mrf.mxu1  ;;  %3256 = vadd.xlane.f32.xlu0 %v3255_v32  ;;  %v3025_v51 = vmul.f32 %v4299_v49, %v6507_v45  ;;  %v3258_v7 = vsel %vm462_vm0, %v3144_v26, 0.0  ;;  %v4089_v29 = vmul.f32 -1.442695, %v1474_v30  ;;  %v3023_v37 = vmul.f32 %v4295_v17, %v6507_v45  ;;  %v7523_v49 = vld [vmem:[#allocation7_spill] sm:$0xff] }
 0x265   :  { %v3086_v44 = vmul.f32 %v3022_v43, %v2658_v22  ;;  %v2650_v41 = vadd.f32 %v6517_v59, %v2649_v35  ;;  %v3273_v18 = vsel %vm462_vm0, %v3149_v50, 0.0  ;;  %v4296_v6 = vunpack.c.h.bf16 %v4372_v28  ;;  %v7524_v22 = vld [vmem:[#allocation8_spill] sm:$0xff]  ;;  %v7525_v35 = vld [vmem:[#allocation26_spill] sm:$0xff] }
 0x266   :  { %v4772_v38 = vpop.f32.mrf.mxu1  ;;  %3259 = vadd.xlane.f32.xlu1 %v3258_v7  ;;  %v3147_v0 = vadd.f32 %v3083_v12, %v7521_v53  ;;  %5097 = vpow2.f32 %v4084_v15  ;;  %v1472_v40 = vadd.f32 %v6629_v61, %v7522_v63  ;;  %v3026_v28 = vmul.f32 %v4300_v54, %v6507_v45  ;;  %v7526_v54 = vld [vmem:[#allocation5_spill] sm:$0xff]  ;;  %v7527_v53 = vld [vmem:[#allocation10_spill] sm:$0xff] }
 0x267   :  { %v3084_v16 = vmul.f32 %v3020_v60, %v2650_v41  ;;  %v2671_v19 = vadd.f32 %v4772_v38, %v6517_v59  ;;  %v3150_v9 = vadd.f32 %v3086_v44, %v6520_v23  ;;  %v4307_v62 = vunpack.c.l.bf16 %v4375_v20  ;;  %v6880_v30 = vpop.eup %5089  ;;  %v7528_v63 = vld [vmem:[#allocation9_spill] sm:$0xff] }
 0x268   :  { %v2662_v46 = vpop.f32.mrf.mxu1  ;;  %3274 = vadd.xlane.f32.xlu0 %v3273_v18  ;;  %5099 = vrcp.f32 %v1717_v4  ;;  %v3024_v57 = vmul.f32 %v4296_v6, %v6507_v45  ;;  %v4303_v26 = vunpack.c.l.bf16 %v6875_v8  ;;  %v6889_v15 = vmul.f32 %v6730_v58, %v6367_v31 }
 0x269   :  { %v3089_v24 = vmul.f32 %v3025_v51, %v2671_v19  ;;  %v2663_v23 = vadd.f32 %v6517_v59, %v2662_v46  ;;  %v3276_v43 = vsel %vm462_vm0, %v3150_v9, 0.0  ;;  %v3148_v14 = vadd.f32 %v3084_v16, %v7523_v49  ;;  %v6891_v33 = vpop.eup %5091  ;;  %v7529_v46 = vld [vmem:[#allocation27_spill] sm:$0xff] }
 0x26a   :  { %v4773_v39 = vpop.f32.mrf.mxu1  ;;  %3277 = vadd.xlane.f32.xlu1 %v3276_v43  ;;  %v3267_v12 = vsel %vm462_vm0, %v3147_v0, 0.0  ;;  %v1722_v50 = vadd.f32 1.0, %v6744_v2  ;;  %v4087_v4 = vmul.f32 -1.442695, %v1472_v40  ;;  %v1394_v44 = vadd.f32 %v7526_v54, %v7525_v35 }
 0x26b   :  { %v3087_v60 = vmul.f32 %v3023_v37, %v2663_v23  ;;  %v2674_v17 = vadd.f32 %v4773_v39, %v6517_v59  ;;  %v3153_v32 = vadd.f32 %v3089_v24, %v7524_v22  ;;  %v4308_v51 = vunpack.c.h.bf16 %v4375_v20  ;;  %v6905_v37 = vld [vmem:[%s7460_s2 + $0xa8] sm:$0xff]   ;;  %v6925_v23 = vld [vmem:[%s7465_s7] ss:$0 sm:$0xff] }
 0x26c   :  { %v2665_v41 = vpop.f32.mrf.mxu1  ;;  %3268 = vadd.xlane.f32.xlu0 %v3267_v12  ;;  %v3029_v7 = vmul.f32 %v4307_v62, %v6507_v45  ;;  %v3270_v38 = vsel %vm462_vm0, %v3148_v14, 0.0  ;;  %5101 = vpow2.f32 %v4089_v29  ;;  %v3027_v18 = vmul.f32 %v4303_v26, %v6507_v45  ;;  %v4376_v29 = vld [vmem:[%s7460_s2 + $0xa0] sm:$0xff]  }
 0x26d   :  { %v3090_v31 = vmul.f32 %v3026_v28, %v2674_v17  ;;  %v2666_v58 = vadd.f32 %v6517_v59, %v2665_v41  ;;  %v3285_v6 = vsel %vm462_vm0, %v3153_v32, 0.0  ;;  %v4304_v20 = vunpack.c.h.bf16 %v6875_v8  ;;  %v6910_v16 = vpop.eup %5093 }
 0x26e   :  { %v4776_v2 = vpop.f32.mrf.mxu1  ;;  %3271 = vadd.xlane.f32.xlu1 %v3270_v38  ;;  %v3151_v40 = vadd.f32 %v3087_v60, %v7528_v63  ;;  %v1475_v28 = vadd.f32 %v6629_v61, %v7529_v46  ;;  %v3030_v8 = vmul.f32 %v4308_v51, %v6507_v45  ;;  %v4315_v24 = vunpack.c.l.bf16 %v6905_v37 }
 0x26f   :  { %v3088_v19 = vmul.f32 %v3024_v57, %v2666_v58  ;;  %v2687_v9 = vadd.f32 %v4776_v2, %v6517_v59  ;;  %v3154_v0 = vadd.f32 %v3090_v31, %v7527_v53  ;;  %v6929_v43 = vmul.f32 %v6925_v23, %v6767_v34  ;;  %v6931_v49 = vpop.eup %5095 }
 0x270   :  { %v2678_v62 = vpop.f32.mrf.mxu1  ;;  %3286 = vadd.xlane.f32.xlu0 %v3285_v6  ;;  %5103 = vrcp.f32 %v1722_v50  ;;  %v1720_v60 = vadd.f32 1.0, %v6778_v5  ;;  %v3028_v12 = vmul.f32 %v4304_v20, %v6507_v45  ;;  %v4311_v22 = vunpack.c.l.bf16 %v4376_v29 }
 0x271   :  { %v3093_v14 = vmul.f32 %v3029_v7, %v2687_v9  ;;  %v2679_v39 = vadd.f32 %v6517_v59, %v2678_v62  ;;  %v3288_v57 = vsel %vm462_vm0, %v3154_v0, 0.0  ;;  %v3152_v26 = vadd.f32 %v3088_v19, %v6655_v56  ;;  %v4378_v9 = vld [vmem:[%s7460_s2 + $0xb0] sm:$0xff]  }
 0x272   :  { %v4777_v17 = vpop.f32.mrf.mxu1  ;;  %3289 = vadd.xlane.f32.xlu1 %v3288_v57  ;;  %v3279_v35 = vsel %vm462_vm0, %v3151_v40, 0.0  ;;  %5105 = vpow2.f32 %v4087_v4  ;;  %v4090_v41 = vmul.f32 -1.442695, %v1475_v28  ;;  %v1473_v51 = vadd.f32 %v6629_v61, %v1394_v44 }
 0x273   :  { %v3091_v32 = vmul.f32 %v3027_v18, %v2679_v39  ;;  %v2690_v34 = vadd.f32 %v4777_v17, %v6517_v59  ;;  %v3157_v54 = vadd.f32 %v3093_v14, %v6688_v3  ;;  %v4316_v5 = vunpack.c.h.bf16 %v6905_v37  ;;  %v6943_v50 = vpop.eup %5097  ;;  %v6951_v3 = vld [vmem:[%s7460_s2 + $0xb8] sm:$0xff]  }
 0x274   :  { %v2681_v56 = vpop.f32.mrf.mxu1  ;;  %3280 = vadd.xlane.f32.xlu0 %v3279_v35  ;;  %v3033_v7 = vmul.f32 %v4315_v24, %v6507_v45  ;;  %v3282_v38 = vsel %vm462_vm0, %v3152_v26, 0.0  ;;  %5107 = vrcp.f32 %v1720_v60  ;;  %v3031_v4 = vmul.f32 %v4311_v22, %v6507_v45 }
 0x275   :  { %v3094_v31 = vmul.f32 %v3030_v8, %v2690_v34  ;;  %v2682_v58 = vadd.f32 %v6517_v59, %v2681_v56  ;;  %v3297_v44 = vsel %vm462_vm0, %v3157_v54, 0.0  ;;  %v4312_v37 = vunpack.c.h.bf16 %v4376_v29  ;;  %v6955_v2 = vpop.eup %5099  ;;  %v6997_v56 = vld [vmem:[%s7469_s11] ss:$0 sm:$0xff] }
 0x276   :  { %v4780_v61 = vpop.f32.mrf.mxu1  ;;  %3283 = vadd.xlane.f32.xlu1 %v3282_v38  ;;  %v3155_v19 = vadd.f32 %v3091_v32, %v6705_v21  ;;  %v1723_v53 = vadd.f32 1.0, %v6807_v47  ;;  %v4088_v0 = vmul.f32 -1.442695, %v1473_v51  ;;  %v3034_v40 = vmul.f32 %v4316_v5, %v6507_v45 }
 0x277   :  { %v3092_v18 = vmul.f32 %v3028_v12, %v2682_v58  ;;  %v2703_v6 = vadd.f32 %v4780_v61, %v6517_v59  ;;  %v3158_v20 = vadd.f32 %v3094_v31, %v6742_v27  ;;  %v4323_v29 = vunpack.c.l.bf16 %v6951_v3 }
 0x278   :  { %v2694_v63 = vpop.f32.mrf.mxu1  ;;  %3298 = vadd.xlane.f32.xlu0 %v3297_v44  ;;  %5109 = vpow2.f32 %v4090_v41  ;;  %v3032_v8 = vmul.f32 %v4312_v37, %v6507_v45  ;;  %v4319_v47 = vunpack.c.l.bf16 %v4378_v9  ;;  %v6972_v24 = vmul.f32 %v6925_v23, %v6794_v52 }
 0x279   :  { %v3097_v46 = vmul.f32 %v3033_v7, %v2703_v6  ;;  %v2695_v28 = vadd.f32 %v6517_v59, %v2694_v63  ;;  %v3300_v27 = vsel %vm462_vm0, %v3158_v20, 0.0  ;;  %v3156_v21 = vadd.f32 %v3092_v18, %v6765_v13  ;;  %v6974_v14 = vpop.eup %5101  ;;  %v4380_v7 = vld [vmem:[%s7460_s2 + $0xc0] sm:$0xff]  }
 0x27a   :  { %v4781_v62 = vpop.f32.mrf.mxu1  ;;  %3301 = vadd.xlane.f32.xlu1 %v3300_v27  ;;  %v3291_v26 = vsel %vm462_vm0, %v3155_v19, 0.0  ;;  %5111 = vrcp.f32 %v1723_v53  ;;  %v1721_v13 = vadd.f32 1.0, %v6843_v10  ;;  %v1726_v17 = vadd.f32 1.0, %v6849_v55 }
 0x27b   :  { %v3095_v39 = vmul.f32 %v3031_v4, %v2695_v28  ;;  %v2706_v57 = vadd.f32 %v4781_v62, %v6517_v59  ;;  %v3161_v60 = vadd.f32 %v3097_v46, %v6776_v1  ;;  %v4324_v22 = vunpack.c.h.bf16 %v6951_v3  ;;  %v6988_v1 = vld [vmem:[%s7460_s2 + $0xc8] sm:$0xff]  }
 0x27c   :  { %v2697_v12 = vpop.f32.mrf.mxu1  ;;  %3292 = vadd.xlane.f32.xlu0 %v3291_v26  ;;  %v3037_v34 = vmul.f32 %v4323_v29, %v6507_v45  ;;  %v3294_v35 = vsel %vm462_vm0, %v3156_v21, 0.0  ;;  %5113 = vpow2.f32 %v4088_v0  ;;  %v3035_v55 = vmul.f32 %v4319_v47, %v6507_v45 }
 0x27d   :  { %v3098_v52 = vmul.f32 %v3034_v40, %v2706_v57  ;;  %v2698_v32 = vadd.f32 %v6517_v59, %v2697_v12  ;;  %v3309_v54 = vsel %vm462_vm0, %v3161_v60, 0.0  ;;  %v4320_v41 = vunpack.c.h.bf16 %v4378_v9  ;;  %v6992_v51 = vpop.eup %5103 }
 0x27e   :  { %v4784_v10 = vpop.f32.mrf.mxu1  ;;  %3295 = vadd.xlane.f32.xlu1 %v3294_v35  ;;  %v3159_v58 = vadd.f32 %v3095_v39, %v6805_v42  ;;  %5115 = vrcp.f32 %v1721_v13  ;;  %v1724_v38 = vadd.f32 1.0, %v6880_v30  ;;  %v3038_v61 = vmul.f32 %v4324_v22, %v6507_v45 }
 0x27f   :  { %v3096_v59 = vmul.f32 %v3032_v8, %v2698_v32  ;;  %v2719_v5 = vadd.f32 %v6997_v56, %v4784_v10  ;;  %v3162_v31 = vadd.f32 %v3098_v52, %v6821_v48  ;;  %v4331_v4 = vunpack.c.l.bf16 %v6988_v1  ;;  %v7008_v44 = vpop.eup %5105 }
 0x280   :  { %v2710_v3 = vpop.f32.mrf.mxu1  ;;  %3310 = vadd.xlane.f32.xlu0 %v3309_v54  ;;  %5117 = vrcp.f32 %v1726_v17  ;;  %v3036_v30 = vmul.f32 %v4320_v41, %v6507_v45  ;;  %v4327_v20 = vunpack.c.l.bf16 %v4380_v7  ;;  %v2971_v19 = vmul.f32 %v6925_v23, %v6823_v25 }
 0x281   :  { %v3101_v37 = vmul.f32 %v3037_v34, %v2719_v5  ;;  %v2711_v48 = vadd.f32 %v6997_v56, %v2710_v3  ;;  %v3312_v42 = vsel %vm462_vm0, %v3162_v31, 0.0  ;;  %v3160_v18 = vadd.f32 %v3096_v59, %v6857_v36  ;;  %v7016_v9 = vpop.eup %5107 }
 0x282   :  { %v4785_v6 = vpop.f32.mrf.mxu1  ;;  %3313 = vadd.xlane.f32.xlu1 %v3312_v42  ;;  %v3303_v63 = vsel %vm462_vm0, %v3159_v58, 0.0  ;;  %5119 = vrcp.f32 %v1724_v38  ;;  %v4332_v29 = vunpack.c.h.bf16 %v6988_v1  ;;  %v2976_v46 = vmul.f32 %v6925_v23, %v6859_v11 }
 0x283   :  { %v3099_v53 = vmul.f32 %v3035_v55, %v2711_v48  ;;  %v2722_v0 = vadd.f32 %v6997_v56, %v4785_v6  ;;  %v3165_v40 = vadd.f32 %v3101_v37, %v6889_v15  ;;  %v2974_v25 = vmul.f32 %v6925_v23, %v6891_v33  ;;  %v7032_v15 = vld [vmem:[%s7460_s2 + $0xd8] sm:$0xff]  }
 0x284   :  { %v2713_v36 = vpop.f32.mrf.mxu1  ;;  %3304 = vadd.xlane.f32.xlu0 %v3303_v63  ;;  %v3041_v21 = vmul.f32 %v4331_v4, %v6507_v45  ;;  %v3306_v62 = vsel %vm462_vm0, %v3160_v18, 0.0  ;;  %v1727_v8 = vadd.f32 1.0, %v6910_v16  ;;  %v3039_v11 = vmul.f32 %v4327_v20, %v6507_v45  ;;  %v7045_v16 = vld [vmem:[%s7460_s2 + $0xd0] sm:$0xff]   ;;  %v4385_v18 = vld [vmem:[%s7460_s2 + $0xe8] sm:$0xff]  }
 0x285   :  { %v3102_v28 = vmul.f32 %v3038_v61, %v2722_v0  ;;  %v2714_v27 = vadd.f32 %v6997_v56, %v2713_v36  ;;  %v3321_v33 = vsel %vm462_vm0, %v3165_v40, 0.0  ;;  %v4328_v39 = vunpack.c.h.bf16 %v4380_v7  ;;  %v7037_v57 = vpop.eup %5109  ;;  %v4384_v36 = vld [vmem:[%s7460_s2 + $0xe0] sm:$0xff]  }
 0x286   :  { %v4788_v47 = vpop.f32.mrf.mxu1  ;;  %3307 = vadd.xlane.f32.xlu1 %v3306_v62  ;;  %v3163_v17 = vadd.f32 %v3099_v53, %v6929_v43  ;;  %v1725_v12 = vadd.f32 1.0, %v6943_v50  ;;  %v3042_v52 = vmul.f32 %v4332_v29, %v6507_v45  ;;  %v4339_v32 = vunpack.c.l.bf16 %v7032_v15 }
 0x287   :  { %v3100_v26 = vmul.f32 %v3036_v30, %v2714_v27  ;;  %v2735_v60 = vadd.f32 %v6997_v56, %v4788_v47  ;;  %v3166_v13 = vadd.f32 %v3102_v28, %v6972_v24  ;;  %v2977_v34 = vmul.f32 %v6925_v23, %v6931_v49  ;;  %v7052_v35 = vpop.eup %5111 }
 0x288   :  { %v2726_v22 = vpop.f32.mrf.mxu1  ;;  %3322 = vadd.xlane.f32.xlu0 %v3321_v33  ;;  %5121 = vrcp.f32 %v1727_v8  ;;  %v3040_v50 = vmul.f32 %v4328_v39, %v6507_v45  ;;  %v4335_v54 = vunpack.c.l.bf16 %v7045_v16  ;;  %v2975_v41 = vmul.f32 %v6925_v23, %v6955_v2 }
 0x289   :  { %v3105_v24 = vmul.f32 %v3041_v21, %v2735_v60  ;;  %v2727_v43 = vadd.f32 %v6997_v56, %v2726_v22  ;;  %v3324_v1 = vsel %vm462_vm0, %v3166_v13, 0.0  ;;  %v3164_v10 = vadd.f32 %v3100_v26, %v2971_v19  ;;  %v5114_v59 = vpop.eup %5113 }
 0x28a   :  { %v4789_v55 = vpop.f32.mrf.mxu1  ;;  %3325 = vadd.xlane.f32.xlu1 %v3324_v1  ;;  %v3315_v31 = vsel %vm462_vm0, %v3163_v17, 0.0  ;;  %5123 = vrcp.f32 %v1725_v12  ;;  %v1730_v7 = vadd.f32 1.0, %v6974_v14  ;;  %v4340_v3 = vunpack.c.h.bf16 %v7032_v15 }
 0x28b   :  { %v3103_v49 = vmul.f32 %v3039_v11, %v2727_v43  ;;  %v2738_v5 = vadd.f32 %v6997_v56, %v4789_v55  ;;  %v3169_v58 = vadd.f32 %v3105_v24, %v2976_v46  ;;  %v2980_v61 = vmul.f32 %v6925_v23, %v6992_v51  ;;  %v5116_v4 = vpop.eup %5115  ;;  %v4387_v43 = vld [vmem:[%s7460_s2 + $0xf8] sm:$0xff]  }
 0x28c   :  { %v2729_v38 = vpop.f32.mrf.mxu1  ;;  %3316 = vadd.xlane.f32.xlu0 %v3315_v31  ;;  %v3045_v48 = vmul.f32 %v4339_v32, %v6507_v45  ;;  %v3318_v42 = vsel %vm462_vm0, %v3164_v10, 0.0  ;;  %v1728_v14 = vadd.f32 1.0, %v7008_v44  ;;  %v3043_v30 = vmul.f32 %v4335_v54, %v6507_v45 }
 0x28d   :  { %v3106_v37 = vmul.f32 %v3042_v52, %v2738_v5  ;;  %v2730_v2 = vadd.f32 %v6997_v56, %v2729_v38  ;;  %v3333_v51 = vsel %vm462_vm0, %v3169_v58, 0.0  ;;  %v4336_v20 = vunpack.c.h.bf16 %v7045_v16  ;;  %v5118_v19 = vpop.eup %5117 }
 0x28e   :  { %v4792_v6 = vpop.f32.mrf.mxu1  ;;  %3319 = vadd.xlane.f32.xlu1 %v3318_v42  ;;  %v3167_v40 = vadd.f32 %v3103_v49, %v2974_v25  ;;  %5125 = vrcp.f32 %v1730_v7  ;;  %v3046_v29 = vmul.f32 %v4340_v3, %v6507_v45  ;;  %v4347_v46 = vunpack.c.l.bf16 %v4385_v18  ;;  %v4386_v49 = vld [vmem:[%s7460_s2 + $0xf0] sm:$0xff]   ;;  %s4163_s2 = sld [smem:[#allocation2 + $0x1]] }
 0x28f   :  { %v3104_v53 = vmul.f32 %v3040_v50, %v2730_v2  ;;  %v2751_v0 = vadd.f32 %v6997_v56, %v4792_v6  ;;  %v3170_v63 = vadd.f32 %v3106_v37, %v2977_v34  ;;  %v2978_v28 = vmul.f32 %v6925_v23, %v7016_v9  ;;  %v5120_v27 = vpop.eup %5119 }
 0x290   :  { %v2742_v44 = vpop.f32.mrf.mxu1  ;;  %3334 = vadd.xlane.f32.xlu0 %v3333_v51  ;;  %5127 = vrcp.f32 %v1728_v14  ;;  %v1729_v8 = vadd.f32 1.0, %v5114_v59  ;;  %v3044_v11 = vmul.f32 %v4336_v20, %v6507_v45  ;;  %v4343_v33 = vunpack.c.l.bf16 %v4384_v36 }
 0x291   :  { %v3109_v21 = vmul.f32 %v3045_v48, %v2751_v0  ;;  %v2743_v62 = vadd.f32 %v6997_v56, %v2742_v44  ;;  %v3336_v15 = vsel %vm462_vm0, %v3170_v63, 0.0  ;;  %v3168_v25 = vadd.f32 %v3104_v53, %v2975_v41 }
 0x292   :  { %v4793_v47 = vpop.f32.mrf.mxu1  ;;  %3337 = vadd.xlane.f32.xlu1 %v3336_v15  ;;  %v3327_v60 = vsel %vm462_vm0, %v3167_v40, 0.0  ;;  %v1731_v13 = vadd.f32 1.0, %v7037_v57  ;;  %v4348_v16 = vunpack.c.h.bf16 %v4385_v18  ;;  %v2981_v12 = vmul.f32 %v6925_v23, %v7052_v35 }
 0x293   :  { %v3107_v39 = vmul.f32 %v3043_v30, %v2743_v62  ;;  %v2754_v26 = vadd.f32 %v6997_v56, %v4793_v47  ;;  %v3173_v9 = vadd.f32 %v3109_v21, %v2980_v61  ;;  %v2979_v22 = vmul.f32 %v6925_v23, %v5116_v4 }
 0x294   :  { %v2745_v17 = vpop.f32.mrf.mxu1  ;;  %3328 = vadd.xlane.f32.xlu0 %v3327_v60  ;;  %v3049_v34 = vmul.f32 %v4347_v46, %v6507_v45  ;;  %v3330_v24 = vsel %vm462_vm0, %v3168_v25, 0.0  ;;  %5129 = vrcp.f32 %v1729_v8  ;;  %v3047_v1 = vmul.f32 %v4343_v33, %v6507_v45 }
 0x295   :  { %v3110_v52 = vmul.f32 %v3046_v29, %v2754_v26  ;;  %v2746_v32 = vadd.f32 %v6997_v56, %v2745_v17  ;;  %v3345_v35 = vsel %vm462_vm0, %v3173_v9, 0.0  ;;  %v4344_v10 = vunpack.c.h.bf16 %v4384_v36  ;;  %v5122_v55 = vpop.eup %5121 }
 0x296   :  { %v4796_v57 = vpop.f32.mrf.mxu1  ;;  %3331 = vadd.xlane.f32.xlu1 %v3330_v24  ;;  %v3171_v59 = vadd.f32 %v3107_v39, %v2978_v28  ;;  %5131 = vrcp.f32 %v1731_v13  ;;  %v3050_v31 = vmul.f32 %v4348_v16, %v6507_v45  ;;  %v4355_v58 = vunpack.c.l.bf16 %v4387_v43 }
 0x297   :  { %v3108_v50 = vmul.f32 %v3044_v11, %v2746_v32  ;;  %v2767_v54 = vadd.f32 %v6997_v56, %v4796_v57  ;;  %v3174_v41 = vadd.f32 %v3110_v52, %v2981_v12  ;;  %v2984_v7 = vmul.f32 %v6925_v23, %v5118_v19  ;;  %v5124_v38 = vpop.eup %5123 }
 0x298   :  { %v2758_v5 = vpop.f32.mrf.mxu1  ;;  %3346 = vadd.xlane.f32.xlu0 %v3345_v35  ;;  %v3048_v48 = vmul.f32 %v4344_v10, %v6507_v45  ;;  %v4351_v42 = vunpack.c.l.bf16 %v4386_v49  ;;  %v3339_v6 = vsel %vm462_vm0, %v3171_v59, 0.0  ;;  %v2985_v20 = vmul.f32 %v6925_v23, %v5122_v55 }
 0x299   :  { %v3113_v3 = vmul.f32 %v3049_v34, %v2767_v54  ;;  %v2759_v61 = vadd.f32 %v6997_v56, %v2758_v5  ;;  %v3348_v4 = vsel %vm462_vm0, %v3174_v41, 0.0  ;;  %v3172_v37 = vadd.f32 %v3108_v50, %v2979_v22 }
 0x29a   :  { %v4797_v2 = vpop.f32.mrf.mxu1  ;;  %3349 = vadd.xlane.f32.xlu1 %v3348_v4  ;;  %v2982_v19 = vmul.f32 %v6925_v23, %v5120_v27  ;;  %v2983_v53 = vmul.f32 %v6925_v23, %v5124_v38  ;;  %v3053_v36 = vmul.f32 %v4355_v58, %v6507_v45  ;;  %v3051_v46 = vmul.f32 %v4351_v42, %v6507_v45 }
 0x29b   :  { %v3111_v18 = vmul.f32 %v3047_v1, %v2759_v61  ;;  %v2770_v14 = vadd.f32 %v6997_v56, %v4797_v2  ;;  %v3177_v30 = vadd.f32 %v3113_v3, %v2984_v7  ;;  %v5126_v0 = vpop.eup %5125  ;;  %v3342_v44 = vsel %vm462_vm0, %v3172_v37, 0.0 }
 0x29c   :  { %v2761_v51 = vpop.f32.mrf.mxu1  ;;  %3340 = vadd.xlane.f32.xlu0 %v3339_v6  ;;  %v4356_v21 = vunpack.c.h.bf16 %v4387_v43  ;;  %v4352_v62 = vunpack.c.h.bf16 %v4386_v49  ;;  %v2988_v35 = vmul.f32 %v6925_v23, %v5126_v0  ;;  %v7136_v58 = vstv %s4163_s2 }
 0x29d   :  { %v3114_v63 = vmul.f32 %v3050_v31, %v2770_v14  ;;  %v2762_v40 = vadd.f32 %v6997_v56, %v2761_v51  ;;  %v3357_v28 = vsel %vm462_vm0, %v3177_v30, 0.0  ;;  %v5128_v15 = vpop.eup %5127  ;;  %v3175_v47 = vadd.f32 %v3111_v18, %v2982_v19 }
 0x29e   :  { %v4800_v29 = vpop.f32.mrf.mxu1  ;;  %3343 = vadd.xlane.f32.xlu1 %v3342_v44  ;;  %v3054_v9 = vmul.f32 %v4356_v21, %v6507_v45  ;;  %v3052_v13 = vmul.f32 %v4352_v62, %v6507_v45  ;;  %v2986_v17 = vmul.f32 %v6925_v23, %v5128_v15 }
 0x29f   :  { %v3112_v27 = vmul.f32 %v3048_v48, %v2762_v40  ;;  %v2783_v25 = vadd.f32 %v6997_v56, %v4800_v29  ;;  %v3178_v8 = vadd.f32 %v3114_v63, %v2985_v20  ;;  %v3351_v32 = vsel %vm462_vm0, %v3175_v47, 0.0 }
 0x2a0   :  { %v2774_v11 = vpop.f32.mrf.mxu1  ;;  %3358 = vadd.xlane.f32.xlu0 %v3357_v28 }
 0x2a1   :  { %v2775_v33 = vadd.f32 %v6997_v56, %v2774_v11  ;;  %v3360_v39 = vsel %vm462_vm0, %v3178_v8, 0.0  ;;  %v3176_v26 = vadd.f32 %v3112_v27, %v2983_v53  ;;  %v5130_v16 = vpop.eup %5129  ;;  %v3117_v12 = vmul.f32 %v3053_v36, %v2783_v25 }
 0x2a2   :  { %v4801_v60 = vpop.f32.mrf.mxu1  ;;  %3361 = vadd.xlane.f32.xlu1 %v3360_v39  ;;  %v2987_v45 = vmul.f32 %v6925_v23, %v5130_v16 }
 0x2a3   :  { %v3115_v22 = vmul.f32 %v3051_v46, %v2775_v33  ;;  %v2786_v52 = vadd.f32 %v6997_v56, %v4801_v60  ;;  %v5132_v24 = vpop.eup %5131  ;;  %v3354_v57 = vsel %vm462_vm0, %v3176_v26, 0.0  ;;  %v3181_v54 = vadd.f32 %v3117_v12, %v2988_v35 }
 0x2a4   :  { %v2777_v34 = vpop.f32.mrf.mxu1  ;;  %3352 = vadd.xlane.f32.xlu0 %v3351_v32  ;;  %v2989_v59 = vmul.f32 %v6925_v23, %v5132_v24 }
 0x2a5   :  { %v2778_v43 = vadd.f32 %v6997_v56, %v2777_v34  ;;  %v3179_v1 = vadd.f32 %v3115_v22, %v2986_v17  ;;  %v3118_v10 = vmul.f32 %v3054_v9, %v2786_v52  ;;  %v3369_v56 = vsel %vm462_vm0, %v3181_v54, 0.0 }
 0x2a6   :  { %3355 = vadd.xlane.f32.xlu1 %v3354_v57 }
 0x2a7   :  { %v3116_v55 = vmul.f32 %v3052_v13, %v2778_v43  ;;  %v3363_v50 = vsel %vm462_vm0, %v3179_v1, 0.0  ;;  %v3182_v5 = vadd.f32 %v3118_v10, %v2989_v59 }
 0x2a8   :  { %3364 = vadd.xlane.f32.xlu0 %v3363_v50 }
 0x2a9   :  { %v3180_v41 = vadd.f32 %v3116_v55, %v2987_v45  ;;  %v3372_v31 = vsel %vm462_vm0, %v3182_v5, 0.0 }
 0x2ab   :  { %v3366_v49 = vsel %vm462_vm0, %v3180_v41, 0.0 }
 0x2ac   :  { %3367 = vadd.xlane.f32.xlu1 %v3366_v49  ;;  %3370 = vadd.xlane.f32.xlu0 %v3369_v56 }
 0x2b0   :  { %3373 = vadd.xlane.f32.xlu1 %v3372_v31 }
 0x2b7   :  { %v3191_v7 = vpop.xlane.xlu1 %3190 }
 0x2b8   :  { %v3378_v38 = vadd.f32 %v7136_v58, %v3191_v7 }
 0x2b9   :  { %v3185_v3 = vpop.xlane.xlu0 %3184 }
 0x2ba   :  { %v4167_v61 = vmul.f32 -1.442695, %v3378_v38  ;;  %v3376_v23 = vadd.f32 %v7136_v58, %v3185_v3 }
 0x2bb   :  { %v3194_v4 = vpop.xlane.xlu1 %3193 }
 0x2bc   :  { %5133 = vpow2.f32 %v4167_v61  ;;  %v4165_v37 = vmul.f32 -1.442695, %v3376_v23  ;;  %v3379_v2 = vadd.f32 %v7136_v58, %v3194_v4 }
 0x2bd   :  { %v3188_v48 = vpop.xlane.xlu0 %3187 }
 0x2be   :  { %5135 = vpow2.f32 %v4165_v37  ;;  %v4168_v42 = vmul.f32 -1.442695, %v3379_v2  ;;  %v3377_v18 = vadd.f32 %v7136_v58, %v3188_v48 }
 0x2c0   :  { %5137 = vpow2.f32 %v4168_v42  ;;  %v4166_v14 = vmul.f32 -1.442695, %v3377_v18 }
 0x2c1   :  { %v3203_v6 = vpop.xlane.xlu0 %3202 }
 0x2c2   :  { %5139 = vpow2.f32 %v4166_v14  ;;  %v3382_v30 = vadd.f32 %v7136_v58, %v3203_v6 }
 0x2c3   :  { %v3206_v51 = vpop.xlane.xlu1 %3205 }
 0x2c4   :  { %v4171_v20 = vmul.f32 -1.442695, %v3382_v30  ;;  %v3383_v19 = vadd.f32 %v7136_v58, %v3206_v51 }
 0x2c5   :  { %v3197_v53 = vpop.xlane.xlu0 %3196 }
 0x2c6   :  { %5141 = vpow2.f32 %v4171_v20  ;;  %v4172_v0 = vmul.f32 -1.442695, %v3383_v19  ;;  %v3380_v63 = vadd.f32 %v7136_v58, %v3197_v53 }
 0x2c7   :  { %v3200_v40 = vpop.xlane.xlu1 %3199 }
 0x2c8   :  { %5143 = vpow2.f32 %v4172_v0  ;;  %v4169_v36 = vmul.f32 -1.442695, %v3380_v63  ;;  %v3381_v44 = vadd.f32 %v7136_v58, %v3200_v40 }
 0x2c9   :  { %v5134_v29 = vpop.eup %5133  ;;  %v3215_v46 = vpop.xlane.xlu0 %3214 }
 0x2ca   :  { %v3634_v28 = vadd.f32 1.0, %v5134_v29  ;;  %5145 = vpow2.f32 %v4169_v36  ;;  %v4170_v21 = vmul.f32 -1.442695, %v3381_v44  ;;  %v3386_v62 = vadd.f32 %v7136_v58, %v3215_v46 }
 0x2cb   :  { %v5136_v15 = vpop.eup %5135  ;;  %v3218_v27 = vpop.xlane.xlu1 %3217 }
 0x2cc   :  { %5147 = vrcp.f32 %v3634_v28  ;;  %v3632_v25 = vadd.f32 1.0, %v5136_v15  ;;  %v4175_v8 = vmul.f32 -1.442695, %v3386_v62  ;;  %v3387_v47 = vadd.f32 %v7136_v58, %v3218_v27 }
 0x2cd   :  { %v5138_v11 = vpop.eup %5137  ;;  %5149 = vpow2.f32 %v4170_v21  ;;  %v3209_v33 = vpop.xlane.xlu0 %3208 }
 0x2ce   :  { %5151 = vrcp.f32 %v3632_v25  ;;  %v3635_v39 = vadd.f32 1.0, %v5138_v11  ;;  %v4176_v26 = vmul.f32 -1.442695, %v3387_v47  ;;  %v3384_v60 = vadd.f32 %v7136_v58, %v3209_v33 }
 0x2cf   :  { %v5140_v9 = vpop.eup %5139  ;;  %5153 = vpow2.f32 %v4175_v8  ;;  %v3212_v13 = vpop.xlane.xlu1 %3211 }
 0x2d0   :  { %5155 = vrcp.f32 %v3635_v39  ;;  %v3633_v17 = vadd.f32 1.0, %v5140_v9  ;;  %v4173_v16 = vmul.f32 -1.442695, %v3384_v60  ;;  %v3385_v12 = vadd.f32 %v7136_v58, %v3212_v13 }
 0x2d1   :  { %5157 = vpow2.f32 %v4176_v26  ;;  %v3227_v22 = vpop.xlane.xlu0 %3226 }
 0x2d2   :  { %5159 = vrcp.f32 %v3633_v17  ;;  %v4174_v52 = vmul.f32 -1.442695, %v3385_v12  ;;  %v3390_v32 = vadd.f32 %v7136_v58, %v3227_v22 }
 0x2d3   :  { %v5142_v34 = vpop.eup %5141  ;;  %5161 = vpow2.f32 %v4173_v16  ;;  %v3230_v24 = vpop.xlane.xlu1 %3229 }
 0x2d4   :  { %v3638_v43 = vadd.f32 1.0, %v5142_v34  ;;  %5163 = vpow2.f32 %v4174_v52  ;;  %v4179_v57 = vmul.f32 -1.442695, %v3390_v32  ;;  %v3391_v1 = vadd.f32 %v7136_v58, %v3230_v24 }
 0x2d5   :  { %v5144_v35 = vpop.eup %5143  ;;  %v3221_v45 = vpop.xlane.xlu0 %3220 }
 0x2d6   :  { %5165 = vrcp.f32 %v3638_v43  ;;  %v3639_v10 = vadd.f32 1.0, %v5144_v35  ;;  %v4180_v55 = vmul.f32 -1.442695, %v3391_v1  ;;  %v3388_v50 = vadd.f32 %v7136_v58, %v3221_v45 }
 0x2d7   :  { %v5146_v54 = vpop.eup %5145  ;;  %5167 = vpow2.f32 %v4179_v57  ;;  %v3224_v41 = vpop.xlane.xlu1 %3223 }
 0x2d8   :  { %5169 = vrcp.f32 %v3639_v10  ;;  %v3636_v59 = vadd.f32 1.0, %v5146_v54  ;;  %v4177_v49 = vmul.f32 -1.442695, %v3388_v50  ;;  %v3389_v56 = vadd.f32 %v7136_v58, %v3224_v41 }
 0x2d9   :  { %v5148_v5 = vpop.eup %5147  ;;  %5171 = vpow2.f32 %v4180_v55  ;;  %v3239_v31 = vpop.xlane.xlu0 %3238 }
 0x2da   :  { %v5150_v7 = vpop.eup %5149  ;;  %3827 = vst.msk [vmem:[%s7471_s13 + $0x10] sm:$0xff] %vm3824_vm2, %v5148_v5  ;;  %5173 = vrcp.f32 %v3636_v59  ;;  %v4178_v38 = vmul.f32 -1.442695, %v3389_v56  ;;  %v3394_v3 = vadd.f32 %v7136_v58, %v3239_v31 }
 0x2db   :  { %v5152_v61 = vpop.eup %5151  ;;  %v3637_v23 = vadd.f32 1.0, %v5150_v7  ;;  %5175 = vpow2.f32 %v4177_v49  ;;  %v3242_v4 = vpop.xlane.xlu1 %3241 }
 0x2dc   :  { %v5154_v37 = vpop.eup %5153  ;;  %3825 = vst.msk [vmem:[%s7471_s13] sm:$0xff] %vm3824_vm2, %v5152_v61  ;;  %5177 = vpow2.f32 %v4178_v38  ;;  %v4183_v2 = vmul.f32 -1.442695, %v3394_v3  ;;  %v3395_v48 = vadd.f32 %v7136_v58, %v3242_v4 }
 0x2dd   :  { %v5156_v42 = vpop.eup %5155  ;;  %5179 = vrcp.f32 %v3637_v23  ;;  %v3642_v18 = vadd.f32 1.0, %v5154_v37  ;;  %v3233_v14 = vpop.xlane.xlu0 %3232 }
 0x2de   :  { %v5158_v6 = vpop.eup %5157  ;;  %3828 = vst.msk [vmem:[%s7471_s13 + $0x18] sm:$0xff] %vm3824_vm2, %v5156_v42  ;;  %5181 = vpow2.f32 %v4183_v2  ;;  %v4184_v30 = vmul.f32 -1.442695, %v3395_v48  ;;  %v3392_v51 = vadd.f32 %v7136_v58, %v3233_v14 }
 0x2df   :  { %v5160_v20 = vpop.eup %5159  ;;  %5183 = vrcp.f32 %v3642_v18  ;;  %v3643_v19 = vadd.f32 1.0, %v5158_v6  ;;  %v3236_v53 = vpop.xlane.xlu1 %3235 }
 0x2e0   :  { %v5162_v0 = vpop.eup %5161  ;;  %3826 = vst.msk [vmem:[%s7471_s13 + $0x8] sm:$0xff] %vm3824_vm2, %v5160_v20  ;;  %5185 = vpow2.f32 %v4184_v30  ;;  %v4181_v63 = vmul.f32 -1.442695, %v3392_v51  ;;  %v3393_v40 = vadd.f32 %v7136_v58, %v3236_v53 }
 0x2e1   :  { %v5164_v36 = vpop.eup %5163  ;;  %5187 = vrcp.f32 %v3643_v19  ;;  %v3640_v44 = vadd.f32 1.0, %v5162_v0  ;;  %v3251_v29 = vpop.xlane.xlu0 %3250 }
 0x2e2   :  { %v3641_v46 = vadd.f32 1.0, %v5164_v36  ;;  %5189 = vpow2.f32 %v4181_v63  ;;  %v4182_v28 = vmul.f32 -1.442695, %v3393_v40  ;;  %v3398_v21 = vadd.f32 %v7136_v58, %v3251_v29 }
 0x2e3   :  { %v5166_v62 = vpop.eup %5165  ;;  %5191 = vrcp.f32 %v3640_v44  ;;  %v3254_v15 = vpop.xlane.xlu1 %3253 }
 0x2e4   :  { %v5168_v27 = vpop.eup %5167  ;;  %3831 = vst.msk [vmem:[%s7471_s13 + $0x30] sm:$0xff] %vm3824_vm2, %v5166_v62  ;;  %5193 = vrcp.f32 %v3641_v46  ;;  %v4187_v25 = vmul.f32 -1.442695, %v3398_v21  ;;  %v3399_v8 = vadd.f32 %v7136_v58, %v3254_v15 }
 0x2e5   :  { %v5170_v47 = vpop.eup %5169  ;;  %v3646_v11 = vadd.f32 1.0, %v5168_v27  ;;  %5195 = vpow2.f32 %v4182_v28  ;;  %v3245_v33 = vpop.xlane.xlu0 %3244 }
 0x2e6   :  { %v5172_v39 = vpop.eup %5171  ;;  %3832 = vst.msk [vmem:[%s7471_s13 + $0x38] sm:$0xff] %vm3824_vm2, %v5170_v47  ;;  %5197 = vpow2.f32 %v4187_v25  ;;  %v4188_v26 = vmul.f32 -1.442695, %v3399_v8  ;;  %v3396_v60 = vadd.f32 %v7136_v58, %v3245_v33 }
 0x2e7   :  { %v5174_v9 = vpop.eup %5173  ;;  %5199 = vrcp.f32 %v3646_v11  ;;  %v3647_v13 = vadd.f32 1.0, %v5172_v39  ;;  %v3248_v17 = vpop.xlane.xlu1 %3247 }
 0x2e8   :  { %v5176_v16 = vpop.eup %5175  ;;  %3829 = vst.msk [vmem:[%s7471_s13 + $0x20] sm:$0xff] %vm3824_vm2, %v5174_v9  ;;  %5201 = vpow2.f32 %v4188_v26  ;;  %v4185_v12 = vmul.f32 -1.442695, %v3396_v60  ;;  %v3397_v22 = vadd.f32 %v7136_v58, %v3248_v17 }
 0x2e9   :  { %v5178_v52 = vpop.eup %5177  ;;  %5203 = vrcp.f32 %v3647_v13  ;;  %v3644_v32 = vadd.f32 1.0, %v5176_v16  ;;  %v3263_v34 = vpop.xlane.xlu0 %3262 }
 0x2ea   :  { %v5180_v24 = vpop.eup %5179  ;;  %v3645_v43 = vadd.f32 1.0, %v5178_v52  ;;  %5205 = vpow2.f32 %v4185_v12  ;;  %v4186_v57 = vmul.f32 -1.442695, %v3397_v22  ;;  %v3402_v1 = vadd.f32 %v7136_v58, %v3263_v34 }
 0x2eb   :  { %v5182_v35 = vpop.eup %5181  ;;  %3830 = vst.msk [vmem:[%s7471_s13 + $0x28] sm:$0xff] %vm3824_vm2, %v5180_v24  ;;  %5207 = vrcp.f32 %v3644_v32  ;;  %v3266_v45 = vpop.xlane.xlu1 %3265 }
 0x2ec   :  { %v5184_v10 = vpop.eup %5183  ;;  %5209 = vrcp.f32 %v3645_v43  ;;  %v3650_v55 = vadd.f32 1.0, %v5182_v35  ;;  %v4191_v50 = vmul.f32 -1.442695, %v3402_v1  ;;  %v3403_v54 = vadd.f32 %v7136_v58, %v3266_v45 }
 0x2ed   :  { %v5186_v41 = vpop.eup %5185  ;;  %3835 = vst.msk [vmem:[%s7471_s13 + $0x50] sm:$0xff] %vm3824_vm2, %v5184_v10  ;;  %5211 = vpow2.f32 %v4186_v57  ;;  %v3257_v59 = vpop.xlane.xlu0 %3256 }
 0x2ee   :  { %v5188_v49 = vpop.eup %5187  ;;  %5213 = vrcp.f32 %v3650_v55  ;;  %v3651_v56 = vadd.f32 1.0, %v5186_v41  ;;  %v4192_v5 = vmul.f32 -1.442695, %v3403_v54  ;;  %v3400_v31 = vadd.f32 %v7136_v58, %v3257_v59 }
 0x2ef   :  { %v5190_v7 = vpop.eup %5189  ;;  %3836 = vst.msk [vmem:[%s7471_s13 + $0x58] sm:$0xff] %vm3824_vm2, %v5188_v49  ;;  %5215 = vpow2.f32 %v4191_v50  ;;  %v3260_v38 = vpop.xlane.xlu1 %3259 }
 0x2f0   :  { %v5192_v3 = vpop.eup %5191  ;;  %5217 = vrcp.f32 %v3651_v56  ;;  %v3648_v61 = vadd.f32 1.0, %v5190_v7  ;;  %v4189_v23 = vmul.f32 -1.442695, %v3400_v31  ;;  %v3401_v4 = vadd.f32 %v7136_v58, %v3260_v38 }
 0x2f1   :  { %v5194_v37 = vpop.eup %5193  ;;  %3833 = vst.msk [vmem:[%s7471_s13 + $0x40] sm:$0xff] %vm3824_vm2, %v5192_v3  ;;  %5219 = vpow2.f32 %v4192_v5  ;;  %v3275_v2 = vpop.xlane.xlu0 %3274 }
 0x2f2   :  { %v5196_v48 = vpop.eup %5195  ;;  %3834 = vst.msk [vmem:[%s7471_s13 + $0x48] sm:$0xff] %vm3824_vm2, %v5194_v37  ;;  %5221 = vrcp.f32 %v3648_v61  ;;  %v4190_v42 = vmul.f32 -1.442695, %v3401_v4  ;;  %v3406_v18 = vadd.f32 %v7136_v58, %v3275_v2 }
 0x2f3   :  { %v5198_v14 = vpop.eup %5197  ;;  %v3649_v6 = vadd.f32 1.0, %v5196_v48  ;;  %5223 = vpow2.f32 %v4189_v23  ;;  %v3278_v30 = vpop.xlane.xlu1 %3277 }
 0x2f4   :  { %v5200_v51 = vpop.eup %5199  ;;  %v3654_v20 = vadd.f32 1.0, %v5198_v14  ;;  %5225 = vpow2.f32 %v4190_v42  ;;  %v4195_v19 = vmul.f32 -1.442695, %v3406_v18  ;;  %v3407_v53 = vadd.f32 %v7136_v58, %v3278_v30 }
 0x2f5   :  { %v5202_v0 = vpop.eup %5201  ;;  %3839 = vst.msk [vmem:[%s7471_s13 + $0x70] sm:$0xff] %vm3824_vm2, %v5200_v51  ;;  %5227 = vrcp.f32 %v3649_v6  ;;  %v3269_v63 = vpop.xlane.xlu0 %3268 }
 0x2f6   :  { %v5204_v40 = vpop.eup %5203  ;;  %5229 = vrcp.f32 %v3654_v20  ;;  %v3655_v36 = vadd.f32 1.0, %v5202_v0  ;;  %v4196_v44 = vmul.f32 -1.442695, %v3407_v53  ;;  %v3404_v29 = vadd.f32 %v7136_v58, %v3269_v63 }
 0x2f7   :  { %v5206_v46 = vpop.eup %5205  ;;  %3840 = vst.msk [vmem:[%s7471_s13 + $0x78] sm:$0xff] %vm3824_vm2, %v5204_v40  ;;  %5231 = vpow2.f32 %v4195_v19  ;;  %v3272_v28 = vpop.xlane.xlu1 %3271 }
 0x2f8   :  { %v5208_v21 = vpop.eup %5207  ;;  %5233 = vrcp.f32 %v3655_v36  ;;  %v3652_v62 = vadd.f32 1.0, %v5206_v46  ;;  %v4193_v15 = vmul.f32 -1.442695, %v3404_v29  ;;  %v3405_v27 = vadd.f32 %v7136_v58, %v3272_v28 }
 0x2f9   :  { %v5210_v25 = vpop.eup %5209  ;;  %3837 = vst.msk [vmem:[%s7471_s13 + $0x60] sm:$0xff] %vm3824_vm2, %v5208_v21  ;;  %5235 = vpow2.f32 %v4196_v44  ;;  %v3287_v8 = vpop.xlane.xlu0 %3286 }
 0x2fa   :  { %v5212_v47 = vpop.eup %5211  ;;  %3838 = vst.msk [vmem:[%s7471_s13 + $0x68] sm:$0xff] %vm3824_vm2, %v5210_v25  ;;  %5237 = vrcp.f32 %v3652_v62  ;;  %v4194_v11 = vmul.f32 -1.442695, %v3405_v27  ;;  %v3410_v33 = vadd.f32 %v7136_v58, %v3287_v8 }
 0x2fb   :  { %v5214_v39 = vpop.eup %5213  ;;  %v3653_v26 = vadd.f32 1.0, %v5212_v47  ;;  %5239 = vpow2.f32 %v4193_v15  ;;  %v3290_v60 = vpop.xlane.xlu1 %3289 }
 0x2fc   :  { %v5216_v9 = vpop.eup %5215  ;;  %3843 = vst.msk [vmem:[%s7471_s13 + $0x90] sm:$0xff] %vm3824_vm2, %v5214_v39  ;;  %5241 = vpow2.f32 %v4194_v11  ;;  %v4199_v13 = vmul.f32 -1.442695, %v3410_v33  ;;  %v3411_v17 = vadd.f32 %v7136_v58, %v3290_v60 }
 0x2fd   :  { %v5218_v16 = vpop.eup %5217  ;;  %5243 = vrcp.f32 %v3653_v26  ;;  %v3658_v12 = vadd.f32 1.0, %v5216_v9  ;;  %v3281_v22 = vpop.xlane.xlu0 %3280 }
 0x2fe   :  { %v5220_v52 = vpop.eup %5219  ;;  %3844 = vst.msk [vmem:[%s7471_s13 + $0x98] sm:$0xff] %vm3824_vm2, %v5218_v16  ;;  %5245 = vpow2.f32 %v4199_v13  ;;  %v4200_v32 = vmul.f32 -1.442695, %v3411_v17  ;;  %v3408_v34 = vadd.f32 %v7136_v58, %v3281_v22 }
 0x2ff   :  { %v5222_v24 = vpop.eup %5221  ;;  %5247 = vrcp.f32 %v3658_v12  ;;  %v3659_v43 = vadd.f32 1.0, %v5220_v52  ;;  %v3284_v57 = vpop.xlane.xlu1 %3283 }
 0x300   :  { %v5224_v1 = vpop.eup %5223  ;;  %3841 = vst.msk [vmem:[%s7471_s13 + $0x80] sm:$0xff] %vm3824_vm2, %v5222_v24  ;;  %5249 = vpow2.f32 %v4200_v32  ;;  %v4197_v35 = vmul.f32 -1.442695, %v3408_v34  ;;  %v3409_v45 = vadd.f32 %v7136_v58, %v3284_v57 }
 0x301   :  { %v5226_v10 = vpop.eup %5225  ;;  %5251 = vrcp.f32 %v3659_v43  ;;  %v3656_v55 = vadd.f32 1.0, %v5224_v1  ;;  %v3299_v50 = vpop.xlane.xlu0 %3298 }
 0x302   :  { %v5228_v54 = vpop.eup %5227  ;;  %v3657_v41 = vadd.f32 1.0, %v5226_v10  ;;  %5253 = vpow2.f32 %v4197_v35  ;;  %v4198_v59 = vmul.f32 -1.442695, %v3409_v45  ;;  %v3414_v49 = vadd.f32 %v7136_v58, %v3299_v50 }
 0x303   :  { %v5230_v56 = vpop.eup %5229  ;;  %3842 = vst.msk [vmem:[%s7471_s13 + $0x88] sm:$0xff] %vm3824_vm2, %v5228_v54  ;;  %5255 = vrcp.f32 %v3656_v55  ;;  %v3302_v5 = vpop.xlane.xlu1 %3301 }
 0x304   :  { %v5232_v31 = vpop.eup %5231  ;;  %3847 = vst.msk [vmem:[%s7471_s13 + $0xb0] sm:$0xff] %vm3824_vm2, %v5230_v56  ;;  %5257 = vrcp.f32 %v3657_v41  ;;  %v4203_v7 = vmul.f32 -1.442695, %v3414_v49  ;;  %v3415_v38 = vadd.f32 %v7136_v58, %v3302_v5 }
 0x305   :  { %v5234_v3 = vpop.eup %5233  ;;  %v3662_v61 = vadd.f32 1.0, %v5232_v31  ;;  %5259 = vpow2.f32 %v4198_v59  ;;  %v3293_v23 = vpop.xlane.xlu0 %3292 }
 0x306   :  { %v5236_v4 = vpop.eup %5235  ;;  %3848 = vst.msk [vmem:[%s7471_s13 + $0xb8] sm:$0xff] %vm3824_vm2, %v5234_v3  ;;  %5261 = vpow2.f32 %v4203_v7  ;;  %v4204_v37 = vmul.f32 -1.442695, %v3415_v38  ;;  %v3412_v2 = vadd.f32 %v7136_v58, %v3293_v23 }
 0x307   :  { %v5238_v48 = vpop.eup %5237  ;;  %5263 = vrcp.f32 %v3662_v61  ;;  %v3663_v42 = vadd.f32 1.0, %v5236_v4  ;;  %v3296_v18 = vpop.xlane.xlu1 %3295 }
 0x308   :  { %v5240_v14 = vpop.eup %5239  ;;  %3845 = vst.msk [vmem:[%s7471_s13 + $0xa0] sm:$0xff] %vm3824_vm2, %v5238_v48  ;;  %5265 = vpow2.f32 %v4204_v37  ;;  %v4201_v6 = vmul.f32 -1.442695, %v3412_v2  ;;  %v3413_v30 = vadd.f32 %v7136_v58, %v3296_v18 }
 0x309   :  { %v5242_v51 = vpop.eup %5241  ;;  %5267 = vrcp.f32 %v3663_v42  ;;  %v3660_v20 = vadd.f32 1.0, %v5240_v14  ;;  %v3311_v19 = vpop.xlane.xlu0 %3310 }
 0x30a   :  { %v5244_v53 = vpop.eup %5243  ;;  %v3661_v0 = vadd.f32 1.0, %v5242_v51  ;;  %5269 = vpow2.f32 %v4201_v6  ;;  %v4202_v63 = vmul.f32 -1.442695, %v3413_v30  ;;  %v3418_v40 = vadd.f32 %v7136_v58, %v3311_v19 }
 0x30b   :  { %v5246_v36 = vpop.eup %5245  ;;  %3846 = vst.msk [vmem:[%s7471_s13 + $0xa8] sm:$0xff] %vm3824_vm2, %v5244_v53  ;;  %5271 = vrcp.f32 %v3660_v20  ;;  %v3314_v44 = vpop.xlane.xlu1 %3313 }
 0x30c   :  { %v5248_v29 = vpop.eup %5247  ;;  %5273 = vrcp.f32 %v3661_v0  ;;  %v3666_v46 = vadd.f32 1.0, %v5246_v36  ;;  %v4207_v28 = vmul.f32 -1.442695, %v3418_v40  ;;  %v3419_v21 = vadd.f32 %v7136_v58, %v3314_v44 }
 0x30d   :  { %v5250_v62 = vpop.eup %5249  ;;  %3851 = vst.msk [vmem:[%s7471_s13 + $0xd0] sm:$0xff] %vm3824_vm2, %v5248_v29  ;;  %5275 = vpow2.f32 %v4202_v63  ;;  %v3305_v15 = vpop.xlane.xlu0 %3304 }
 0x30e   :  { %v5252_v27 = vpop.eup %5251  ;;  %5277 = vrcp.f32 %v3666_v46  ;;  %v3667_v25 = vadd.f32 1.0, %v5250_v62  ;;  %v4208_v8 = vmul.f32 -1.442695, %v3419_v21  ;;  %v3416_v47 = vadd.f32 %v7136_v58, %v3305_v15 }
 0x30f   :  { %v5254_v11 = vpop.eup %5253  ;;  %3852 = vst.msk [vmem:[%s7471_s13 + $0xd8] sm:$0xff] %vm3824_vm2, %v5252_v27  ;;  %5279 = vpow2.f32 %v4207_v28  ;;  %v3308_v33 = vpop.xlane.xlu1 %3307 }
 0x310   :  { %v5256_v39 = vpop.eup %5255  ;;  %5281 = vrcp.f32 %v3667_v25  ;;  %v3664_v26 = vadd.f32 1.0, %v5254_v11  ;;  %v4205_v60 = vmul.f32 -1.442695, %v3416_v47  ;;  %v3417_v9 = vadd.f32 %v7136_v58, %v3308_v33 }
 0x311   :  { %v5258_v13 = vpop.eup %5257  ;;  %3849 = vst.msk [vmem:[%s7471_s13 + $0xc0] sm:$0xff] %vm3824_vm2, %v5256_v39  ;;  %5283 = vpow2.f32 %v4208_v8  ;;  %v3323_v17 = vpop.xlane.xlu0 %3322 }
 0x312   :  { %v5260_v16 = vpop.eup %5259  ;;  %3850 = vst.msk [vmem:[%s7471_s13 + $0xc8] sm:$0xff] %vm3824_vm2, %v5258_v13  ;;  %5285 = vrcp.f32 %v3664_v26  ;;  %v4206_v12 = vmul.f32 -1.442695, %v3417_v9  ;;  %v3422_v22 = vadd.f32 %v7136_v58, %v3323_v17 }
 0x313   :  { %v5262_v52 = vpop.eup %5261  ;;  %v3665_v32 = vadd.f32 1.0, %v5260_v16  ;;  %5287 = vpow2.f32 %v4205_v60  ;;  %v3326_v34 = vpop.xlane.xlu1 %3325 }
 0x314   :  { %v5264_v24 = vpop.eup %5263  ;;  %v3670_v43 = vadd.f32 1.0, %v5262_v52  ;;  %5289 = vpow2.f32 %v4206_v12  ;;  %v4211_v57 = vmul.f32 -1.442695, %v3422_v22  ;;  %v3423_v1 = vadd.f32 %v7136_v58, %v3326_v34 }
 0x315   :  { %v5266_v35 = vpop.eup %5265  ;;  %3855 = vst.msk [vmem:[%s7471_s13 + $0xf0] sm:$0xff] %vm3824_vm2, %v5264_v24  ;;  %5291 = vrcp.f32 %v3665_v32  ;;  %v3317_v45 = vpop.xlane.xlu0 %3316 }
 0x316   :  { %v5268_v10 = vpop.eup %5267  ;;  %5293 = vrcp.f32 %v3670_v43  ;;  %v3671_v55 = vadd.f32 1.0, %v5266_v35  ;;  %v4212_v50 = vmul.f32 -1.442695, %v3423_v1  ;;  %v3420_v54 = vadd.f32 %v7136_v58, %v3317_v45 }
 0x317   :  { %v5270_v41 = vpop.eup %5269  ;;  %3856 = vst.msk [vmem:[%s7471_s13 + $0xf8] sm:$0xff] %vm3824_vm2, %v5268_v10  ;;  %5295 = vpow2.f32 %v4211_v57  ;;  %v3320_v59 = vpop.xlane.xlu1 %3319 }
 0x318   :  { %v5272_v49 = vpop.eup %5271  ;;  %5297 = vrcp.f32 %v3671_v55  ;;  %v3668_v56 = vadd.f32 1.0, %v5270_v41  ;;  %v4209_v5 = vmul.f32 -1.442695, %v3420_v54  ;;  %v3421_v31 = vadd.f32 %v7136_v58, %v3320_v59 }
 0x319   :  { %v5274_v7 = vpop.eup %5273  ;;  %3853 = vst.msk [vmem:[%s7471_s13 + $0xe0] sm:$0xff] %vm3824_vm2, %v5272_v49  ;;  %5299 = vpow2.f32 %v4212_v50  ;;  %v3335_v38 = vpop.xlane.xlu0 %3334 }
 0x31a   :  { %v5276_v3 = vpop.eup %5275  ;;  %3854 = vst.msk [vmem:[%s7471_s13 + $0xe8] sm:$0xff] %vm3824_vm2, %v5274_v7  ;;  %5301 = vrcp.f32 %v3668_v56  ;;  %v4210_v61 = vmul.f32 -1.442695, %v3421_v31  ;;  %v3426_v23 = vadd.f32 %v7136_v58, %v3335_v38 }
 0x31b   :  { %v5278_v4 = vpop.eup %5277  ;;  %v3669_v37 = vadd.f32 1.0, %v5276_v3  ;;  %5303 = vpow2.f32 %v4209_v5  ;;  %v3338_v2 = vpop.xlane.xlu1 %3337 }
 0x31c   :  { %v5280_v48 = vpop.eup %5279  ;;  %3859 = vst.msk [vmem:[%s7471_s13 + $0x110] sm:$0xff] %vm3824_vm2, %v5278_v4  ;;  %5305 = vpow2.f32 %v4210_v61  ;;  %v4215_v42 = vmul.f32 -1.442695, %v3426_v23  ;;  %v3427_v18 = vadd.f32 %v7136_v58, %v3338_v2 }
 0x31d   :  { %v5282_v14 = vpop.eup %5281  ;;  %5307 = vrcp.f32 %v3669_v37  ;;  %v3674_v6 = vadd.f32 1.0, %v5280_v48  ;;  %v3329_v30 = vpop.xlane.xlu0 %3328 }
 0x31e   :  { %v5284_v51 = vpop.eup %5283  ;;  %3860 = vst.msk [vmem:[%s7471_s13 + $0x118] sm:$0xff] %vm3824_vm2, %v5282_v14  ;;  %5309 = vpow2.f32 %v4215_v42  ;;  %v4216_v20 = vmul.f32 -1.442695, %v3427_v18  ;;  %v3424_v19 = vadd.f32 %v7136_v58, %v3329_v30 }
 0x31f   :  { %v5286_v53 = vpop.eup %5285  ;;  %5311 = vrcp.f32 %v3674_v6  ;;  %v3675_v0 = vadd.f32 1.0, %v5284_v51  ;;  %v3332_v63 = vpop.xlane.xlu1 %3331 }
 0x320   :  { %v5288_v40 = vpop.eup %5287  ;;  %3857 = vst.msk [vmem:[%s7471_s13 + $0x100] sm:$0xff] %vm3824_vm2, %v5286_v53  ;;  %5313 = vpow2.f32 %v4216_v20  ;;  %v4213_v36 = vmul.f32 -1.442695, %v3424_v19  ;;  %v3425_v44 = vadd.f32 %v7136_v58, %v3332_v63 }
 0x321   :  { %v5290_v29 = vpop.eup %5289  ;;  %5315 = vrcp.f32 %v3675_v0  ;;  %v3672_v46 = vadd.f32 1.0, %v5288_v40  ;;  %v3347_v28 = vpop.xlane.xlu0 %3346 }
 0x322   :  { %v5292_v21 = vpop.eup %5291  ;;  %v3673_v62 = vadd.f32 1.0, %v5290_v29  ;;  %5317 = vpow2.f32 %v4213_v36  ;;  %v4214_v15 = vmul.f32 -1.442695, %v3425_v44  ;;  %v3430_v27 = vadd.f32 %v7136_v58, %v3347_v28 }
 0x323   :  { %v5294_v25 = vpop.eup %5293  ;;  %3858 = vst.msk [vmem:[%s7471_s13 + $0x108] sm:$0xff] %vm3824_vm2, %v5292_v21  ;;  %5319 = vrcp.f32 %v3672_v46  ;;  %v3350_v8 = vpop.xlane.xlu1 %3349 }
 0x324   :  { %v5296_v47 = vpop.eup %5295  ;;  %3863 = vst.msk [vmem:[%s7471_s13 + $0x130] sm:$0xff] %vm3824_vm2, %v5294_v25  ;;  %5321 = vrcp.f32 %v3673_v62  ;;  %v4219_v11 = vmul.f32 -1.442695, %v3430_v27  ;;  %v3431_v33 = vadd.f32 %v7136_v58, %v3350_v8 }
 0x325   :  { %v5298_v39 = vpop.eup %5297  ;;  %v3678_v26 = vadd.f32 1.0, %v5296_v47  ;;  %5323 = vpow2.f32 %v4214_v15  ;;  %v3341_v60 = vpop.xlane.xlu0 %3340 }
 0x326   :  { %v5300_v9 = vpop.eup %5299  ;;  %3864 = vst.msk [vmem:[%s7471_s13 + $0x138] sm:$0xff] %vm3824_vm2, %v5298_v39  ;;  %5325 = vpow2.f32 %v4219_v11  ;;  %v4220_v13 = vmul.f32 -1.442695, %v3431_v33  ;;  %v3428_v17 = vadd.f32 %v7136_v58, %v3341_v60 }
 0x327   :  { %v5302_v16 = vpop.eup %5301  ;;  %5327 = vrcp.f32 %v3678_v26  ;;  %v3679_v12 = vadd.f32 1.0, %v5300_v9  ;;  %v3344_v22 = vpop.xlane.xlu1 %3343 }
 0x328   :  { %v5304_v52 = vpop.eup %5303  ;;  %3861 = vst.msk [vmem:[%s7471_s13 + $0x120] sm:$0xff] %vm3824_vm2, %v5302_v16  ;;  %5329 = vpow2.f32 %v4220_v13  ;;  %v4217_v32 = vmul.f32 -1.442695, %v3428_v17  ;;  %v3429_v34 = vadd.f32 %v7136_v58, %v3344_v22 }
 0x329   :  { %v5306_v24 = vpop.eup %5305  ;;  %5331 = vrcp.f32 %v3679_v12  ;;  %v3676_v43 = vadd.f32 1.0, %v5304_v52  ;;  %v3359_v57 = vpop.xlane.xlu0 %3358 }
 0x32a   :  { %v5308_v1 = vpop.eup %5307  ;;  %v3677_v35 = vadd.f32 1.0, %v5306_v24  ;;  %5333 = vpow2.f32 %v4217_v32  ;;  %v4218_v45 = vmul.f32 -1.442695, %v3429_v34  ;;  %v3434_v10 = vadd.f32 %v7136_v58, %v3359_v57 }
 0x32b   :  { %v5310_v55 = vpop.eup %5309  ;;  %3862 = vst.msk [vmem:[%s7471_s13 + $0x128] sm:$0xff] %vm3824_vm2, %v5308_v1  ;;  %5335 = vrcp.f32 %v3676_v43  ;;  %v3362_v50 = vpop.xlane.xlu1 %3361 }
 0x32c   :  { %v5312_v54 = vpop.eup %5311  ;;  %5337 = vrcp.f32 %v3677_v35  ;;  %v3682_v41 = vadd.f32 1.0, %v5310_v55  ;;  %v4223_v59 = vmul.f32 -1.442695, %v3434_v10  ;;  %v3435_v49 = vadd.f32 %v7136_v58, %v3362_v50 }
 0x32d   :  { %v5314_v56 = vpop.eup %5313  ;;  %3867 = vst.msk [vmem:[%s7471_s13 + $0x150] sm:$0xff] %vm3824_vm2, %v5312_v54  ;;  %5339 = vpow2.f32 %v4218_v45  ;;  %v3353_v5 = vpop.xlane.xlu0 %3352 }
 0x32e   :  { %v5316_v31 = vpop.eup %5315  ;;  %5341 = vrcp.f32 %v3682_v41  ;;  %v3683_v7 = vadd.f32 1.0, %v5314_v56  ;;  %v4224_v38 = vmul.f32 -1.442695, %v3435_v49  ;;  %v3432_v3 = vadd.f32 %v7136_v58, %v3353_v5 }
 0x32f   :  { %v5318_v61 = vpop.eup %5317  ;;  %3868 = vst.msk [vmem:[%s7471_s13 + $0x158] sm:$0xff] %vm3824_vm2, %v5316_v31  ;;  %5343 = vpow2.f32 %v4223_v59  ;;  %v3356_v23 = vpop.xlane.xlu1 %3355 }
 0x330   :  { %v5320_v4 = vpop.eup %5319  ;;  %5345 = vrcp.f32 %v3683_v7  ;;  %v3680_v37 = vadd.f32 1.0, %v5318_v61  ;;  %v4221_v2 = vmul.f32 -1.442695, %v3432_v3  ;;  %v3433_v48 = vadd.f32 %v7136_v58, %v3356_v23 }
 0x331   :  { %v5322_v42 = vpop.eup %5321  ;;  %3865 = vst.msk [vmem:[%s7471_s13 + $0x140] sm:$0xff] %vm3824_vm2, %v5320_v4  ;;  %5347 = vpow2.f32 %v4224_v38  ;;  %v3365_v18 = vpop.xlane.xlu0 %3364 }
 0x332   :  { %v5324_v14 = vpop.eup %5323  ;;  %3866 = vst.msk [vmem:[%s7471_s13 + $0x148] sm:$0xff] %vm3824_vm2, %v5322_v42  ;;  %5349 = vrcp.f32 %v3680_v37  ;;  %v4222_v6 = vmul.f32 -1.442695, %v3433_v48  ;;  %v3436_v30 = vadd.f32 %v7136_v58, %v3365_v18 }
 0x333   :  { %v5326_v51 = vpop.eup %5325  ;;  %v3681_v20 = vadd.f32 1.0, %v5324_v14  ;;  %5351 = vpow2.f32 %v4221_v2 }
 0x334   :  { %v5328_v19 = vpop.eup %5327  ;;  %v3686_v53 = vadd.f32 1.0, %v5326_v51  ;;  %5353 = vpow2.f32 %v4222_v6  ;;  %v4225_v0 = vmul.f32 -1.442695, %v3436_v30 }
 0x335   :  { %v5330_v63 = vpop.eup %5329  ;;  %3871 = vst.msk [vmem:[%s7471_s13 + $0x170] sm:$0xff] %vm3824_vm2, %v5328_v19  ;;  %5355 = vrcp.f32 %v3681_v20  ;;  %v3368_v40 = vpop.xlane.xlu1 %3367 }
 0x336   :  { %v3371_v36 = vpop.xlane.xlu0 %3370  ;;  %v5332_v44 = vpop.eup %5331  ;;  %5357 = vrcp.f32 %v3686_v53  ;;  %v3687_v29 = vadd.f32 1.0, %v5330_v63  ;;  %v3437_v46 = vadd.f32 %v7136_v58, %v3368_v40 }
 0x337   :  { %v3438_v28 = vadd.f32 %v7136_v58, %v3371_v36  ;;  %v5334_v21 = vpop.eup %5333  ;;  %3872 = vst.msk [vmem:[%s7471_s13 + $0x178] sm:$0xff] %vm3824_vm2, %v5332_v44  ;;  %5359 = vpow2.f32 %v4225_v0 }
 0x338   :  { %v5336_v62 = vpop.eup %5335  ;;  %5361 = vrcp.f32 %v3687_v29  ;;  %v3684_v15 = vadd.f32 1.0, %v5334_v21  ;;  %v4226_v27 = vmul.f32 -1.442695, %v3437_v46 }
 0x339   :  { %v4227_v25 = vmul.f32 -1.442695, %v3438_v28  ;;  %v5338_v8 = vpop.eup %5337  ;;  %3869 = vst.msk [vmem:[%s7471_s13 + $0x160] sm:$0xff] %vm3824_vm2, %v5336_v62  ;;  %v3374_v47 = vpop.xlane.xlu1 %3373 }
 0x33a   :  { %v5340_v11 = vpop.eup %5339  ;;  %3870 = vst.msk [vmem:[%s7471_s13 + $0x168] sm:$0xff] %vm3824_vm2, %v5338_v8  ;;  %5363 = vrcp.f32 %v3684_v15  ;;  %v3439_v33 = vadd.f32 %v7136_v58, %v3374_v47 }
 0x33b   :  { %v5342_v39 = vpop.eup %5341  ;;  %v3685_v26 = vadd.f32 1.0, %v5340_v11  ;;  %5365 = vpow2.f32 %v4226_v27 }
 0x33c   :  { %v5344_v60 = vpop.eup %5343  ;;  %3875 = vst.msk [vmem:[%s7471_s13 + $0x190] sm:$0xff] %vm3824_vm2, %v5342_v39  ;;  %5367 = vpow2.f32 %v4227_v25  ;;  %v4228_v9 = vmul.f32 -1.442695, %v3439_v33 }
 0x33d   :  { %v5346_v13 = vpop.eup %5345  ;;  %5369 = vrcp.f32 %v3685_v26  ;;  %v3690_v17 = vadd.f32 1.0, %v5344_v60 }
 0x33e   :  { %v5348_v16 = vpop.eup %5347  ;;  %3876 = vst.msk [vmem:[%s7471_s13 + $0x198] sm:$0xff] %vm3824_vm2, %v5346_v13  ;;  %5371 = vpow2.f32 %v4228_v9 }
 0x33f   :  { %v5350_v58 = vpop.eup %5349  ;;  %5373 = vrcp.f32 %v3690_v17  ;;  %v3691_v12 = vadd.f32 1.0, %v5348_v16 }
 0x340   :  { %v5352_v22 = vpop.eup %5351  ;;  %3873 = vst.msk [vmem:[%s7471_s13 + $0x180] sm:$0xff] %vm3824_vm2, %v5350_v58 }
 0x341   :  { %v5354_v52 = vpop.eup %5353  ;;  %5375 = vrcp.f32 %v3691_v12  ;;  %v3688_v32 = vadd.f32 1.0, %v5352_v22 }
 0x342   :  { %v5356_v34 = vpop.eup %5355  ;;  %v3689_v24 = vadd.f32 1.0, %v5354_v52 }
 0x343   :  { %v5358_v43 = vpop.eup %5357  ;;  %3874 = vst.msk [vmem:[%s7471_s13 + $0x188] sm:$0xff] %vm3824_vm2, %v5356_v34  ;;  %5377 = vrcp.f32 %v3688_v32 }
 0x344   :  { %v5360_v57 = vpop.eup %5359  ;;  %3879 = vst.msk [vmem:[%s7471_s13 + $0x1b0] sm:$0xff] %vm3824_vm2, %v5358_v43  ;;  %5379 = vrcp.f32 %v3689_v24 }
 0x345   :  { %v5362_v1 = vpop.eup %5361  ;;  %v3692_v35 = vadd.f32 1.0, %v5360_v57 }
 0x346   :  { %3880 = vst.msk [vmem:[%s7471_s13 + $0x1b8] sm:$0xff] %vm3824_vm2, %v5362_v1 }
 0x347   :  { %v5364_v45 = vpop.eup %5363  ;;  %5381 = vrcp.f32 %v3692_v35 }
 0x348   :  { %v5366_v10 = vpop.eup %5365  ;;  %3877 = vst.msk [vmem:[%s7471_s13 + $0x1a0] sm:$0xff] %vm3824_vm2, %v5364_v45 }
 0x349   :  { %v5368_v55 = vpop.eup %5367  ;;  %v3693_v50 = vadd.f32 1.0, %v5366_v10 }
 0x34a   :  { %v5370_v54 = vpop.eup %5369  ;;  %v3694_v41 = vadd.f32 1.0, %v5368_v55 }
 0x34b   :  { %v5372_v59 = vpop.eup %5371  ;;  %3878 = vst.msk [vmem:[%s7471_s13 + $0x1a8] sm:$0xff] %vm3824_vm2, %v5370_v54  ;;  %5383 = vrcp.f32 %v3693_v50 }
 0x34c   :  { %v5374_v49 = vpop.eup %5373  ;;  %5385 = vrcp.f32 %v3694_v41  ;;  %v3695_v56 = vadd.f32 1.0, %v5372_v59 }
 0x34d   :  { %3883 = vst.msk [vmem:[%s7471_s13 + $0x1d0] sm:$0xff] %vm3824_vm2, %v5374_v49 }
 0x34e   :  { %v5376_v5 = vpop.eup %5375  ;;  %5387 = vrcp.f32 %v3695_v56 }
 0x34f   :  { %3884 = vst.msk [vmem:[%s7471_s13 + $0x1d8] sm:$0xff] %vm3824_vm2, %v5376_v5 }
 0x350   :  { %v5378_v31 = vpop.eup %5377 }
 0x351   :  { %v5380_v7 = vpop.eup %5379  ;;  %3881 = vst.msk [vmem:[%s7471_s13 + $0x1c0] sm:$0xff] %vm3824_vm2, %v5378_v31 }
 0x352   :  { %3882 = vst.msk [vmem:[%s7471_s13 + $0x1c8] sm:$0xff] %vm3824_vm2, %v5380_v7 }
 0x354   :  { %v5382_v38 = vpop.eup %5381 }
 0x355   :  { %3885 = vst.msk [vmem:[%s7471_s13 + $0x1e0] sm:$0xff] %vm3824_vm2, %v5382_v38 }
 0x358   :  { %v5384_v3 = vpop.eup %5383 }
 0x359   :  { %v5386_v61 = vpop.eup %5385  ;;  %3886 = vst.msk [vmem:[%s7471_s13 + $0x1e8] sm:$0xff] %vm3824_vm2, %v5384_v3 }
 0x35a   :  { %3887 = vst.msk [vmem:[%s7471_s13 + $0x1f0] sm:$0xff] %vm3824_vm2, %v5386_v61 }
 0x35b   :  { %v5388_v23 = vpop.eup %5387 }
 0x35c   :  { %3888 = vst.msk [vmem:[%s7471_s13 + $0x1f8] sm:$0xff] %vm3824_vm2, %v5388_v23 }
 0x35d   :  { %3893 = vsyncpa [#allocation3], 1 }

</bundles_post_ra>
